<compile_context>
chip_gen: v7x
topology: tpu7x:2x2x1
jax: 0.10.0
libtpu: 0.0.40
codegen_flags: <defaults>
</compile_context>

<pallas_src>
import jax
import jax.numpy as jnp
from jax.experimental import pallas as pl
from jax.experimental.pallas import tpu as pltpu

SHIFT = 1  # stand-in for the module's random shift_direction (+1 or -1)


def _fused_conv_kernel(w_ref, x_ref, o_ref, xpad_ref, xcol_ref):
    """Fused roll + pad + im2col + 3x3 conv as one MXU matmul.

    w_ref:    (256, 1152) bf16  fused weight, (Cout, [kh, kw, Cin]).
    x_ref:    (128, 196)  f32   raw input, spatial flattened (q = h*14 + w).
    o_ref:    (256, 256)  f32   (Cout, p) with p = m*16 + n; columns with
                                m >= 14 or n >= 14 are zero-tap garbage and
                                are cropped by the caller.
    xpad_ref: (128, 384)  f32   scratch: rolled(+1,+1) + zero-padded input,
                                spatial flattened with row stride 16.
    xcol_ref: (1152, 256) bf16  scratch: im2col slab, rows = [tap, Cin].
    """
    # ---- rolled & zero-padded slab (static slice copies, SHIFT=+1 baked in) ----
    xpad_ref[...] = jnp.zeros_like(xpad_ref)
    for a in range(1, 15):               # padded H index (interior rows 1..14)
        r = (a - 2) % 14                 # source row after H-roll by +1
        d = a * 16                       # dest lane base (row stride 16)
        s = r * 14                       # src  lane base (row stride 14)
        # W-roll by +1: dest cols 2..14 <- src cols 0..12, dest col 1 <- src col 13
        xpad_ref[:, d + 2:d + 15] = x_ref[:, s:s + 13]
        xpad_ref[:, d + 1:d + 2] = x_ref[:, s + 13:s + 14]

    # ---- im2col: nine shifted copies into the (1152, 256) bf16 slab ----
    for kh in range(3):
        for kw in range(3):
            t = kh * 3 + kw
            off = kh * 16 + kw
            xcol_ref[t * 128:(t + 1) * 128, :] = (
                xpad_ref[:, off:off + 256].astype(jnp.bfloat16))

    # ---- single K=1152 MXU matmul, f32 accumulation, single output store ----
    o_ref[...] = jnp.dot(w_ref[...], xcol_ref[...],
                         preferred_element_type=jnp.float32)


def fused_conv(wmat_bf16, x_flat):
    return pl.pallas_call(
        _fused_conv_kernel,
        out_shape=jax.ShapeDtypeStruct((256, 256), jnp.float32),
        in_specs=[pl.BlockSpec(memory_space=pltpu.MemorySpace.VMEM),
                  pl.BlockSpec(memory_space=pltpu.MemorySpace.VMEM)],
        out_specs=pl.BlockSpec(memory_space=pltpu.MemorySpace.VMEM),
        scratch_shapes=[pltpu.VMEM((128, 384), jnp.float32),
                        pltpu.VMEM((1152, 256), jnp.bfloat16)],
    )(wmat_bf16, x_flat)


def fuse_weights(w1, w2):
    """Fold the two einsum weights over the shared size-4 axis.

    Weff[o, kh, kw, g, c4] = sum_i w1[o, g, kh, kw, i] * w2[g*4+c4, kh, i]
    Depends only on the parameters -> cacheable across forward passes.
    """
    w2r = w2.reshape(32, 4, 3, 4)                              # (g, c4, kh, i)
    weff = jnp.einsum('oghwi,gchi->ohwgc', w1, w2r,
                      precision=jax.lax.Precision.HIGHEST)     # (256,3,3,32,4)
    return weff.reshape(256, 1152).astype(jnp.bfloat16)        # (Cout,[kh,kw,Cin])


def kernel_generated_3_forward(x, w1, w2):
    """x: (1,128,14,14) f32 NCHW, w1: (256,32,3,3,4), w2: (128,3,4)."""
    C, H, W = 128, 14, 14
    wmat = fuse_weights(w1, w2)           # cacheable parameter-only prologue
    xflat = x.reshape(C, H * W)           # metadata-only reshape of NCHW input
    out = fused_conv(wmat, xflat)         # (256, 256) f32, (Cout, 16*16)
    # Epilogue: reshape (metadata) + crop of the zero-pad garbage columns.
    return out.reshape(256, 16, 16)[:, :H, :W][None]           # (1,256,14,14)


def reference_forward(x, w1, w2):
    """Direct JAX transcription of the PyTorch graph (for verification)."""
    t3 = jnp.roll(x, SHIFT, axis=2)
    t3 = t3.reshape(1, 128, 14, 14)
    t3p = jnp.pad(t3, ((0, 0), (0, 0), (1, 1), (0, 0)))
    t3u = jnp.stack([t3p[:, :, k:k + 14, :] for k in range(3)], axis=2)
    t4 = jnp.einsum('ljkmn,jki->ljkmni', t3u, w2,
                    precision=jax.lax.Precision.HIGHEST)
    t5 = t4.reshape(1, 32, 4, 3, 14, 14, 4).sum(axis=2)
    t6 = jnp.roll(t5, SHIFT, axis=4)
    t6 = t6.reshape(1, 1344, 14, 4)
    t6p = jnp.pad(t6, ((0, 0), (0, 0), (1, 1), (0, 0)))
    t6u = jnp.stack([t6p[:, :, k:k + 14, :] for k in range(3)], axis=2)
    t6r = t6u.reshape(1, 32, 3, 14, 3, 14, 4)
    y = jnp.einsum('nlkojpm,ilkjm->niop', t6r, w1,
                   precision=jax.lax.Precision.HIGHEST)
    return y


if __name__ == "__main__":
    key = jax.random.PRNGKey(0)
    kx, k1, k2 = jax.random.split(key, 3)
    # Shapes are forced by the module's internal reshapes.
    x = jax.random.normal(kx, (1, 128, 14, 14), jnp.float32)
    w1 = jax.random.normal(k1, (256, 32, 3, 3, 4), jnp.float32)   # weights[0]
    w2 = jax.random.normal(k2, (128, 3, 4), jnp.float32)          # weights[1]

    y = jax.jit(kernel_generated_3_forward)(x, w1, w2)
    y = jax.block_until_ready(y)
    assert y.shape == (1, 256, 14, 14) and y.dtype == jnp.float32

    y_ref = reference_forward(x, w1, w2)
    rel_err = jnp.max(jnp.abs(y - y_ref)) / (jnp.max(jnp.abs(y_ref)) + 1e-6)
    assert float(rel_err) < 1e-2, f"max relative error too large: {float(rel_err)}"

    print("KERNEL_OK")
</pallas_src>

<mosaic_0001>
module attributes {stable_mosaic.version = 11 : i64} {
  func.func @_fused_conv_kernel(%arg0: memref<256x1152xbf16, #tpu.memory_space<vmem>>, %arg1: memref<128x196xf32, #tpu.memory_space<vmem>>, %arg2: memref<256x256xf32, #tpu.memory_space<vmem>>, %arg3: memref<128x384xf32, #tpu.memory_space<vmem>>, %arg4: memref<1152x256xbf16, #tpu.memory_space<vmem>>) attributes {dimension_semantics = [], scalar_prefetch = 0 : i64, scratch_operands = 2 : i64, tpu.core_type = #tpu.core_type<tc>} {
    %cst = arith.constant 0.000000e+00 : f32
    %0 = vector.broadcast %cst : f32 to vector<128x384xf32>
    %c0 = arith.constant 0 : index
    %c0_0 = arith.constant 0 : index
    %1 = vector.load %arg3[%c0, %c0_0] : memref<128x384xf32, #tpu.memory_space<vmem>>, vector<128x384xf32>
    tpu.vector_store %arg3[%c0, %c0_0], %0 {strides = array<i32>} : memref<128x384xf32, #tpu.memory_space<vmem>>, vector<128x384xf32>,
    %c0_1 = arith.constant 0 : index
    %c182 = arith.constant 182 : index
    %2 = vector.load %arg1[%c0_1, %c182] : memref<128x196xf32, #tpu.memory_space<vmem>>, vector<128x13xf32>
    %c0_2 = arith.constant 0 : index
    %c18 = arith.constant 18 : index
    %3 = vector.load %arg3[%c0_2, %c18] : memref<128x384xf32, #tpu.memory_space<vmem>>, vector<128x13xf32>
    tpu.vector_store %arg3[%c0_2, %c18], %2 {strides = array<i32>} : memref<128x384xf32, #tpu.memory_space<vmem>>, vector<128x13xf32>,
    %c0_3 = arith.constant 0 : index
    %c195 = arith.constant 195 : index
    %4 = vector.load %arg1[%c0_3, %c195] : memref<128x196xf32, #tpu.memory_space<vmem>>, vector<128x1xf32>
    %c0_4 = arith.constant 0 : index
    %c17 = arith.constant 17 : index
    %5 = vector.load %arg3[%c0_4, %c17] : memref<128x384xf32, #tpu.memory_space<vmem>>, vector<128x1xf32>
    tpu.vector_store %arg3[%c0_4, %c17], %4 {strides = array<i32>} : memref<128x384xf32, #tpu.memory_space<vmem>>, vector<128x1xf32>,
    %c0_5 = arith.constant 0 : index
    %c0_6 = arith.constant 0 : index
    %6 = vector.load %arg1[%c0_5, %c0_6] : memref<128x196xf32, #tpu.memory_space<vmem>>, vector<128x13xf32>
    %c0_7 = arith.constant 0 : index
    %c34 = arith.constant 34 : index
    %7 = vector.load %arg3[%c0_7, %c34] : memref<128x384xf32, #tpu.memory_space<vmem>>, vector<128x13xf32>
    tpu.vector_store %arg3[%c0_7, %c34], %6 {strides = array<i32>} : memref<128x384xf32, #tpu.memory_space<vmem>>, vector<128x13xf32>,
    %c0_8 = arith.constant 0 : index
    %c13 = arith.constant 13 : index
    %8 = vector.load %arg1[%c0_8, %c13] : memref<128x196xf32, #tpu.memory_space<vmem>>, vector<128x1xf32>
    %c0_9 = arith.constant 0 : index
    %c33 = arith.constant 33 : index
    %9 = vector.load %arg3[%c0_9, %c33] : memref<128x384xf32, #tpu.memory_space<vmem>>, vector<128x1xf32>
    tpu.vector_store %arg3[%c0_9, %c33], %8 {strides = array<i32>} : memref<128x384xf32, #tpu.memory_space<vmem>>, vector<128x1xf32>,
    %c0_10 = arith.constant 0 : index
    %c14 = arith.constant 14 : index
    %10 = vector.load %arg1[%c0_10, %c14] : memref<128x196xf32, #tpu.memory_space<vmem>>, vector<128x13xf32>
    %c0_11 = arith.constant 0 : index
    %c50 = arith.constant 50 : index
    %11 = vector.load %arg3[%c0_11, %c50] : memref<128x384xf32, #tpu.memory_space<vmem>>, vector<128x13xf32>
    tpu.vector_store %arg3[%c0_11, %c50], %10 {strides = array<i32>} : memref<128x384xf32, #tpu.memory_space<vmem>>, vector<128x13xf32>,
    %c0_12 = arith.constant 0 : index
    %c27 = arith.constant 27 : index
    %12 = vector.load %arg1[%c0_12, %c27] : memref<128x196xf32, #tpu.memory_space<vmem>>, vector<128x1xf32>
    %c0_13 = arith.constant 0 : index
    %c49 = arith.constant 49 : index
    %13 = vector.load %arg3[%c0_13, %c49] : memref<128x384xf32, #tpu.memory_space<vmem>>, vector<128x1xf32>
    tpu.vector_store %arg3[%c0_13, %c49], %12 {strides = array<i32>} : memref<128x384xf32, #tpu.memory_space<vmem>>, vector<128x1xf32>,
    %c0_14 = arith.constant 0 : index
    %c28 = arith.constant 28 : index
    %14 = vector.load %arg1[%c0_14, %c28] : memref<128x196xf32, #tpu.memory_space<vmem>>, vector<128x13xf32>
    %c0_15 = arith.constant 0 : index
    %c66 = arith.constant 66 : index
    %15 = vector.load %arg3[%c0_15, %c66] : memref<128x384xf32, #tpu.memory_space<vmem>>, vector<128x13xf32>
    tpu.vector_store %arg3[%c0_15, %c66], %14 {strides = array<i32>} : memref<128x384xf32, #tpu.memory_space<vmem>>, vector<128x13xf32>,
    %c0_16 = arith.constant 0 : index
    %c41 = arith.constant 41 : index
    %16 = vector.load %arg1[%c0_16, %c41] : memref<128x196xf32, #tpu.memory_space<vmem>>, vector<128x1xf32>
    %c0_17 = arith.constant 0 : index
    %c65 = arith.constant 65 : index
    %17 = vector.load %arg3[%c0_17, %c65] : memref<128x384xf32, #tpu.memory_space<vmem>>, vector<128x1xf32>
    tpu.vector_store %arg3[%c0_17, %c65], %16 {strides = array<i32>} : memref<128x384xf32, #tpu.memory_space<vmem>>, vector<128x1xf32>,
    %c0_18 = arith.constant 0 : index
    %c42 = arith.constant 42 : index
    %18 = vector.load %arg1[%c0_18, %c42] : memref<128x196xf32, #tpu.memory_space<vmem>>, vector<128x13xf32>
    %c0_19 = arith.constant 0 : index
    %c82 = arith.constant 82 : index
    %19 = vector.load %arg3[%c0_19, %c82] : memref<128x384xf32, #tpu.memory_space<vmem>>, vector<128x13xf32>
    tpu.vector_store %arg3[%c0_19, %c82], %18 {strides = array<i32>} : memref<128x384xf32, #tpu.memory_space<vmem>>, vector<128x13xf32>,
    %c0_20 = arith.constant 0 : index
    %c55 = arith.constant 55 : index
    %20 = vector.load %arg1[%c0_20, %c55] : memref<128x196xf32, #tpu.memory_space<vmem>>, vector<128x1xf32>
    %c0_21 = arith.constant 0 : index
    %c81 = arith.constant 81 : index
    %21 = vector.load %arg3[%c0_21, %c81] : memref<128x384xf32, #tpu.memory_space<vmem>>, vector<128x1xf32>
    tpu.vector_store %arg3[%c0_21, %c81], %20 {strides = array<i32>} : memref<128x384xf32, #tpu.memory_space<vmem>>, vector<128x1xf32>,
    %c0_22 = arith.constant 0 : index
    %c56 = arith.constant 56 : index
    %22 = vector.load %arg1[%c0_22, %c56] : memref<128x196xf32, #tpu.memory_space<vmem>>, vector<128x13xf32>
    %c0_23 = arith.constant 0 : index
    %c98 = arith.constant 98 : index
    %23 = vector.load %arg3[%c0_23, %c98] : memref<128x384xf32, #tpu.memory_space<vmem>>, vector<128x13xf32>
    tpu.vector_store %arg3[%c0_23, %c98], %22 {strides = array<i32>} : memref<128x384xf32, #tpu.memory_space<vmem>>, vector<128x13xf32>,
    %c0_24 = arith.constant 0 : index
    %c69 = arith.constant 69 : index
    %24 = vector.load %arg1[%c0_24, %c69] : memref<128x196xf32, #tpu.memory_space<vmem>>, vector<128x1xf32>
    %c0_25 = arith.constant 0 : index
    %c97 = arith.constant 97 : index
    %25 = vector.load %arg3[%c0_25, %c97] : memref<128x384xf32, #tpu.memory_space<vmem>>, vector<128x1xf32>
    tpu.vector_store %arg3[%c0_25, %c97], %24 {strides = array<i32>} : memref<128x384xf32, #tpu.memory_space<vmem>>, vector<128x1xf32>,
    %c0_26 = arith.constant 0 : index
    %c70 = arith.constant 70 : index
    %26 = vector.load %arg1[%c0_26, %c70] : memref<128x196xf32, #tpu.memory_space<vmem>>, vector<128x13xf32>
    %c0_27 = arith.constant 0 : index
    %c114 = arith.constant 114 : index
    %27 = vector.load %arg3[%c0_27, %c114] : memref<128x384xf32, #tpu.memory_space<vmem>>, vector<128x13xf32>
    tpu.vector_store %arg3[%c0_27, %c114], %26 {strides = array<i32>} : memref<128x384xf32, #tpu.memory_space<vmem>>, vector<128x13xf32>,
    %c0_28 = arith.constant 0 : index
    %c83 = arith.constant 83 : index
    %28 = vector.load %arg1[%c0_28, %c83] : memref<128x196xf32, #tpu.memory_space<vmem>>, vector<128x1xf32>
    %c0_29 = arith.constant 0 : index
    %c113 = arith.constant 113 : index
    %29 = vector.load %arg3[%c0_29, %c113] : memref<128x384xf32, #tpu.memory_space<vmem>>, vector<128x1xf32>
    tpu.vector_store %arg3[%c0_29, %c113], %28 {strides = array<i32>} : memref<128x384xf32, #tpu.memory_space<vmem>>, vector<128x1xf32>,
    %c0_30 = arith.constant 0 : index
    %c84 = arith.constant 84 : index
    %30 = vector.load %arg1[%c0_30, %c84] : memref<128x196xf32, #tpu.memory_space<vmem>>, vector<128x13xf32>
    %c0_31 = arith.constant 0 : index
    %c130 = arith.constant 130 : index
    %31 = vector.load %arg3[%c0_31, %c130] : memref<128x384xf32, #tpu.memory_space<vmem>>, vector<128x13xf32>
    tpu.vector_store %arg3[%c0_31, %c130], %30 {strides = array<i32>} : memref<128x384xf32, #tpu.memory_space<vmem>>, vector<128x13xf32>,
    %c0_32 = arith.constant 0 : index
    %c97_33 = arith.constant 97 : index
    %32 = vector.load %arg1[%c0_32, %c97_33] : memref<128x196xf32, #tpu.memory_space<vmem>>, vector<128x1xf32>
    %c0_34 = arith.constant 0 : index
    %c129 = arith.constant 129 : index
    %33 = vector.load %arg3[%c0_34, %c129] : memref<128x384xf32, #tpu.memory_space<vmem>>, vector<128x1xf32>
    tpu.vector_store %arg3[%c0_34, %c129], %32 {strides = array<i32>} : memref<128x384xf32, #tpu.memory_space<vmem>>, vector<128x1xf32>,
    %c0_35 = arith.constant 0 : index
    %c98_36 = arith.constant 98 : index
    %34 = vector.load %arg1[%c0_35, %c98_36] : memref<128x196xf32, #tpu.memory_space<vmem>>, vector<128x13xf32>
    %c0_37 = arith.constant 0 : index
    %c146 = arith.constant 146 : index
    %35 = vector.load %arg3[%c0_37, %c146] : memref<128x384xf32, #tpu.memory_space<vmem>>, vector<128x13xf32>
    tpu.vector_store %arg3[%c0_37, %c146], %34 {strides = array<i32>} : memref<128x384xf32, #tpu.memory_space<vmem>>, vector<128x13xf32>,
    %c0_38 = arith.constant 0 : index
    %c111 = arith.constant 111 : index
    %36 = vector.load %arg1[%c0_38, %c111] : memref<128x196xf32, #tpu.memory_space<vmem>>, vector<128x1xf32>
    %c0_39 = arith.constant 0 : index
    %c145 = arith.constant 145 : index
    %37 = vector.load %arg3[%c0_39, %c145] : memref<128x384xf32, #tpu.memory_space<vmem>>, vector<128x1xf32>
    tpu.vector_store %arg3[%c0_39, %c145], %36 {strides = array<i32>} : memref<128x384xf32, #tpu.memory_space<vmem>>, vector<128x1xf32>,
    %c0_40 = arith.constant 0 : index
    %c112 = arith.constant 112 : index
    %38 = vector.load %arg1[%c0_40, %c112] : memref<128x196xf32, #tpu.memory_space<vmem>>, vector<128x13xf32>
    %c0_41 = arith.constant 0 : index
    %c162 = arith.constant 162 : index
    %39 = vector.load %arg3[%c0_41, %c162] : memref<128x384xf32, #tpu.memory_space<vmem>>, vector<128x13xf32>
    tpu.vector_store %arg3[%c0_41, %c162], %38 {strides = array<i32>} : memref<128x384xf32, #tpu.memory_space<vmem>>, vector<128x13xf32>,
    %c0_42 = arith.constant 0 : index
    %c125 = arith.constant 125 : index
    %40 = vector.load %arg1[%c0_42, %c125] : memref<128x196xf32, #tpu.memory_space<vmem>>, vector<128x1xf32>
    %c0_43 = arith.constant 0 : index
    %c161 = arith.constant 161 : index
    %41 = vector.load %arg3[%c0_43, %c161] : memref<128x384xf32, #tpu.memory_space<vmem>>, vector<128x1xf32>
    tpu.vector_store %arg3[%c0_43, %c161], %40 {strides = array<i32>} : memref<128x384xf32, #tpu.memory_space<vmem>>, vector<128x1xf32>,
    %c0_44 = arith.constant 0 : index
    %c126 = arith.constant 126 : index
    %42 = vector.load %arg1[%c0_44, %c126] : memref<128x196xf32, #tpu.memory_space<vmem>>, vector<128x13xf32>
    %c0_45 = arith.constant 0 : index
    %c178 = arith.constant 178 : index
    %43 = vector.load %arg3[%c0_45, %c178] : memref<128x384xf32, #tpu.memory_space<vmem>>, vector<128x13xf32>
    tpu.vector_store %arg3[%c0_45, %c178], %42 {strides = array<i32>} : memref<128x384xf32, #tpu.memory_space<vmem>>, vector<128x13xf32>,
    %c0_46 = arith.constant 0 : index
    %c139 = arith.constant 139 : index
    %44 = vector.load %arg1[%c0_46, %c139] : memref<128x196xf32, #tpu.memory_space<vmem>>, vector<128x1xf32>
    %c0_47 = arith.constant 0 : index
    %c177 = arith.constant 177 : index
    %45 = vector.load %arg3[%c0_47, %c177] : memref<128x384xf32, #tpu.memory_space<vmem>>, vector<128x1xf32>
    tpu.vector_store %arg3[%c0_47, %c177], %44 {strides = array<i32>} : memref<128x384xf32, #tpu.memory_space<vmem>>, vector<128x1xf32>,
    %c0_48 = arith.constant 0 : index
    %c140 = arith.constant 140 : index
    %46 = vector.load %arg1[%c0_48, %c140] : memref<128x196xf32, #tpu.memory_space<vmem>>, vector<128x13xf32>
    %c0_49 = arith.constant 0 : index
    %c194 = arith.constant 194 : index
    %47 = vector.load %arg3[%c0_49, %c194] : memref<128x384xf32, #tpu.memory_space<vmem>>, vector<128x13xf32>
    tpu.vector_store %arg3[%c0_49, %c194], %46 {strides = array<i32>} : memref<128x384xf32, #tpu.memory_space<vmem>>, vector<128x13xf32>,
    %c0_50 = arith.constant 0 : index
    %c153 = arith.constant 153 : index
    %48 = vector.load %arg1[%c0_50, %c153] : memref<128x196xf32, #tpu.memory_space<vmem>>, vector<128x1xf32>
    %c0_51 = arith.constant 0 : index
    %c193 = arith.constant 193 : index
    %49 = vector.load %arg3[%c0_51, %c193] : memref<128x384xf32, #tpu.memory_space<vmem>>, vector<128x1xf32>
    tpu.vector_store %arg3[%c0_51, %c193], %48 {strides = array<i32>} : memref<128x384xf32, #tpu.memory_space<vmem>>, vector<128x1xf32>,
    %c0_52 = arith.constant 0 : index
    %c154 = arith.constant 154 : index
    %50 = vector.load %arg1[%c0_52, %c154] : memref<128x196xf32, #tpu.memory_space<vmem>>, vector<128x13xf32>
    %c0_53 = arith.constant 0 : index
    %c210 = arith.constant 210 : index
    %51 = vector.load %arg3[%c0_53, %c210] : memref<128x384xf32, #tpu.memory_space<vmem>>, vector<128x13xf32>
    tpu.vector_store %arg3[%c0_53, %c210], %50 {strides = array<i32>} : memref<128x384xf32, #tpu.memory_space<vmem>>, vector<128x13xf32>,
    %c0_54 = arith.constant 0 : index
    %c167 = arith.constant 167 : index
    %52 = vector.load %arg1[%c0_54, %c167] : memref<128x196xf32, #tpu.memory_space<vmem>>, vector<128x1xf32>
    %c0_55 = arith.constant 0 : index
    %c209 = arith.constant 209 : index
    %53 = vector.load %arg3[%c0_55, %c209] : memref<128x384xf32, #tpu.memory_space<vmem>>, vector<128x1xf32>
    tpu.vector_store %arg3[%c0_55, %c209], %52 {strides = array<i32>} : memref<128x384xf32, #tpu.memory_space<vmem>>, vector<128x1xf32>,
    %c0_56 = arith.constant 0 : index
    %c168 = arith.constant 168 : index
    %54 = vector.load %arg1[%c0_56, %c168] : memref<128x196xf32, #tpu.memory_space<vmem>>, vector<128x13xf32>
    %c0_57 = arith.constant 0 : index
    %c226 = arith.constant 226 : index
    %55 = vector.load %arg3[%c0_57, %c226] : memref<128x384xf32, #tpu.memory_space<vmem>>, vector<128x13xf32>
    tpu.vector_store %arg3[%c0_57, %c226], %54 {strides = array<i32>} : memref<128x384xf32, #tpu.memory_space<vmem>>, vector<128x13xf32>,
    %c0_58 = arith.constant 0 : index
    %c181 = arith.constant 181 : index
    %56 = vector.load %arg1[%c0_58, %c181] : memref<128x196xf32, #tpu.memory_space<vmem>>, vector<128x1xf32>
    %c0_59 = arith.constant 0 : index
    %c225 = arith.constant 225 : index
    %57 = vector.load %arg3[%c0_59, %c225] : memref<128x384xf32, #tpu.memory_space<vmem>>, vector<128x1xf32>
    tpu.vector_store %arg3[%c0_59, %c225], %56 {strides = array<i32>} : memref<128x384xf32, #tpu.memory_space<vmem>>, vector<128x1xf32>,
    %c0_60 = arith.constant 0 : index
    %c0_61 = arith.constant 0 : index
    %58 = vector.load %arg3[%c0_60, %c0_61] : memref<128x384xf32, #tpu.memory_space<vmem>>, vector<128x256xf32>
    %59 = arith.truncf %58 : vector<128x256xf32> to vector<128x256xbf16>
    %c0_62 = arith.constant 0 : index
    %c0_63 = arith.constant 0 : index
    %60 = vector.load %arg4[%c0_62, %c0_63] : memref<1152x256xbf16, #tpu.memory_space<vmem>>, vector<128x256xbf16>
    tpu.vector_store %arg4[%c0_62, %c0_63], %59 {strides = array<i32>} : memref<1152x256xbf16, #tpu.memory_space<vmem>>, vector<128x256xbf16>,
    %c0_64 = arith.constant 0 : index
    %c1 = arith.constant 1 : index
    %61 = vector.load %arg3[%c0_64, %c1] : memref<128x384xf32, #tpu.memory_space<vmem>>, vector<128x256xf32>
    %62 = arith.truncf %61 : vector<128x256xf32> to vector<128x256xbf16>
    %c128 = arith.constant 128 : index
    %c0_65 = arith.constant 0 : index
    %63 = vector.load %arg4[%c128, %c0_65] : memref<1152x256xbf16, #tpu.memory_space<vmem>>, vector<128x256xbf16>
    tpu.vector_store %arg4[%c128, %c0_65], %62 {strides = array<i32>} : memref<1152x256xbf16, #tpu.memory_space<vmem>>, vector<128x256xbf16>,
    %c0_66 = arith.constant 0 : index
    %c2 = arith.constant 2 : index
    %64 = vector.load %arg3[%c0_66, %c2] : memref<128x384xf32, #tpu.memory_space<vmem>>, vector<128x256xf32>
    %65 = arith.truncf %64 : vector<128x256xf32> to vector<128x256xbf16>
    %c256 = arith.constant 256 : index
    %c0_67 = arith.constant 0 : index
    %66 = vector.load %arg4[%c256, %c0_67] : memref<1152x256xbf16, #tpu.memory_space<vmem>>, vector<128x256xbf16>
    tpu.vector_store %arg4[%c256, %c0_67], %65 {strides = array<i32>} : memref<1152x256xbf16, #tpu.memory_space<vmem>>, vector<128x256xbf16>,
    %c0_68 = arith.constant 0 : index
    %c16 = arith.constant 16 : index
    %67 = vector.load %arg3[%c0_68, %c16] : memref<128x384xf32, #tpu.memory_space<vmem>>, vector<128x256xf32>
    %68 = arith.truncf %67 : vector<128x256xf32> to vector<128x256xbf16>
    %c384 = arith.constant 384 : index
    %c0_69 = arith.constant 0 : index
    %69 = vector.load %arg4[%c384, %c0_69] : memref<1152x256xbf16, #tpu.memory_space<vmem>>, vector<128x256xbf16>
    tpu.vector_store %arg4[%c384, %c0_69], %68 {strides = array<i32>} : memref<1152x256xbf16, #tpu.memory_space<vmem>>, vector<128x256xbf16>,
    %c0_70 = arith.constant 0 : index
    %c17_71 = arith.constant 17 : index
    %70 = vector.load %arg3[%c0_70, %c17_71] : memref<128x384xf32, #tpu.memory_space<vmem>>, vector<128x256xf32>
    %71 = arith.truncf %70 : vector<128x256xf32> to vector<128x256xbf16>
    %c512 = arith.constant 512 : index
    %c0_72 = arith.constant 0 : index
    %72 = vector.load %arg4[%c512, %c0_72] : memref<1152x256xbf16, #tpu.memory_space<vmem>>, vector<128x256xbf16>
    tpu.vector_store %arg4[%c512, %c0_72], %71 {strides = array<i32>} : memref<1152x256xbf16, #tpu.memory_space<vmem>>, vector<128x256xbf16>,
    %c0_73 = arith.constant 0 : index
    %c18_74 = arith.constant 18 : index
    %73 = vector.load %arg3[%c0_73, %c18_74] : memref<128x384xf32, #tpu.memory_space<vmem>>, vector<128x256xf32>
    %74 = arith.truncf %73 : vector<128x256xf32> to vector<128x256xbf16>
    %c640 = arith.constant 640 : index
    %c0_75 = arith.constant 0 : index
    %75 = vector.load %arg4[%c640, %c0_75] : memref<1152x256xbf16, #tpu.memory_space<vmem>>, vector<128x256xbf16>
    tpu.vector_store %arg4[%c640, %c0_75], %74 {strides = array<i32>} : memref<1152x256xbf16, #tpu.memory_space<vmem>>, vector<128x256xbf16>,
    %c0_76 = arith.constant 0 : index
    %c32 = arith.constant 32 : index
    %76 = vector.load %arg3[%c0_76, %c32] : memref<128x384xf32, #tpu.memory_space<vmem>>, vector<128x256xf32>
    %77 = arith.truncf %76 : vector<128x256xf32> to vector<128x256xbf16>
    %c768 = arith.constant 768 : index
    %c0_77 = arith.constant 0 : index
    %78 = vector.load %arg4[%c768, %c0_77] : memref<1152x256xbf16, #tpu.memory_space<vmem>>, vector<128x256xbf16>
    tpu.vector_store %arg4[%c768, %c0_77], %77 {strides = array<i32>} : memref<1152x256xbf16, #tpu.memory_space<vmem>>, vector<128x256xbf16>,
    %c0_78 = arith.constant 0 : index
    %c33_79 = arith.constant 33 : index
    %79 = vector.load %arg3[%c0_78, %c33_79] : memref<128x384xf32, #tpu.memory_space<vmem>>, vector<128x256xf32>
    %80 = arith.truncf %79 : vector<128x256xf32> to vector<128x256xbf16>
    %c896 = arith.constant 896 : index
    %c0_80 = arith.constant 0 : index
    %81 = vector.load %arg4[%c896, %c0_80] : memref<1152x256xbf16, #tpu.memory_space<vmem>>, vector<128x256xbf16>
    tpu.vector_store %arg4[%c896, %c0_80], %80 {strides = array<i32>} : memref<1152x256xbf16, #tpu.memory_space<vmem>>, vector<128x256xbf16>,
    %c0_81 = arith.constant 0 : index
    %c34_82 = arith.constant 34 : index
    %82 = vector.load %arg3[%c0_81, %c34_82] : memref<128x384xf32, #tpu.memory_space<vmem>>, vector<128x256xf32>
    %83 = arith.truncf %82 : vector<128x256xf32> to vector<128x256xbf16>
    %c1024 = arith.constant 1024 : index
    %c0_83 = arith.constant 0 : index
    %84 = vector.load %arg4[%c1024, %c0_83] : memref<1152x256xbf16, #tpu.memory_space<vmem>>, vector<128x256xbf16>
    tpu.vector_store %arg4[%c1024, %c0_83], %83 {strides = array<i32>} : memref<1152x256xbf16, #tpu.memory_space<vmem>>, vector<128x256xbf16>,
    %c0_84 = arith.constant 0 : index
    %c0_85 = arith.constant 0 : index
    %85 = vector.load %arg0[%c0_84, %c0_85] : memref<256x1152xbf16, #tpu.memory_space<vmem>>, vector<256x1152xbf16>
    %c0_86 = arith.constant 0 : index
    %c0_87 = arith.constant 0 : index
    %86 = vector.load %arg4[%c0_86, %c0_87] : memref<1152x256xbf16, #tpu.memory_space<vmem>>, vector<1152x256xbf16>
    %cst_88 = arith.constant dense<0.000000e+00> : vector<256x256xf32>
    %87 = tpu.matmul %85, %86, %cst_88 {dimension_numbers = #tpu.dot_dimension_numbers<[1], [0], [0], [1], [0, 0, 1, 1], [], []>} : vector<256x1152xbf16>, vector<1152x256xbf16>, vector<256x256xf32> -> vector<256x256xf32>
    %c0_89 = arith.constant 0 : index
    %c0_90 = arith.constant 0 : index
    %88 = vector.load %arg2[%c0_89, %c0_90] : memref<256x256xf32, #tpu.memory_space<vmem>>, vector<256x256xf32>
    tpu.vector_store %arg2[%c0_89, %c0_90], %87 {strides = array<i32>} : memref<256x256xf32, #tpu.memory_space<vmem>>, vector<256x256xf32>,
    return
  }
}

</mosaic_0001>

<bundles_post_ra>
// kernel: kernel_generated_3_forward.1
= control target key start
LH: loop header
LB: loop body
LE: loop exit
PB: predicated region body
PF: predicated region fallthrough
CT: control target
= control target key end

     0   :  { %v7200_v2 = vmov 0.0   ;;  %s7201_s13 = smov 92   ;;  %s7202_s15 = smov 78   ;;  %vm140_vm0 = vcmask 253072   ;;  %vm237_vm1 = vcmask 146568   ;;  %vm334_vm2 = vcmask 384272   ;;  %s10263_s1 = inlined_call_operand.vmem [shape: f32[128,196], index: 1, kind: input, shape index: {}]   ;;  %s10264_s0 = inlined_call_operand.vmem [shape: bf16[256,1152], index: 0, kind: input, shape index: {}]   ;;  %s10265_s2 = inlined_call_operand.vmem [shape: f32[256,256], index: 2, kind: output, shape index: {}]  }
   0x1   :  { %v7250_v0 = vld [vmem:[%s10263_s1 + $0x28] sm:$0xff]  ;;  %18 = vst [vmem:[#allocation2 + $0x30] sm:$0xff] %v7200_v2  ;;  %12 = vst [vmem:[#allocation2] sm:$0xff] %v7200_v2  ;;  %v63_v3 = vld [vmem:[%s10263_s1 + $0x38] sm:$0xff]  ;;  %s7203_s19 = smov 34   ;;  %s7204_s21 = smov 20  }
   0x2   :  { %v7255_v1 = vld [vmem:[%s10263_s1 + $0x8] sm:$0xff]  ;;  %13 = vst [vmem:[#allocation2 + $0x8] sm:$0xff] %v7200_v2  ;;  %14 = vst [vmem:[#allocation2 + $0x10] sm:$0xff] %v7200_v2  ;;  %96 = vrot.lane.b32.xlu1 %v7250_v0, %s7201_s13  ;;  %v61_v4 = vld [vmem:[%s10263_s1 + $0x18] sm:$0xff]  ;;  %s7205_s22 = smov 36   ;;  %s7206_s23 = smov 22  }
   0x3   :  { %15 = vst [vmem:[#allocation2 + $0x18] sm:$0xff] %v7200_v2  ;;  %16 = vst [vmem:[#allocation2 + $0x20] sm:$0xff] %v7200_v2  ;;  %92 = vrot.lane.b32.xlu0 %v7255_v1, %s7201_s13  ;;  %v65_v5 = vld [vmem:[%s10263_s1 + $0x58] sm:$0xff]  ;;  %v64_v6 = vld [vmem:[%s10263_s1 + $0x48] sm:$0xff]  ;;  %s7207_s24 = smov 38   ;;  %vm431_vm3 = vcmask 277768  }
   0x4   :  { %19 = vst [vmem:[#allocation2 + $0x38] sm:$0xff] %v7200_v2  ;;  %21 = vst [vmem:[#allocation2 + $0x48] sm:$0xff] %v7200_v2  ;;  %v67_v7 = vld [vmem:[%s10263_s1 + $0x78] sm:$0xff]  ;;  %v66_v8 = vld [vmem:[%s10263_s1 + $0x68] sm:$0xff]  ;;  %s7208_s25 = smov 24   ;;  %vm528_vm4 = vcmask 515472  }
   0x5   :  { %22 = vst [vmem:[#allocation2 + $0x50] sm:$0xff] %v7200_v2  ;;  %24 = vst [vmem:[#allocation2 + $0x60] sm:$0xff] %v7200_v2  ;;  %v69_v9 = vld [vmem:[%s10263_s1 + $0x98] sm:$0xff]  ;;  %v68_v10 = vld [vmem:[%s10263_s1 + $0x88] sm:$0xff]  ;;  %s7209_s26 = smov 40   ;;  %vm625_vm5 = vcmask 408968  }
   0x6   :  { %25 = vst [vmem:[#allocation2 + $0x68] sm:$0xff] %v7200_v2  ;;  %27 = vst [vmem:[#allocation2 + $0x78] sm:$0xff] %v7200_v2  ;;  %98 = vrot.lane.b32.xlu1 %v63_v3, %s7201_s13  ;;  %v71_v11 = vld [vmem:[%s10263_s1 + $0xb8] sm:$0xff]  ;;  %v70_v12 = vld [vmem:[%s10263_s1 + $0xa8] sm:$0xff]  ;;  %s7210_s27 = smov 26   ;;  %vm722_vm6 = vcmask 646672  }
   0x7   :  { %28 = vst [vmem:[#allocation2 + $0x80] sm:$0xff] %v7200_v2  ;;  %30 = vst [vmem:[#allocation2 + $0x90] sm:$0xff] %v7200_v2  ;;  %94 = vrot.lane.b32.xlu0 %v61_v4, %s7201_s13  ;;  %v73_v13 = vld [vmem:[%s10263_s1 + $0xd8] sm:$0xff]  ;;  %v72_v14 = vld [vmem:[%s10263_s1 + $0xc8] sm:$0xff]  ;;  %s7211_s4 = smov 42   ;;  %vm819_vm7 = vcmask 540168  }
   0x8   :  { %31 = vst [vmem:[#allocation2 + $0x98] sm:$0xff] %v7200_v2  ;;  %33 = vst [vmem:[#allocation2 + $0xa8] sm:$0xff] %v7200_v2  ;;  %v75_v15 = vld [vmem:[%s10263_s1 + $0xf8] sm:$0xff]  ;;  %v74_v16 = vld [vmem:[%s10263_s1 + $0xe8] sm:$0xff]  ;;  %s7212_s10 = smov 28   ;;  %vm916_vm8 = vcmask 777872  }
   0x9   :  { %34 = vst [vmem:[#allocation2 + $0xb0] sm:$0xff] %v7200_v2  ;;  %36 = vst [vmem:[#allocation2 + $0xc0] sm:$0xff] %v7200_v2  ;;  %v7306_v17 = vld [vmem:[%s10263_s1 + $0x10] sm:$0xff]  ;;  %v7311_v18 = vld [vmem:[%s10263_s1] sm:$0xff]  ;;  %s7213_s11 = smov 44   ;;  %vm1013_vm9 = vcmask 671368  }
   0xa   :  { %37 = vst [vmem:[#allocation2 + $0xc8] sm:$0xff] %v7200_v2  ;;  %39 = vst [vmem:[#allocation2 + $0xd8] sm:$0xff] %v7200_v2  ;;  %102 = vrot.lane.b32.xlu1 %v65_v5, %s7201_s13  ;;  %v7320_v19 = vld [vmem:[%s10263_s1 + $0x30] sm:$0xff]  ;;  %v7325_v20 = vld [vmem:[%s10263_s1 + $0x20] sm:$0xff]  ;;  %s7214_s12 = smov 30   ;;  %vm1110_vm10 = vcmask 909072  }
   0xb   :  { %40 = vst [vmem:[#allocation2 + $0xe0] sm:$0xff] %v7200_v2  ;;  %42 = vst [vmem:[#allocation2 + $0xf0] sm:$0xff] %v7200_v2  ;;  %100 = vrot.lane.b32.xlu0 %v64_v6, %s7201_s13  ;;  %v7334_v21 = vld [vmem:[%s10263_s1 + $0x50] sm:$0xff]  ;;  %v7339_v22 = vld [vmem:[%s10263_s1 + $0x40] sm:$0xff]  ;;  %s7215_s14 = smov 46   ;;  %vm1207_vm11 = vcmask 802568  }
   0xc   :  { %43 = vst [vmem:[#allocation2 + $0xf8] sm:$0xff] %v7200_v2  ;;  %45 = vst [vmem:[#allocation2 + $0x108] sm:$0xff] %v7200_v2  ;;  %v7348_v23 = vld [vmem:[%s10263_s1 + $0x70] sm:$0xff]  ;;  %v7353_v24 = vld [vmem:[%s10263_s1 + $0x60] sm:$0xff]  ;;  %vm1304_vm12 = vcmask 1040272   ;;  %vm1401_vm13 = vcmask 933768  }
   0xd   :  { %46 = vst [vmem:[#allocation2 + $0x110] sm:$0xff] %v7200_v2  ;;  %48 = vst [vmem:[#allocation2 + $0x120] sm:$0xff] %v7200_v2  ;;  %v7362_v25 = vld [vmem:[%s10263_s1 + $0x90] sm:$0xff]  ;;  %v7367_v26 = vld [vmem:[%s10263_s1 + $0x80] sm:$0xff]  ;;  %vm1498_vm14 = vcmask 121872   ;;  %s7219_s30 = smov 52  }
   0xe   :  { %49 = vst [vmem:[#allocation2 + $0x128] sm:$0xff] %v7200_v2  ;;  %51 = vst [vmem:[#allocation2 + $0x138] sm:$0xff] %v7200_v2  ;;  %106 = vrot.lane.b32.xlu1 %v67_v7, %s7201_s13  ;;  %v7376_v27 = vld [vmem:[%s10263_s1 + $0xb0] sm:$0xff]  ;;  %v7381_v28 = vld [vmem:[%s10263_s1 + $0xa0] sm:$0xff]  ;;  %vm1595_vm15 = vcmask 15368   ;;  %s7220_s6 = smov 54  }
   0xf   :  { %52 = vst [vmem:[#allocation2 + $0x140] sm:$0xff] %v7200_v2  ;;  %54 = vst [vmem:[#allocation2 + $0x150] sm:$0xff] %v7200_v2  ;;  %104 = vrot.lane.b32.xlu0 %v66_v8, %s7201_s13  ;;  %v7390_v29 = vld [vmem:[%s10263_s1 + $0xd0] sm:$0xff]  ;;  %v7395_v30 = vld [vmem:[%s10263_s1 + $0xc0] sm:$0xff]  ;;  %s7222_s17 = smov 58  }
  0x10   :  { %55 = vst [vmem:[#allocation2 + $0x158] sm:$0xff] %v7200_v2  ;;  %57 = vst [vmem:[#allocation2 + $0x168] sm:$0xff] %v7200_v2  ;;  %v7404_v31 = vld [vmem:[%s10263_s1 + $0xf0] sm:$0xff]  ;;  %v7409_v32 = vld [vmem:[%s10263_s1 + $0xe0] sm:$0xff] }
  0x11   :  { %58 = vst [vmem:[#allocation2 + $0x170] sm:$0xff] %v7200_v2 }
  0x12   :  { %110 = vrot.lane.b32.xlu1 %v69_v9, %s7201_s13 }
  0x13   :  { %108 = vrot.lane.b32.xlu0 %v68_v10, %s7201_s13 }
  0x16   :  { %114 = vrot.lane.b32.xlu1 %v71_v11, %s7201_s13 }
  0x17   :  { %112 = vrot.lane.b32.xlu0 %v70_v12, %s7201_s13 }
  0x1a   :  { %118 = vrot.lane.b32.xlu1 %v73_v13, %s7201_s13 }
  0x1b   :  { %116 = vrot.lane.b32.xlu0 %v72_v14, %s7201_s13 }
  0x1e   :  { %122 = vrot.lane.b32.xlu1 %v75_v15, %s7201_s13 }
  0x1f   :  { %120 = vrot.lane.b32.xlu0 %v74_v16, %s7201_s13  ;;  %s7217_s13 = smov 48  }
  0x22   :  { %191 = vrot.lane.b32.xlu1 %v61_v4, %s7202_s15 }
  0x23   :  { %189 = vrot.lane.b32.xlu0 %v7255_v1, %s7202_s15 }
  0x26   :  { %195 = vrot.lane.b32.xlu1 %v63_v3, %s7202_s15 }
  0x27   :  { %193 = vrot.lane.b32.xlu0 %v7250_v0, %s7202_s15 }
  0x2a   :  { %199 = vrot.lane.b32.xlu1 %v65_v5, %s7202_s15 }
  0x2b   :  { %197 = vrot.lane.b32.xlu0 %v64_v6, %s7202_s15 }
  0x2e   :  { %203 = vrot.lane.b32.xlu1 %v67_v7, %s7202_s15 }
  0x2f   :  { %201 = vrot.lane.b32.xlu0 %v66_v8, %s7202_s15 }
  0x32   :  { %207 = vrot.lane.b32.xlu1 %v69_v9, %s7202_s15 }
  0x33   :  { %205 = vrot.lane.b32.xlu0 %v68_v10, %s7202_s15 }
  0x36   :  { %211 = vrot.lane.b32.xlu1 %v71_v11, %s7202_s15 }
  0x37   :  { %209 = vrot.lane.b32.xlu0 %v70_v12, %s7202_s15 }
  0x3a   :  { %215 = vrot.lane.b32.xlu1 %v73_v13, %s7202_s15 }
  0x3b   :  { %213 = vrot.lane.b32.xlu0 %v72_v14, %s7202_s15 }
  0x3e   :  { %219 = vrot.lane.b32.xlu1 %v75_v15, %s7202_s15 }
  0x3f   :  { %217 = vrot.lane.b32.xlu0 %v74_v16, %s7202_s15  ;;  %s7216_s15 = smov 32  }
  0x42   :  { %288 = vrot.lane.b32.xlu1 %v7306_v17, %s7203_s19 }
  0x43   :  { %286 = vrot.lane.b32.xlu0 %v7311_v18, %s7203_s19 }
  0x46   :  { %292 = vrot.lane.b32.xlu1 %v7320_v19, %s7203_s19 }
  0x47   :  { %290 = vrot.lane.b32.xlu0 %v7325_v20, %s7203_s19 }
  0x4a   :  { %296 = vrot.lane.b32.xlu1 %v7334_v21, %s7203_s19 }
  0x4b   :  { %294 = vrot.lane.b32.xlu0 %v7339_v22, %s7203_s19 }
  0x4e   :  { %300 = vrot.lane.b32.xlu1 %v7348_v23, %s7203_s19 }
  0x4f   :  { %298 = vrot.lane.b32.xlu0 %v7353_v24, %s7203_s19 }
  0x52   :  { %304 = vrot.lane.b32.xlu1 %v7362_v25, %s7203_s19 }
  0x53   :  { %302 = vrot.lane.b32.xlu0 %v7367_v26, %s7203_s19 }
  0x56   :  { %308 = vrot.lane.b32.xlu1 %v7376_v27, %s7203_s19 }
  0x57   :  { %306 = vrot.lane.b32.xlu0 %v7381_v28, %s7203_s19 }
  0x5a   :  { %312 = vrot.lane.b32.xlu1 %v7390_v29, %s7203_s19 }
  0x5b   :  { %310 = vrot.lane.b32.xlu0 %v7395_v30, %s7203_s19 }
  0x5e   :  { %316 = vrot.lane.b32.xlu1 %v7404_v31, %s7203_s19 }
  0x5f   :  { %314 = vrot.lane.b32.xlu0 %v7409_v32, %s7203_s19 }
  0x62   :  { %385 = vrot.lane.b32.xlu1 %v7306_v17, %s7204_s21 }
  0x63   :  { %383 = vrot.lane.b32.xlu0 %v7311_v18, %s7204_s21 }
  0x66   :  { %389 = vrot.lane.b32.xlu1 %v7320_v19, %s7204_s21 }
  0x67   :  { %387 = vrot.lane.b32.xlu0 %v7325_v20, %s7204_s21 }
  0x6a   :  { %393 = vrot.lane.b32.xlu1 %v7334_v21, %s7204_s21 }
  0x6b   :  { %391 = vrot.lane.b32.xlu0 %v7339_v22, %s7204_s21 }
  0x6e   :  { %397 = vrot.lane.b32.xlu1 %v7348_v23, %s7204_s21 }
  0x6f   :  { %395 = vrot.lane.b32.xlu0 %v7353_v24, %s7204_s21 }
  0x72   :  { %401 = vrot.lane.b32.xlu1 %v7362_v25, %s7204_s21 }
  0x73   :  { %399 = vrot.lane.b32.xlu0 %v7367_v26, %s7204_s21 }
  0x74   :  { %v97_v33 = vpop.permute.xlu1 %96 }
  0x75   :  { %v93_v34 = vpop.permute.xlu0 %92  ;;  %143 = vst.msk [vmem:[#allocation2 + $0x30] sm:$0xff] %vm140_vm0, %v97_v33 }
  0x76   :  { %141 = vst.msk [vmem:[#allocation2] sm:$0xff] %vm140_vm0, %v93_v34  ;;  %405 = vrot.lane.b32.xlu1 %v7376_v27, %s7204_s21 }
  0x77   :  { %403 = vrot.lane.b32.xlu0 %v7381_v28, %s7204_s21 }
  0x78   :  { %v99_v35 = vpop.permute.xlu1 %98 }
  0x79   :  { %v95_v36 = vpop.permute.xlu0 %94  ;;  %144 = vst.msk [vmem:[#allocation2 + $0x48] sm:$0xff] %vm140_vm0, %v99_v35 }
  0x7a   :  { %142 = vst.msk [vmem:[#allocation2 + $0x18] sm:$0xff] %vm140_vm0, %v95_v36  ;;  %409 = vrot.lane.b32.xlu1 %v7390_v29, %s7204_s21 }
  0x7b   :  { %407 = vrot.lane.b32.xlu0 %v7395_v30, %s7204_s21 }
  0x7c   :  { %v103_v37 = vpop.permute.xlu1 %102 }
  0x7d   :  { %v101_v38 = vpop.permute.xlu0 %100  ;;  %146 = vst.msk [vmem:[#allocation2 + $0x78] sm:$0xff] %vm140_vm0, %v103_v37 }
  0x7e   :  { %145 = vst.msk [vmem:[#allocation2 + $0x60] sm:$0xff] %vm140_vm0, %v101_v38  ;;  %413 = vrot.lane.b32.xlu1 %v7404_v31, %s7204_s21 }
  0x7f   :  { %411 = vrot.lane.b32.xlu0 %v7409_v32, %s7204_s21  ;;  %s7218_s21 = smov 50  }
  0x80   :  { %v107_v39 = vpop.permute.xlu1 %106 }
  0x81   :  { %v105_v40 = vpop.permute.xlu0 %104  ;;  %148 = vst.msk [vmem:[#allocation2 + $0xa8] sm:$0xff] %vm140_vm0, %v107_v39 }
  0x82   :  { %147 = vst.msk [vmem:[#allocation2 + $0x90] sm:$0xff] %vm140_vm0, %v105_v40  ;;  %482 = vrot.lane.b32.xlu1 %v7306_v17, %s7205_s22 }
  0x83   :  { %480 = vrot.lane.b32.xlu0 %v7311_v18, %s7205_s22 }
  0x84   :  { %v111_v41 = vpop.permute.xlu1 %110 }
  0x85   :  { %v109_v42 = vpop.permute.xlu0 %108  ;;  %150 = vst.msk [vmem:[#allocation2 + $0xd8] sm:$0xff] %vm140_vm0, %v111_v41 }
  0x86   :  { %149 = vst.msk [vmem:[#allocation2 + $0xc0] sm:$0xff] %vm140_vm0, %v109_v42  ;;  %486 = vrot.lane.b32.xlu1 %v7320_v19, %s7205_s22 }
  0x87   :  { %484 = vrot.lane.b32.xlu0 %v7325_v20, %s7205_s22 }
  0x88   :  { %v115_v43 = vpop.permute.xlu1 %114 }
  0x89   :  { %v113_v44 = vpop.permute.xlu0 %112  ;;  %152 = vst.msk [vmem:[#allocation2 + $0x108] sm:$0xff] %vm140_vm0, %v115_v43 }
  0x8a   :  { %151 = vst.msk [vmem:[#allocation2 + $0xf0] sm:$0xff] %vm140_vm0, %v113_v44  ;;  %490 = vrot.lane.b32.xlu1 %v7334_v21, %s7205_s22 }
  0x8b   :  { %488 = vrot.lane.b32.xlu0 %v7339_v22, %s7205_s22 }
  0x8c   :  { %v119_v45 = vpop.permute.xlu1 %118 }
  0x8d   :  { %v117_v46 = vpop.permute.xlu0 %116  ;;  %154 = vst.msk [vmem:[#allocation2 + $0x138] sm:$0xff] %vm140_vm0, %v119_v45 }
  0x8e   :  { %153 = vst.msk [vmem:[#allocation2 + $0x120] sm:$0xff] %vm140_vm0, %v117_v46  ;;  %494 = vrot.lane.b32.xlu1 %v7348_v23, %s7205_s22 }
  0x8f   :  { %492 = vrot.lane.b32.xlu0 %v7353_v24, %s7205_s22 }
  0x90   :  { %v123_v47 = vpop.permute.xlu1 %122 }
  0x91   :  { %v121_v48 = vpop.permute.xlu0 %120  ;;  %156 = vst.msk [vmem:[#allocation2 + $0x168] sm:$0xff] %vm140_vm0, %v123_v47 }
  0x92   :  { %155 = vst.msk [vmem:[#allocation2 + $0x150] sm:$0xff] %vm140_vm0, %v121_v48  ;;  %498 = vrot.lane.b32.xlu1 %v7362_v25, %s7205_s22 }
  0x93   :  { %496 = vrot.lane.b32.xlu0 %v7367_v26, %s7205_s22 }
  0x94   :  { %v192_v49 = vpop.permute.xlu1 %191 }
  0x95   :  { %v190_v50 = vpop.permute.xlu0 %189  ;;  %239 = vst.msk [vmem:[#allocation2 + $0x18] sm:$0xff] %vm237_vm1, %v192_v49 }
  0x96   :  { %238 = vst.msk [vmem:[#allocation2] sm:$0xff] %vm237_vm1, %v190_v50  ;;  %502 = vrot.lane.b32.xlu1 %v7376_v27, %s7205_s22 }
  0x97   :  { %500 = vrot.lane.b32.xlu0 %v7381_v28, %s7205_s22 }
  0x98   :  { %v196_v51 = vpop.permute.xlu1 %195 }
  0x99   :  { %v194_v52 = vpop.permute.xlu0 %193  ;;  %241 = vst.msk [vmem:[#allocation2 + $0x48] sm:$0xff] %vm237_vm1, %v196_v51 }
  0x9a   :  { %240 = vst.msk [vmem:[#allocation2 + $0x30] sm:$0xff] %vm237_vm1, %v194_v52  ;;  %506 = vrot.lane.b32.xlu1 %v7390_v29, %s7205_s22 }
  0x9b   :  { %504 = vrot.lane.b32.xlu0 %v7395_v30, %s7205_s22 }
  0x9c   :  { %v200_v53 = vpop.permute.xlu1 %199 }
  0x9d   :  { %v198_v54 = vpop.permute.xlu0 %197  ;;  %243 = vst.msk [vmem:[#allocation2 + $0x78] sm:$0xff] %vm237_vm1, %v200_v53 }
  0x9e   :  { %242 = vst.msk [vmem:[#allocation2 + $0x60] sm:$0xff] %vm237_vm1, %v198_v54  ;;  %510 = vrot.lane.b32.xlu1 %v7404_v31, %s7205_s22 }
  0x9f   :  { %508 = vrot.lane.b32.xlu0 %v7409_v32, %s7205_s22 }
  0xa0   :  { %v204_v55 = vpop.permute.xlu1 %203 }
  0xa1   :  { %v202_v56 = vpop.permute.xlu0 %201  ;;  %245 = vst.msk [vmem:[#allocation2 + $0xa8] sm:$0xff] %vm237_vm1, %v204_v55 }
  0xa2   :  { %244 = vst.msk [vmem:[#allocation2 + $0x90] sm:$0xff] %vm237_vm1, %v202_v56  ;;  %579 = vrot.lane.b32.xlu1 %v7306_v17, %s7206_s23 }
  0xa3   :  { %577 = vrot.lane.b32.xlu0 %v7311_v18, %s7206_s23 }
  0xa4   :  { %v208_v57 = vpop.permute.xlu1 %207 }
  0xa5   :  { %v206_v58 = vpop.permute.xlu0 %205  ;;  %247 = vst.msk [vmem:[#allocation2 + $0xd8] sm:$0xff] %vm237_vm1, %v208_v57 }
  0xa6   :  { %246 = vst.msk [vmem:[#allocation2 + $0xc0] sm:$0xff] %vm237_vm1, %v206_v58  ;;  %583 = vrot.lane.b32.xlu1 %v7320_v19, %s7206_s23 }
  0xa7   :  { %581 = vrot.lane.b32.xlu0 %v7325_v20, %s7206_s23 }
  0xa8   :  { %v212_v59 = vpop.permute.xlu1 %211 }
  0xa9   :  { %v210_v60 = vpop.permute.xlu0 %209  ;;  %249 = vst.msk [vmem:[#allocation2 + $0x108] sm:$0xff] %vm237_vm1, %v212_v59 }
  0xaa   :  { %248 = vst.msk [vmem:[#allocation2 + $0xf0] sm:$0xff] %vm237_vm1, %v210_v60  ;;  %587 = vrot.lane.b32.xlu1 %v7334_v21, %s7206_s23 }
  0xab   :  { %585 = vrot.lane.b32.xlu0 %v7339_v22, %s7206_s23 }
  0xac   :  { %v216_v61 = vpop.permute.xlu1 %215 }
  0xad   :  { %v214_v62 = vpop.permute.xlu0 %213  ;;  %251 = vst.msk [vmem:[#allocation2 + $0x138] sm:$0xff] %vm237_vm1, %v216_v61 }
  0xae   :  { %250 = vst.msk [vmem:[#allocation2 + $0x120] sm:$0xff] %vm237_vm1, %v214_v62  ;;  %591 = vrot.lane.b32.xlu1 %v7348_v23, %s7206_s23 }
  0xaf   :  { %589 = vrot.lane.b32.xlu0 %v7353_v24, %s7206_s23 }
  0xb0   :  { %v220_v63 = vpop.permute.xlu1 %219 }
  0xb1   :  { %v218_v0 = vpop.permute.xlu0 %217  ;;  %253 = vst.msk [vmem:[#allocation2 + $0x168] sm:$0xff] %vm237_vm1, %v220_v63 }
  0xb2   :  { %252 = vst.msk [vmem:[#allocation2 + $0x150] sm:$0xff] %vm237_vm1, %v218_v0  ;;  %595 = vrot.lane.b32.xlu1 %v7362_v25, %s7206_s23 }
  0xb3   :  { %593 = vrot.lane.b32.xlu0 %v7367_v26, %s7206_s23 }
  0xb4   :  { %v289_v1 = vpop.permute.xlu1 %288 }
  0xb5   :  { %v287_v2 = vpop.permute.xlu0 %286  ;;  %336 = vst.msk [vmem:[#allocation2 + $0x18] sm:$0xff] %vm334_vm2, %v289_v1 }
  0xb6   :  { %335 = vst.msk [vmem:[#allocation2] sm:$0xff] %vm334_vm2, %v287_v2  ;;  %599 = vrot.lane.b32.xlu1 %v7376_v27, %s7206_s23 }
  0xb7   :  { %597 = vrot.lane.b32.xlu0 %v7381_v28, %s7206_s23 }
  0xb8   :  { %v293_v3 = vpop.permute.xlu1 %292 }
  0xb9   :  { %v291_v4 = vpop.permute.xlu0 %290  ;;  %338 = vst.msk [vmem:[#allocation2 + $0x48] sm:$0xff] %vm334_vm2, %v293_v3 }
  0xba   :  { %337 = vst.msk [vmem:[#allocation2 + $0x30] sm:$0xff] %vm334_vm2, %v291_v4  ;;  %603 = vrot.lane.b32.xlu1 %v7390_v29, %s7206_s23 }
  0xbb   :  { %601 = vrot.lane.b32.xlu0 %v7395_v30, %s7206_s23 }
  0xbc   :  { %v297_v5 = vpop.permute.xlu1 %296 }
  0xbd   :  { %v295_v6 = vpop.permute.xlu0 %294  ;;  %340 = vst.msk [vmem:[#allocation2 + $0x78] sm:$0xff] %vm334_vm2, %v297_v5 }
  0xbe   :  { %339 = vst.msk [vmem:[#allocation2 + $0x60] sm:$0xff] %vm334_vm2, %v295_v6  ;;  %607 = vrot.lane.b32.xlu1 %v7404_v31, %s7206_s23 }
  0xbf   :  { %605 = vrot.lane.b32.xlu0 %v7409_v32, %s7206_s23  ;;  %s7230_s23 = smov 94  }
  0xc0   :  { %v301_v7 = vpop.permute.xlu1 %300 }
  0xc1   :  { %v299_v8 = vpop.permute.xlu0 %298  ;;  %342 = vst.msk [vmem:[#allocation2 + $0xa8] sm:$0xff] %vm334_vm2, %v301_v7 }
  0xc2   :  { %341 = vst.msk [vmem:[#allocation2 + $0x90] sm:$0xff] %vm334_vm2, %v299_v8  ;;  %676 = vrot.lane.b32.xlu1 %v7306_v17, %s7207_s24 }
  0xc3   :  { %674 = vrot.lane.b32.xlu0 %v7311_v18, %s7207_s24 }
  0xc4   :  { %v305_v9 = vpop.permute.xlu1 %304 }
  0xc5   :  { %v303_v10 = vpop.permute.xlu0 %302  ;;  %344 = vst.msk [vmem:[#allocation2 + $0xd8] sm:$0xff] %vm334_vm2, %v305_v9 }
  0xc6   :  { %343 = vst.msk [vmem:[#allocation2 + $0xc0] sm:$0xff] %vm334_vm2, %v303_v10  ;;  %680 = vrot.lane.b32.xlu1 %v7320_v19, %s7207_s24 }
  0xc7   :  { %678 = vrot.lane.b32.xlu0 %v7325_v20, %s7207_s24 }
  0xc8   :  { %v309_v11 = vpop.permute.xlu1 %308 }
  0xc9   :  { %v307_v12 = vpop.permute.xlu0 %306  ;;  %346 = vst.msk [vmem:[#allocation2 + $0x108] sm:$0xff] %vm334_vm2, %v309_v11 }
  0xca   :  { %345 = vst.msk [vmem:[#allocation2 + $0xf0] sm:$0xff] %vm334_vm2, %v307_v12  ;;  %684 = vrot.lane.b32.xlu1 %v7334_v21, %s7207_s24 }
  0xcb   :  { %682 = vrot.lane.b32.xlu0 %v7339_v22, %s7207_s24 }
  0xcc   :  { %v313_v13 = vpop.permute.xlu1 %312 }
  0xcd   :  { %v311_v14 = vpop.permute.xlu0 %310  ;;  %348 = vst.msk [vmem:[#allocation2 + $0x138] sm:$0xff] %vm334_vm2, %v313_v13 }
  0xce   :  { %347 = vst.msk [vmem:[#allocation2 + $0x120] sm:$0xff] %vm334_vm2, %v311_v14  ;;  %688 = vrot.lane.b32.xlu1 %v7348_v23, %s7207_s24 }
  0xcf   :  { %686 = vrot.lane.b32.xlu0 %v7353_v24, %s7207_s24 }
  0xd0   :  { %v317_v15 = vpop.permute.xlu1 %316 }
  0xd1   :  { %v315_v16 = vpop.permute.xlu0 %314  ;;  %350 = vst.msk [vmem:[#allocation2 + $0x168] sm:$0xff] %vm334_vm2, %v317_v15  ;;  %v7760_v15 = vld [vmem:[%s10263_s1 + $0x50] sm:$0xff] }
  0xd2   :  { %349 = vst.msk [vmem:[#allocation2 + $0x150] sm:$0xff] %vm334_vm2, %v315_v16  ;;  %692 = vrot.lane.b32.xlu1 %v7362_v25, %s7207_s24  ;;  %v7765_v16 = vld [vmem:[%s10263_s1 + $0x40] sm:$0xff] }
  0xd3   :  { %690 = vrot.lane.b32.xlu0 %v7367_v26, %s7207_s24 }
  0xd4   :  { %v386_v33 = vpop.permute.xlu1 %385 }
  0xd5   :  { %v384_v34 = vpop.permute.xlu0 %383  ;;  %433 = vst.msk [vmem:[#allocation2 + $0x18] sm:$0xff] %vm431_vm3, %v386_v33 }
  0xd6   :  { %432 = vst.msk [vmem:[#allocation2] sm:$0xff] %vm431_vm3, %v384_v34  ;;  %696 = vrot.lane.b32.xlu1 %v7376_v27, %s7207_s24 }
  0xd7   :  { %694 = vrot.lane.b32.xlu0 %v7381_v28, %s7207_s24 }
  0xd8   :  { %v390_v35 = vpop.permute.xlu1 %389 }
  0xd9   :  { %v388_v36 = vpop.permute.xlu0 %387  ;;  %435 = vst.msk [vmem:[#allocation2 + $0x48] sm:$0xff] %vm431_vm3, %v390_v35  ;;  %v7776_v35 = vld [vmem:[%s10263_s1 + $0x70] sm:$0xff] }
  0xda   :  { %434 = vst.msk [vmem:[#allocation2 + $0x30] sm:$0xff] %vm431_vm3, %v388_v36  ;;  %700 = vrot.lane.b32.xlu1 %v7390_v29, %s7207_s24  ;;  %v7781_v36 = vld [vmem:[%s10263_s1 + $0x60] sm:$0xff] }
  0xdb   :  { %698 = vrot.lane.b32.xlu0 %v7395_v30, %s7207_s24 }
  0xdc   :  { %v394_v37 = vpop.permute.xlu1 %393 }
  0xdd   :  { %v392_v38 = vpop.permute.xlu0 %391  ;;  %437 = vst.msk [vmem:[#allocation2 + $0x78] sm:$0xff] %vm431_vm3, %v394_v37 }
  0xde   :  { %436 = vst.msk [vmem:[#allocation2 + $0x60] sm:$0xff] %vm431_vm3, %v392_v38  ;;  %704 = vrot.lane.b32.xlu1 %v7404_v31, %s7207_s24 }
  0xdf   :  { %702 = vrot.lane.b32.xlu0 %v7409_v32, %s7207_s24 }
  0xe0   :  { %v398_v39 = vpop.permute.xlu1 %397 }
  0xe1   :  { %v396_v40 = vpop.permute.xlu0 %395  ;;  %439 = vst.msk [vmem:[#allocation2 + $0xa8] sm:$0xff] %vm431_vm3, %v398_v39  ;;  %v7792_v39 = vld [vmem:[%s10263_s1 + $0x90] sm:$0xff] }
  0xe2   :  { %438 = vst.msk [vmem:[#allocation2 + $0x90] sm:$0xff] %vm431_vm3, %v396_v40  ;;  %773 = vrot.lane.b32.xlu1 %v7306_v17, %s7208_s25  ;;  %v7797_v40 = vld [vmem:[%s10263_s1 + $0x80] sm:$0xff] }
  0xe3   :  { %771 = vrot.lane.b32.xlu0 %v7311_v18, %s7208_s25 }
  0xe4   :  { %v402_v41 = vpop.permute.xlu1 %401 }
  0xe5   :  { %v400_v42 = vpop.permute.xlu0 %399  ;;  %441 = vst.msk [vmem:[#allocation2 + $0xd8] sm:$0xff] %vm431_vm3, %v402_v41 }
  0xe6   :  { %440 = vst.msk [vmem:[#allocation2 + $0xc0] sm:$0xff] %vm431_vm3, %v400_v42  ;;  %777 = vrot.lane.b32.xlu1 %v7320_v19, %s7208_s25 }
  0xe7   :  { %775 = vrot.lane.b32.xlu0 %v7325_v20, %s7208_s25 }
  0xe8   :  { %v406_v43 = vpop.permute.xlu1 %405 }
  0xe9   :  { %v404_v44 = vpop.permute.xlu0 %403  ;;  %443 = vst.msk [vmem:[#allocation2 + $0x108] sm:$0xff] %vm431_vm3, %v406_v43  ;;  %v7808_v43 = vld [vmem:[%s10263_s1 + $0xb0] sm:$0xff] }
  0xea   :  { %442 = vst.msk [vmem:[#allocation2 + $0xf0] sm:$0xff] %vm431_vm3, %v404_v44  ;;  %781 = vrot.lane.b32.xlu1 %v7334_v21, %s7208_s25  ;;  %v7813_v44 = vld [vmem:[%s10263_s1 + $0xa0] sm:$0xff] }
  0xeb   :  { %779 = vrot.lane.b32.xlu0 %v7339_v22, %s7208_s25 }
  0xec   :  { %v410_v45 = vpop.permute.xlu1 %409 }
  0xed   :  { %v408_v46 = vpop.permute.xlu0 %407  ;;  %445 = vst.msk [vmem:[#allocation2 + $0x138] sm:$0xff] %vm431_vm3, %v410_v45 }
  0xee   :  { %444 = vst.msk [vmem:[#allocation2 + $0x120] sm:$0xff] %vm431_vm3, %v408_v46  ;;  %785 = vrot.lane.b32.xlu1 %v7348_v23, %s7208_s25 }
  0xef   :  { %783 = vrot.lane.b32.xlu0 %v7353_v24, %s7208_s25 }
  0xf0   :  { %v414_v47 = vpop.permute.xlu1 %413 }
  0xf1   :  { %v412_v48 = vpop.permute.xlu0 %411  ;;  %447 = vst.msk [vmem:[#allocation2 + $0x168] sm:$0xff] %vm431_vm3, %v414_v47  ;;  %v7824_v47 = vld [vmem:[%s10263_s1 + $0xd0] sm:$0xff] }
  0xf2   :  { %446 = vst.msk [vmem:[#allocation2 + $0x150] sm:$0xff] %vm431_vm3, %v412_v48  ;;  %789 = vrot.lane.b32.xlu1 %v7362_v25, %s7208_s25  ;;  %v7829_v48 = vld [vmem:[%s10263_s1 + $0xc0] sm:$0xff] }
  0xf3   :  { %787 = vrot.lane.b32.xlu0 %v7367_v26, %s7208_s25 }
  0xf4   :  { %v483_v49 = vpop.permute.xlu1 %482 }
  0xf5   :  { %v481_v50 = vpop.permute.xlu0 %480  ;;  %530 = vst.msk [vmem:[#allocation2 + $0x18] sm:$0xff] %vm528_vm4, %v483_v49 }
  0xf6   :  { %529 = vst.msk [vmem:[#allocation2] sm:$0xff] %vm528_vm4, %v481_v50  ;;  %793 = vrot.lane.b32.xlu1 %v7376_v27, %s7208_s25 }
  0xf7   :  { %791 = vrot.lane.b32.xlu0 %v7381_v28, %s7208_s25 }
  0xf8   :  { %v487_v51 = vpop.permute.xlu1 %486 }
  0xf9   :  { %v485_v52 = vpop.permute.xlu0 %484  ;;  %532 = vst.msk [vmem:[#allocation2 + $0x48] sm:$0xff] %vm528_vm4, %v487_v51  ;;  %v7840_v51 = vld [vmem:[%s10263_s1 + $0xf0] sm:$0xff] }
  0xfa   :  { %531 = vst.msk [vmem:[#allocation2 + $0x30] sm:$0xff] %vm528_vm4, %v485_v52  ;;  %797 = vrot.lane.b32.xlu1 %v7390_v29, %s7208_s25  ;;  %v7845_v52 = vld [vmem:[%s10263_s1 + $0xe0] sm:$0xff] }
  0xfb   :  { %795 = vrot.lane.b32.xlu0 %v7395_v30, %s7208_s25 }
  0xfc   :  { %v491_v53 = vpop.permute.xlu1 %490 }
  0xfd   :  { %v489_v54 = vpop.permute.xlu0 %488  ;;  %534 = vst.msk [vmem:[#allocation2 + $0x78] sm:$0xff] %vm528_vm4, %v491_v53 }
  0xfe   :  { %533 = vst.msk [vmem:[#allocation2 + $0x60] sm:$0xff] %vm528_vm4, %v489_v54  ;;  %801 = vrot.lane.b32.xlu1 %v7404_v31, %s7208_s25 }
  0xff   :  { %799 = vrot.lane.b32.xlu0 %v7409_v32, %s7208_s25 }
 0x100   :  { %v495_v55 = vpop.permute.xlu1 %494 }
 0x101   :  { %v493_v56 = vpop.permute.xlu0 %492  ;;  %536 = vst.msk [vmem:[#allocation2 + $0xa8] sm:$0xff] %vm528_vm4, %v495_v55 }
 0x102   :  { %535 = vst.msk [vmem:[#allocation2 + $0x90] sm:$0xff] %vm528_vm4, %v493_v56  ;;  %870 = vrot.lane.b32.xlu1 %v7306_v17, %s7209_s26 }
 0x103   :  { %868 = vrot.lane.b32.xlu0 %v7311_v18, %s7209_s26 }
 0x104   :  { %v499_v57 = vpop.permute.xlu1 %498 }
 0x105   :  { %v497_v58 = vpop.permute.xlu0 %496  ;;  %538 = vst.msk [vmem:[#allocation2 + $0xd8] sm:$0xff] %vm528_vm4, %v499_v57 }
 0x106   :  { %537 = vst.msk [vmem:[#allocation2 + $0xc0] sm:$0xff] %vm528_vm4, %v497_v58  ;;  %874 = vrot.lane.b32.xlu1 %v7320_v19, %s7209_s26 }
 0x107   :  { %872 = vrot.lane.b32.xlu0 %v7325_v20, %s7209_s26 }
 0x108   :  { %v503_v59 = vpop.permute.xlu1 %502 }
 0x109   :  { %v501_v60 = vpop.permute.xlu0 %500  ;;  %540 = vst.msk [vmem:[#allocation2 + $0x108] sm:$0xff] %vm528_vm4, %v503_v59 }
 0x10a   :  { %539 = vst.msk [vmem:[#allocation2 + $0xf0] sm:$0xff] %vm528_vm4, %v501_v60  ;;  %878 = vrot.lane.b32.xlu1 %v7334_v21, %s7209_s26 }
 0x10b   :  { %876 = vrot.lane.b32.xlu0 %v7339_v22, %s7209_s26 }
 0x10c   :  { %v507_v61 = vpop.permute.xlu1 %506 }
 0x10d   :  { %v505_v62 = vpop.permute.xlu0 %504  ;;  %542 = vst.msk [vmem:[#allocation2 + $0x138] sm:$0xff] %vm528_vm4, %v507_v61 }
 0x10e   :  { %541 = vst.msk [vmem:[#allocation2 + $0x120] sm:$0xff] %vm528_vm4, %v505_v62  ;;  %882 = vrot.lane.b32.xlu1 %v7348_v23, %s7209_s26 }
 0x10f   :  { %880 = vrot.lane.b32.xlu0 %v7353_v24, %s7209_s26 }
 0x110   :  { %v511_v63 = vpop.permute.xlu1 %510 }
 0x111   :  { %v509_v0 = vpop.permute.xlu0 %508  ;;  %544 = vst.msk [vmem:[#allocation2 + $0x168] sm:$0xff] %vm528_vm4, %v511_v63 }
 0x112   :  { %543 = vst.msk [vmem:[#allocation2 + $0x150] sm:$0xff] %vm528_vm4, %v509_v0  ;;  %886 = vrot.lane.b32.xlu1 %v7362_v25, %s7209_s26 }
 0x113   :  { %884 = vrot.lane.b32.xlu0 %v7367_v26, %s7209_s26 }
 0x114   :  { %v580_v1 = vpop.permute.xlu1 %579 }
 0x115   :  { %v578_v2 = vpop.permute.xlu0 %577  ;;  %627 = vst.msk [vmem:[#allocation2 + $0x18] sm:$0xff] %vm625_vm5, %v580_v1 }
 0x116   :  { %626 = vst.msk [vmem:[#allocation2] sm:$0xff] %vm625_vm5, %v578_v2  ;;  %890 = vrot.lane.b32.xlu1 %v7376_v27, %s7209_s26 }
 0x117   :  { %888 = vrot.lane.b32.xlu0 %v7381_v28, %s7209_s26 }
 0x118   :  { %v584_v3 = vpop.permute.xlu1 %583 }
 0x119   :  { %v582_v4 = vpop.permute.xlu0 %581  ;;  %629 = vst.msk [vmem:[#allocation2 + $0x48] sm:$0xff] %vm625_vm5, %v584_v3 }
 0x11a   :  { %628 = vst.msk [vmem:[#allocation2 + $0x30] sm:$0xff] %vm625_vm5, %v582_v4  ;;  %894 = vrot.lane.b32.xlu1 %v7390_v29, %s7209_s26 }
 0x11b   :  { %892 = vrot.lane.b32.xlu0 %v7395_v30, %s7209_s26 }
 0x11c   :  { %v588_v5 = vpop.permute.xlu1 %587 }
 0x11d   :  { %v586_v6 = vpop.permute.xlu0 %585  ;;  %631 = vst.msk [vmem:[#allocation2 + $0x78] sm:$0xff] %vm625_vm5, %v588_v5 }
 0x11e   :  { %630 = vst.msk [vmem:[#allocation2 + $0x60] sm:$0xff] %vm625_vm5, %v586_v6  ;;  %898 = vrot.lane.b32.xlu1 %v7404_v31, %s7209_s26 }
 0x11f   :  { %896 = vrot.lane.b32.xlu0 %v7409_v32, %s7209_s26 }
 0x120   :  { %v592_v7 = vpop.permute.xlu1 %591 }
 0x121   :  { %v590_v8 = vpop.permute.xlu0 %589  ;;  %633 = vst.msk [vmem:[#allocation2 + $0xa8] sm:$0xff] %vm625_vm5, %v592_v7 }
 0x122   :  { %632 = vst.msk [vmem:[#allocation2 + $0x90] sm:$0xff] %vm625_vm5, %v590_v8  ;;  %967 = vrot.lane.b32.xlu1 %v7306_v17, %s7210_s27 }
 0x123   :  { %965 = vrot.lane.b32.xlu0 %v7311_v18, %s7210_s27 }
 0x124   :  { %v596_v9 = vpop.permute.xlu1 %595 }
 0x125   :  { %v594_v10 = vpop.permute.xlu0 %593  ;;  %635 = vst.msk [vmem:[#allocation2 + $0xd8] sm:$0xff] %vm625_vm5, %v596_v9 }
 0x126   :  { %634 = vst.msk [vmem:[#allocation2 + $0xc0] sm:$0xff] %vm625_vm5, %v594_v10  ;;  %971 = vrot.lane.b32.xlu1 %v7320_v19, %s7210_s27 }
 0x127   :  { %969 = vrot.lane.b32.xlu0 %v7325_v20, %s7210_s27 }
 0x128   :  { %v600_v11 = vpop.permute.xlu1 %599 }
 0x129   :  { %v598_v12 = vpop.permute.xlu0 %597  ;;  %637 = vst.msk [vmem:[#allocation2 + $0x108] sm:$0xff] %vm625_vm5, %v600_v11 }
 0x12a   :  { %636 = vst.msk [vmem:[#allocation2 + $0xf0] sm:$0xff] %vm625_vm5, %v598_v12  ;;  %975 = vrot.lane.b32.xlu1 %v7334_v21, %s7210_s27 }
 0x12b   :  { %973 = vrot.lane.b32.xlu0 %v7339_v22, %s7210_s27 }
 0x12c   :  { %v604_v17 = vpop.permute.xlu1 %603 }
 0x12d   :  { %v602_v18 = vpop.permute.xlu0 %601  ;;  %639 = vst.msk [vmem:[#allocation2 + $0x138] sm:$0xff] %vm625_vm5, %v604_v17 }
 0x12e   :  { %638 = vst.msk [vmem:[#allocation2 + $0x120] sm:$0xff] %vm625_vm5, %v602_v18  ;;  %979 = vrot.lane.b32.xlu1 %v7348_v23, %s7210_s27 }
 0x12f   :  { %977 = vrot.lane.b32.xlu0 %v7353_v24, %s7210_s27 }
 0x130   :  { %v608_v19 = vpop.permute.xlu1 %607 }
 0x131   :  { %v606_v20 = vpop.permute.xlu0 %605  ;;  %641 = vst.msk [vmem:[#allocation2 + $0x168] sm:$0xff] %vm625_vm5, %v608_v19 }
 0x132   :  { %640 = vst.msk [vmem:[#allocation2 + $0x150] sm:$0xff] %vm625_vm5, %v606_v20  ;;  %983 = vrot.lane.b32.xlu1 %v7362_v25, %s7210_s27 }
 0x133   :  { %981 = vrot.lane.b32.xlu0 %v7367_v26, %s7210_s27 }
 0x134   :  { %v677_v21 = vpop.permute.xlu1 %676 }
 0x135   :  { %v675_v22 = vpop.permute.xlu0 %674  ;;  %724 = vst.msk [vmem:[#allocation2 + $0x18] sm:$0xff] %vm722_vm6, %v677_v21 }
 0x136   :  { %723 = vst.msk [vmem:[#allocation2] sm:$0xff] %vm722_vm6, %v675_v22  ;;  %987 = vrot.lane.b32.xlu1 %v7376_v27, %s7210_s27  ;;  %v7728_v27 = vld [vmem:[%s10263_s1 + $0x10] sm:$0xff] }
 0x137   :  { %985 = vrot.lane.b32.xlu0 %v7381_v28, %s7210_s27  ;;  %v7733_v28 = vld [vmem:[%s10263_s1] sm:$0xff] }
 0x138   :  { %v681_v23 = vpop.permute.xlu1 %680 }
 0x139   :  { %v679_v24 = vpop.permute.xlu0 %678  ;;  %726 = vst.msk [vmem:[#allocation2 + $0x48] sm:$0xff] %vm722_vm6, %v681_v23 }
 0x13a   :  { %725 = vst.msk [vmem:[#allocation2 + $0x30] sm:$0xff] %vm722_vm6, %v679_v24  ;;  %991 = vrot.lane.b32.xlu1 %v7390_v29, %s7210_s27 }
 0x13b   :  { %989 = vrot.lane.b32.xlu0 %v7395_v30, %s7210_s27 }
 0x13c   :  { %v685_v25 = vpop.permute.xlu1 %684 }
 0x13d   :  { %v683_v26 = vpop.permute.xlu0 %682  ;;  %728 = vst.msk [vmem:[#allocation2 + $0x78] sm:$0xff] %vm722_vm6, %v685_v25 }
 0x13e   :  { %727 = vst.msk [vmem:[#allocation2 + $0x60] sm:$0xff] %vm722_vm6, %v683_v26  ;;  %995 = vrot.lane.b32.xlu1 %v7404_v31, %s7210_s27  ;;  %v7744_v31 = vld [vmem:[%s10263_s1 + $0x30] sm:$0xff] }
 0x13f   :  { %993 = vrot.lane.b32.xlu0 %v7409_v32, %s7210_s27  ;;  %v7749_v32 = vld [vmem:[%s10263_s1 + $0x20] sm:$0xff] }
 0x140   :  { %v689_v29 = vpop.permute.xlu1 %688 }
 0x141   :  { %v687_v30 = vpop.permute.xlu0 %686  ;;  %730 = vst.msk [vmem:[#allocation2 + $0xa8] sm:$0xff] %vm722_vm6, %v689_v29 }
 0x142   :  { %729 = vst.msk [vmem:[#allocation2 + $0x90] sm:$0xff] %vm722_vm6, %v687_v30  ;;  %1064 = vrot.lane.b32.xlu1 %v7728_v27, %s7211_s4 }
 0x143   :  { %1062 = vrot.lane.b32.xlu0 %v7733_v28, %s7211_s4 }
 0x144   :  { %v693_v13 = vpop.permute.xlu1 %692 }
 0x145   :  { %v691_v14 = vpop.permute.xlu0 %690  ;;  %732 = vst.msk [vmem:[#allocation2 + $0xd8] sm:$0xff] %vm722_vm6, %v693_v13 }
 0x146   :  { %731 = vst.msk [vmem:[#allocation2 + $0xc0] sm:$0xff] %vm722_vm6, %v691_v14  ;;  %1068 = vrot.lane.b32.xlu1 %v7744_v31, %s7211_s4 }
 0x147   :  { %1066 = vrot.lane.b32.xlu0 %v7749_v32, %s7211_s4 }
 0x148   :  { %v697_v33 = vpop.permute.xlu1 %696 }
 0x149   :  { %v695_v34 = vpop.permute.xlu0 %694  ;;  %734 = vst.msk [vmem:[#allocation2 + $0x108] sm:$0xff] %vm722_vm6, %v697_v33 }
 0x14a   :  { %733 = vst.msk [vmem:[#allocation2 + $0xf0] sm:$0xff] %vm722_vm6, %v695_v34  ;;  %1072 = vrot.lane.b32.xlu1 %v7760_v15, %s7211_s4 }
 0x14b   :  { %1070 = vrot.lane.b32.xlu0 %v7765_v16, %s7211_s4 }
 0x14c   :  { %v701_v37 = vpop.permute.xlu1 %700 }
 0x14d   :  { %v699_v38 = vpop.permute.xlu0 %698  ;;  %736 = vst.msk [vmem:[#allocation2 + $0x138] sm:$0xff] %vm722_vm6, %v701_v37 }
 0x14e   :  { %735 = vst.msk [vmem:[#allocation2 + $0x120] sm:$0xff] %vm722_vm6, %v699_v38  ;;  %1076 = vrot.lane.b32.xlu1 %v7776_v35, %s7211_s4 }
 0x14f   :  { %1074 = vrot.lane.b32.xlu0 %v7781_v36, %s7211_s4 }
 0x150   :  { %v705_v41 = vpop.permute.xlu1 %704 }
 0x151   :  { %v703_v42 = vpop.permute.xlu0 %702  ;;  %738 = vst.msk [vmem:[#allocation2 + $0x168] sm:$0xff] %vm722_vm6, %v705_v41 }
 0x152   :  { %737 = vst.msk [vmem:[#allocation2 + $0x150] sm:$0xff] %vm722_vm6, %v703_v42  ;;  %1080 = vrot.lane.b32.xlu1 %v7792_v39, %s7211_s4 }
 0x153   :  { %1078 = vrot.lane.b32.xlu0 %v7797_v40, %s7211_s4 }
 0x154   :  { %v774_v45 = vpop.permute.xlu1 %773 }
 0x155   :  { %v772_v46 = vpop.permute.xlu0 %771  ;;  %821 = vst.msk [vmem:[#allocation2 + $0x18] sm:$0xff] %vm819_vm7, %v774_v45 }
 0x156   :  { %820 = vst.msk [vmem:[#allocation2] sm:$0xff] %vm819_vm7, %v772_v46  ;;  %1084 = vrot.lane.b32.xlu1 %v7808_v43, %s7211_s4 }
 0x157   :  { %1082 = vrot.lane.b32.xlu0 %v7813_v44, %s7211_s4 }
 0x158   :  { %v778_v49 = vpop.permute.xlu1 %777 }
 0x159   :  { %v776_v50 = vpop.permute.xlu0 %775  ;;  %823 = vst.msk [vmem:[#allocation2 + $0x48] sm:$0xff] %vm819_vm7, %v778_v49 }
 0x15a   :  { %822 = vst.msk [vmem:[#allocation2 + $0x30] sm:$0xff] %vm819_vm7, %v776_v50  ;;  %1088 = vrot.lane.b32.xlu1 %v7824_v47, %s7211_s4 }
 0x15b   :  { %1086 = vrot.lane.b32.xlu0 %v7829_v48, %s7211_s4 }
 0x15c   :  { %v782_v53 = vpop.permute.xlu1 %781 }
 0x15d   :  { %v780_v54 = vpop.permute.xlu0 %779  ;;  %825 = vst.msk [vmem:[#allocation2 + $0x78] sm:$0xff] %vm819_vm7, %v782_v53 }
 0x15e   :  { %824 = vst.msk [vmem:[#allocation2 + $0x60] sm:$0xff] %vm819_vm7, %v780_v54  ;;  %1092 = vrot.lane.b32.xlu1 %v7840_v51, %s7211_s4 }
 0x15f   :  { %1090 = vrot.lane.b32.xlu0 %v7845_v52, %s7211_s4 }
 0x160   :  { %v786_v55 = vpop.permute.xlu1 %785 }
 0x161   :  { %v784_v56 = vpop.permute.xlu0 %783  ;;  %827 = vst.msk [vmem:[#allocation2 + $0xa8] sm:$0xff] %vm819_vm7, %v786_v55 }
 0x162   :  { %826 = vst.msk [vmem:[#allocation2 + $0x90] sm:$0xff] %vm819_vm7, %v784_v56  ;;  %1161 = vrot.lane.b32.xlu1 %v7728_v27, %s7212_s10 }
 0x163   :  { %1159 = vrot.lane.b32.xlu0 %v7733_v28, %s7212_s10 }
 0x164   :  { %v790_v57 = vpop.permute.xlu1 %789 }
 0x165   :  { %v788_v58 = vpop.permute.xlu0 %787  ;;  %829 = vst.msk [vmem:[#allocation2 + $0xd8] sm:$0xff] %vm819_vm7, %v790_v57 }
 0x166   :  { %828 = vst.msk [vmem:[#allocation2 + $0xc0] sm:$0xff] %vm819_vm7, %v788_v58  ;;  %1165 = vrot.lane.b32.xlu1 %v7744_v31, %s7212_s10 }
 0x167   :  { %1163 = vrot.lane.b32.xlu0 %v7749_v32, %s7212_s10 }
 0x168   :  { %v794_v59 = vpop.permute.xlu1 %793 }
 0x169   :  { %v792_v60 = vpop.permute.xlu0 %791  ;;  %831 = vst.msk [vmem:[#allocation2 + $0x108] sm:$0xff] %vm819_vm7, %v794_v59 }
 0x16a   :  { %830 = vst.msk [vmem:[#allocation2 + $0xf0] sm:$0xff] %vm819_vm7, %v792_v60  ;;  %1169 = vrot.lane.b32.xlu1 %v7760_v15, %s7212_s10 }
 0x16b   :  { %1167 = vrot.lane.b32.xlu0 %v7765_v16, %s7212_s10 }
 0x16c   :  { %v798_v61 = vpop.permute.xlu1 %797 }
 0x16d   :  { %v796_v62 = vpop.permute.xlu0 %795  ;;  %833 = vst.msk [vmem:[#allocation2 + $0x138] sm:$0xff] %vm819_vm7, %v798_v61 }
 0x16e   :  { %832 = vst.msk [vmem:[#allocation2 + $0x120] sm:$0xff] %vm819_vm7, %v796_v62  ;;  %1173 = vrot.lane.b32.xlu1 %v7776_v35, %s7212_s10 }
 0x16f   :  { %1171 = vrot.lane.b32.xlu0 %v7781_v36, %s7212_s10 }
 0x170   :  { %v802_v63 = vpop.permute.xlu1 %801 }
 0x171   :  { %v800_v0 = vpop.permute.xlu0 %799  ;;  %835 = vst.msk [vmem:[#allocation2 + $0x168] sm:$0xff] %vm819_vm7, %v802_v63 }
 0x172   :  { %834 = vst.msk [vmem:[#allocation2 + $0x150] sm:$0xff] %vm819_vm7, %v800_v0  ;;  %1177 = vrot.lane.b32.xlu1 %v7792_v39, %s7212_s10 }
 0x173   :  { %1175 = vrot.lane.b32.xlu0 %v7797_v40, %s7212_s10 }
 0x174   :  { %v871_v1 = vpop.permute.xlu1 %870 }
 0x175   :  { %v869_v2 = vpop.permute.xlu0 %868  ;;  %918 = vst.msk [vmem:[#allocation2 + $0x18] sm:$0xff] %vm916_vm8, %v871_v1 }
 0x176   :  { %917 = vst.msk [vmem:[#allocation2] sm:$0xff] %vm916_vm8, %v869_v2  ;;  %1181 = vrot.lane.b32.xlu1 %v7808_v43, %s7212_s10 }
 0x177   :  { %1179 = vrot.lane.b32.xlu0 %v7813_v44, %s7212_s10 }
 0x178   :  { %v875_v3 = vpop.permute.xlu1 %874 }
 0x179   :  { %v873_v4 = vpop.permute.xlu0 %872  ;;  %920 = vst.msk [vmem:[#allocation2 + $0x48] sm:$0xff] %vm916_vm8, %v875_v3 }
 0x17a   :  { %919 = vst.msk [vmem:[#allocation2 + $0x30] sm:$0xff] %vm916_vm8, %v873_v4  ;;  %1185 = vrot.lane.b32.xlu1 %v7824_v47, %s7212_s10 }
 0x17b   :  { %1183 = vrot.lane.b32.xlu0 %v7829_v48, %s7212_s10 }
 0x17c   :  { %v879_v5 = vpop.permute.xlu1 %878 }
 0x17d   :  { %v877_v6 = vpop.permute.xlu0 %876  ;;  %922 = vst.msk [vmem:[#allocation2 + $0x78] sm:$0xff] %vm916_vm8, %v879_v5 }
 0x17e   :  { %921 = vst.msk [vmem:[#allocation2 + $0x60] sm:$0xff] %vm916_vm8, %v877_v6  ;;  %1189 = vrot.lane.b32.xlu1 %v7840_v51, %s7212_s10 }
 0x17f   :  { %1187 = vrot.lane.b32.xlu0 %v7845_v52, %s7212_s10 }
 0x180   :  { %v883_v7 = vpop.permute.xlu1 %882 }
 0x181   :  { %v881_v8 = vpop.permute.xlu0 %880  ;;  %924 = vst.msk [vmem:[#allocation2 + $0xa8] sm:$0xff] %vm916_vm8, %v883_v7 }
 0x182   :  { %923 = vst.msk [vmem:[#allocation2 + $0x90] sm:$0xff] %vm916_vm8, %v881_v8  ;;  %1258 = vrot.lane.b32.xlu1 %v7728_v27, %s7213_s11 }
 0x183   :  { %1256 = vrot.lane.b32.xlu0 %v7733_v28, %s7213_s11 }
 0x184   :  { %v887_v9 = vpop.permute.xlu1 %886 }
 0x185   :  { %v885_v10 = vpop.permute.xlu0 %884  ;;  %926 = vst.msk [vmem:[#allocation2 + $0xd8] sm:$0xff] %vm916_vm8, %v887_v9 }
 0x186   :  { %925 = vst.msk [vmem:[#allocation2 + $0xc0] sm:$0xff] %vm916_vm8, %v885_v10  ;;  %1262 = vrot.lane.b32.xlu1 %v7744_v31, %s7213_s11 }
 0x187   :  { %1260 = vrot.lane.b32.xlu0 %v7749_v32, %s7213_s11 }
 0x188   :  { %v891_v11 = vpop.permute.xlu1 %890 }
 0x189   :  { %v889_v12 = vpop.permute.xlu0 %888  ;;  %928 = vst.msk [vmem:[#allocation2 + $0x108] sm:$0xff] %vm916_vm8, %v891_v11 }
 0x18a   :  { %927 = vst.msk [vmem:[#allocation2 + $0xf0] sm:$0xff] %vm916_vm8, %v889_v12  ;;  %1266 = vrot.lane.b32.xlu1 %v7760_v15, %s7213_s11 }
 0x18b   :  { %1264 = vrot.lane.b32.xlu0 %v7765_v16, %s7213_s11 }
 0x18c   :  { %v895_v17 = vpop.permute.xlu1 %894 }
 0x18d   :  { %v893_v18 = vpop.permute.xlu0 %892  ;;  %930 = vst.msk [vmem:[#allocation2 + $0x138] sm:$0xff] %vm916_vm8, %v895_v17 }
 0x18e   :  { %929 = vst.msk [vmem:[#allocation2 + $0x120] sm:$0xff] %vm916_vm8, %v893_v18  ;;  %1270 = vrot.lane.b32.xlu1 %v7776_v35, %s7213_s11 }
 0x18f   :  { %1268 = vrot.lane.b32.xlu0 %v7781_v36, %s7213_s11 }
 0x190   :  { %v899_v19 = vpop.permute.xlu1 %898 }
 0x191   :  { %v897_v20 = vpop.permute.xlu0 %896  ;;  %932 = vst.msk [vmem:[#allocation2 + $0x168] sm:$0xff] %vm916_vm8, %v899_v19 }
 0x192   :  { %931 = vst.msk [vmem:[#allocation2 + $0x150] sm:$0xff] %vm916_vm8, %v897_v20  ;;  %1274 = vrot.lane.b32.xlu1 %v7792_v39, %s7213_s11 }
 0x193   :  { %1272 = vrot.lane.b32.xlu0 %v7797_v40, %s7213_s11 }
 0x194   :  { %v968_v21 = vpop.permute.xlu1 %967 }
 0x195   :  { %v966_v22 = vpop.permute.xlu0 %965  ;;  %1015 = vst.msk [vmem:[#allocation2 + $0x18] sm:$0xff] %vm1013_vm9, %v968_v21 }
 0x196   :  { %1014 = vst.msk [vmem:[#allocation2] sm:$0xff] %vm1013_vm9, %v966_v22  ;;  %1278 = vrot.lane.b32.xlu1 %v7808_v43, %s7213_s11 }
 0x197   :  { %1276 = vrot.lane.b32.xlu0 %v7813_v44, %s7213_s11 }
 0x198   :  { %v972_v23 = vpop.permute.xlu1 %971 }
 0x199   :  { %v970_v24 = vpop.permute.xlu0 %969  ;;  %1017 = vst.msk [vmem:[#allocation2 + $0x48] sm:$0xff] %vm1013_vm9, %v972_v23 }
 0x19a   :  { %1016 = vst.msk [vmem:[#allocation2 + $0x30] sm:$0xff] %vm1013_vm9, %v970_v24  ;;  %1282 = vrot.lane.b32.xlu1 %v7824_v47, %s7213_s11 }
 0x19b   :  { %1280 = vrot.lane.b32.xlu0 %v7829_v48, %s7213_s11 }
 0x19c   :  { %v976_v25 = vpop.permute.xlu1 %975 }
 0x19d   :  { %v974_v26 = vpop.permute.xlu0 %973  ;;  %1019 = vst.msk [vmem:[#allocation2 + $0x78] sm:$0xff] %vm1013_vm9, %v976_v25 }
 0x19e   :  { %1018 = vst.msk [vmem:[#allocation2 + $0x60] sm:$0xff] %vm1013_vm9, %v974_v26  ;;  %1286 = vrot.lane.b32.xlu1 %v7840_v51, %s7213_s11 }
 0x19f   :  { %1284 = vrot.lane.b32.xlu0 %v7845_v52, %s7213_s11 }
 0x1a0   :  { %v980_v29 = vpop.permute.xlu1 %979 }
 0x1a1   :  { %v978_v30 = vpop.permute.xlu0 %977  ;;  %1021 = vst.msk [vmem:[#allocation2 + $0xa8] sm:$0xff] %vm1013_vm9, %v980_v29 }
 0x1a2   :  { %1020 = vst.msk [vmem:[#allocation2 + $0x90] sm:$0xff] %vm1013_vm9, %v978_v30  ;;  %1355 = vrot.lane.b32.xlu1 %v7728_v27, %s7214_s12 }
 0x1a3   :  { %1353 = vrot.lane.b32.xlu0 %v7733_v28, %s7214_s12 }
 0x1a4   :  { %v984_v13 = vpop.permute.xlu1 %983 }
 0x1a5   :  { %v982_v14 = vpop.permute.xlu0 %981  ;;  %1023 = vst.msk [vmem:[#allocation2 + $0xd8] sm:$0xff] %vm1013_vm9, %v984_v13 }
 0x1a6   :  { %1022 = vst.msk [vmem:[#allocation2 + $0xc0] sm:$0xff] %vm1013_vm9, %v982_v14  ;;  %1359 = vrot.lane.b32.xlu1 %v7744_v31, %s7214_s12 }
 0x1a7   :  { %1357 = vrot.lane.b32.xlu0 %v7749_v32, %s7214_s12 }
 0x1a8   :  { %v988_v33 = vpop.permute.xlu1 %987 }
 0x1a9   :  { %v986_v34 = vpop.permute.xlu0 %985  ;;  %1025 = vst.msk [vmem:[#allocation2 + $0x108] sm:$0xff] %vm1013_vm9, %v988_v33 }
 0x1aa   :  { %1024 = vst.msk [vmem:[#allocation2 + $0xf0] sm:$0xff] %vm1013_vm9, %v986_v34  ;;  %1363 = vrot.lane.b32.xlu1 %v7760_v15, %s7214_s12 }
 0x1ab   :  { %1361 = vrot.lane.b32.xlu0 %v7765_v16, %s7214_s12 }
 0x1ac   :  { %v992_v37 = vpop.permute.xlu1 %991 }
 0x1ad   :  { %v990_v38 = vpop.permute.xlu0 %989  ;;  %1027 = vst.msk [vmem:[#allocation2 + $0x138] sm:$0xff] %vm1013_vm9, %v992_v37 }
 0x1ae   :  { %1026 = vst.msk [vmem:[#allocation2 + $0x120] sm:$0xff] %vm1013_vm9, %v990_v38  ;;  %1367 = vrot.lane.b32.xlu1 %v7776_v35, %s7214_s12 }
 0x1af   :  { %1365 = vrot.lane.b32.xlu0 %v7781_v36, %s7214_s12 }
 0x1b0   :  { %v996_v41 = vpop.permute.xlu1 %995 }
 0x1b1   :  { %v994_v42 = vpop.permute.xlu0 %993  ;;  %1029 = vst.msk [vmem:[#allocation2 + $0x168] sm:$0xff] %vm1013_vm9, %v996_v41 }
 0x1b2   :  { %1028 = vst.msk [vmem:[#allocation2 + $0x150] sm:$0xff] %vm1013_vm9, %v994_v42  ;;  %1371 = vrot.lane.b32.xlu1 %v7792_v39, %s7214_s12 }
 0x1b3   :  { %1369 = vrot.lane.b32.xlu0 %v7797_v40, %s7214_s12 }
 0x1b4   :  { %v1065_v45 = vpop.permute.xlu1 %1064 }
 0x1b5   :  { %v1063_v46 = vpop.permute.xlu0 %1062  ;;  %1112 = vst.msk [vmem:[#allocation2 + $0x18] sm:$0xff] %vm1110_vm10, %v1065_v45 }
 0x1b6   :  { %1111 = vst.msk [vmem:[#allocation2] sm:$0xff] %vm1110_vm10, %v1063_v46  ;;  %1375 = vrot.lane.b32.xlu1 %v7808_v43, %s7214_s12 }
 0x1b7   :  { %1373 = vrot.lane.b32.xlu0 %v7813_v44, %s7214_s12 }
 0x1b8   :  { %v1069_v49 = vpop.permute.xlu1 %1068 }
 0x1b9   :  { %v1067_v50 = vpop.permute.xlu0 %1066  ;;  %1114 = vst.msk [vmem:[#allocation2 + $0x48] sm:$0xff] %vm1110_vm10, %v1069_v49 }
 0x1ba   :  { %1113 = vst.msk [vmem:[#allocation2 + $0x30] sm:$0xff] %vm1110_vm10, %v1067_v50  ;;  %1379 = vrot.lane.b32.xlu1 %v7824_v47, %s7214_s12 }
 0x1bb   :  { %1377 = vrot.lane.b32.xlu0 %v7829_v48, %s7214_s12 }
 0x1bc   :  { %v1073_v53 = vpop.permute.xlu1 %1072 }
 0x1bd   :  { %v1071_v54 = vpop.permute.xlu0 %1070  ;;  %1116 = vst.msk [vmem:[#allocation2 + $0x78] sm:$0xff] %vm1110_vm10, %v1073_v53 }
 0x1be   :  { %1115 = vst.msk [vmem:[#allocation2 + $0x60] sm:$0xff] %vm1110_vm10, %v1071_v54  ;;  %1383 = vrot.lane.b32.xlu1 %v7840_v51, %s7214_s12 }
 0x1bf   :  { %1381 = vrot.lane.b32.xlu0 %v7845_v52, %s7214_s12  ;;  %s7221_s12 = smov 56  }
 0x1c0   :  { %v1077_v55 = vpop.permute.xlu1 %1076 }
 0x1c1   :  { %v1075_v56 = vpop.permute.xlu0 %1074  ;;  %1118 = vst.msk [vmem:[#allocation2 + $0xa8] sm:$0xff] %vm1110_vm10, %v1077_v55 }
 0x1c2   :  { %1117 = vst.msk [vmem:[#allocation2 + $0x90] sm:$0xff] %vm1110_vm10, %v1075_v56  ;;  %1452 = vrot.lane.b32.xlu1 %v7728_v27, %s7215_s14 }
 0x1c3   :  { %1450 = vrot.lane.b32.xlu0 %v7733_v28, %s7215_s14 }
 0x1c4   :  { %v1081_v57 = vpop.permute.xlu1 %1080 }
 0x1c5   :  { %v1079_v58 = vpop.permute.xlu0 %1078  ;;  %1120 = vst.msk [vmem:[#allocation2 + $0xd8] sm:$0xff] %vm1110_vm10, %v1081_v57 }
 0x1c6   :  { %1119 = vst.msk [vmem:[#allocation2 + $0xc0] sm:$0xff] %vm1110_vm10, %v1079_v58  ;;  %1456 = vrot.lane.b32.xlu1 %v7744_v31, %s7215_s14 }
 0x1c7   :  { %1454 = vrot.lane.b32.xlu0 %v7749_v32, %s7215_s14 }
 0x1c8   :  { %v1085_v59 = vpop.permute.xlu1 %1084 }
 0x1c9   :  { %v1083_v60 = vpop.permute.xlu0 %1082  ;;  %1122 = vst.msk [vmem:[#allocation2 + $0x108] sm:$0xff] %vm1110_vm10, %v1085_v59 }
 0x1ca   :  { %1121 = vst.msk [vmem:[#allocation2 + $0xf0] sm:$0xff] %vm1110_vm10, %v1083_v60  ;;  %1460 = vrot.lane.b32.xlu1 %v7760_v15, %s7215_s14 }
 0x1cb   :  { %1458 = vrot.lane.b32.xlu0 %v7765_v16, %s7215_s14 }
 0x1cc   :  { %v1089_v61 = vpop.permute.xlu1 %1088 }
 0x1cd   :  { %v1087_v62 = vpop.permute.xlu0 %1086  ;;  %1124 = vst.msk [vmem:[#allocation2 + $0x138] sm:$0xff] %vm1110_vm10, %v1089_v61 }
 0x1ce   :  { %1123 = vst.msk [vmem:[#allocation2 + $0x120] sm:$0xff] %vm1110_vm10, %v1087_v62  ;;  %1464 = vrot.lane.b32.xlu1 %v7776_v35, %s7215_s14 }
 0x1cf   :  { %1462 = vrot.lane.b32.xlu0 %v7781_v36, %s7215_s14 }
 0x1d0   :  { %v1093_v63 = vpop.permute.xlu1 %1092 }
 0x1d1   :  { %v1091_v0 = vpop.permute.xlu0 %1090  ;;  %1126 = vst.msk [vmem:[#allocation2 + $0x168] sm:$0xff] %vm1110_vm10, %v1093_v63 }
 0x1d2   :  { %1125 = vst.msk [vmem:[#allocation2 + $0x150] sm:$0xff] %vm1110_vm10, %v1091_v0  ;;  %1468 = vrot.lane.b32.xlu1 %v7792_v39, %s7215_s14 }
 0x1d3   :  { %1466 = vrot.lane.b32.xlu0 %v7797_v40, %s7215_s14 }
 0x1d4   :  { %v1162_v1 = vpop.permute.xlu1 %1161 }
 0x1d5   :  { %v1160_v2 = vpop.permute.xlu0 %1159  ;;  %1209 = vst.msk [vmem:[#allocation2 + $0x18] sm:$0xff] %vm1207_vm11, %v1162_v1  ;;  %v8216_v1 = vld [vmem:[%s10263_s1 + $0x8] sm:$0xff] }
 0x1d6   :  { %1208 = vst.msk [vmem:[#allocation2] sm:$0xff] %vm1207_vm11, %v1160_v2  ;;  %1472 = vrot.lane.b32.xlu1 %v7808_v43, %s7215_s14 }
 0x1d7   :  { %1470 = vrot.lane.b32.xlu0 %v7813_v44, %s7215_s14 }
 0x1d8   :  { %v1166_v3 = vpop.permute.xlu1 %1165 }
 0x1d9   :  { %v1164_v4 = vpop.permute.xlu0 %1163  ;;  %1211 = vst.msk [vmem:[#allocation2 + $0x48] sm:$0xff] %vm1207_vm11, %v1166_v3 }
 0x1da   :  { %1210 = vst.msk [vmem:[#allocation2 + $0x30] sm:$0xff] %vm1207_vm11, %v1164_v4  ;;  %1476 = vrot.lane.b32.xlu1 %v7824_v47, %s7215_s14  ;;  %v8226_v4 = vld [vmem:[%s10263_s1 + $0x18] sm:$0xff] }
 0x1db   :  { %1474 = vrot.lane.b32.xlu0 %v7829_v48, %s7215_s14 }
 0x1dc   :  { %v1170_v5 = vpop.permute.xlu1 %1169 }
 0x1dd   :  { %v1168_v6 = vpop.permute.xlu0 %1167  ;;  %1213 = vst.msk [vmem:[#allocation2 + $0x78] sm:$0xff] %vm1207_vm11, %v1170_v5 }
 0x1de   :  { %1212 = vst.msk [vmem:[#allocation2 + $0x60] sm:$0xff] %vm1207_vm11, %v1168_v6  ;;  %1480 = vrot.lane.b32.xlu1 %v7840_v51, %s7215_s14 }
 0x1df   :  { %1478 = vrot.lane.b32.xlu0 %v7845_v52, %s7215_s14 }
 0x1e0   :  { %v1174_v7 = vpop.permute.xlu1 %1173 }
 0x1e1   :  { %v1172_v8 = vpop.permute.xlu0 %1171  ;;  %1215 = vst.msk [vmem:[#allocation2 + $0xa8] sm:$0xff] %vm1207_vm11, %v1174_v7 }
 0x1e2   :  { %1214 = vst.msk [vmem:[#allocation2 + $0x90] sm:$0xff] %vm1207_vm11, %v1172_v8  ;;  %1549 = vrot.lane.b32.xlu1 %v7728_v27, %s7216_s15 }
 0x1e3   :  { %1547 = vrot.lane.b32.xlu0 %v7733_v28, %s7216_s15 }
 0x1e4   :  { %v1178_v9 = vpop.permute.xlu1 %1177 }
 0x1e5   :  { %v1176_v10 = vpop.permute.xlu0 %1175  ;;  %1217 = vst.msk [vmem:[#allocation2 + $0xd8] sm:$0xff] %vm1207_vm11, %v1178_v9 }
 0x1e6   :  { %1216 = vst.msk [vmem:[#allocation2 + $0xc0] sm:$0xff] %vm1207_vm11, %v1176_v10  ;;  %1553 = vrot.lane.b32.xlu1 %v7744_v31, %s7216_s15 }
 0x1e7   :  { %1551 = vrot.lane.b32.xlu0 %v7749_v32, %s7216_s15 }
 0x1e8   :  { %v1182_v11 = vpop.permute.xlu1 %1181 }
 0x1e9   :  { %v1180_v12 = vpop.permute.xlu0 %1179  ;;  %1219 = vst.msk [vmem:[#allocation2 + $0x108] sm:$0xff] %vm1207_vm11, %v1182_v11 }
 0x1ea   :  { %1218 = vst.msk [vmem:[#allocation2 + $0xf0] sm:$0xff] %vm1207_vm11, %v1180_v12  ;;  %1557 = vrot.lane.b32.xlu1 %v7760_v15, %s7216_s15 }
 0x1eb   :  { %1555 = vrot.lane.b32.xlu0 %v7765_v16, %s7216_s15 }
 0x1ec   :  { %v1186_v17 = vpop.permute.xlu1 %1185 }
 0x1ed   :  { %v1184_v18 = vpop.permute.xlu0 %1183  ;;  %1221 = vst.msk [vmem:[#allocation2 + $0x138] sm:$0xff] %vm1207_vm11, %v1186_v17  ;;  %v8252_v17 = vld [vmem:[%s10263_s1 + $0x28] sm:$0xff] }
 0x1ee   :  { %1220 = vst.msk [vmem:[#allocation2 + $0x120] sm:$0xff] %vm1207_vm11, %v1184_v18  ;;  %1561 = vrot.lane.b32.xlu1 %v7776_v35, %s7216_s15 }
 0x1ef   :  { %1559 = vrot.lane.b32.xlu0 %v7781_v36, %s7216_s15 }
 0x1f0   :  { %v1190_v19 = vpop.permute.xlu1 %1189 }
 0x1f1   :  { %v1188_v20 = vpop.permute.xlu0 %1187  ;;  %1223 = vst.msk [vmem:[#allocation2 + $0x168] sm:$0xff] %vm1207_vm11, %v1190_v19 }
 0x1f2   :  { %1222 = vst.msk [vmem:[#allocation2 + $0x150] sm:$0xff] %vm1207_vm11, %v1188_v20  ;;  %1565 = vrot.lane.b32.xlu1 %v7792_v39, %s7216_s15  ;;  %v8262_v20 = vld [vmem:[%s10263_s1 + $0x38] sm:$0xff] }
 0x1f3   :  { %1563 = vrot.lane.b32.xlu0 %v7797_v40, %s7216_s15 }
 0x1f4   :  { %v1259_v21 = vpop.permute.xlu1 %1258 }
 0x1f5   :  { %v1257_v22 = vpop.permute.xlu0 %1256  ;;  %1306 = vst.msk [vmem:[#allocation2 + $0x18] sm:$0xff] %vm1304_vm12, %v1259_v21 }
 0x1f6   :  { %1305 = vst.msk [vmem:[#allocation2] sm:$0xff] %vm1304_vm12, %v1257_v22  ;;  %1569 = vrot.lane.b32.xlu1 %v7808_v43, %s7216_s15 }
 0x1f7   :  { %1567 = vrot.lane.b32.xlu0 %v7813_v44, %s7216_s15 }
 0x1f8   :  { %v1263_v23 = vpop.permute.xlu1 %1262 }
 0x1f9   :  { %v1261_v24 = vpop.permute.xlu0 %1260  ;;  %1308 = vst.msk [vmem:[#allocation2 + $0x48] sm:$0xff] %vm1304_vm12, %v1263_v23 }
 0x1fa   :  { %1307 = vst.msk [vmem:[#allocation2 + $0x30] sm:$0xff] %vm1304_vm12, %v1261_v24  ;;  %1573 = vrot.lane.b32.xlu1 %v7824_v47, %s7216_s15 }
 0x1fb   :  { %1571 = vrot.lane.b32.xlu0 %v7829_v48, %s7216_s15 }
 0x1fc   :  { %v1267_v25 = vpop.permute.xlu1 %1266 }
 0x1fd   :  { %v1265_v26 = vpop.permute.xlu0 %1264  ;;  %1310 = vst.msk [vmem:[#allocation2 + $0x78] sm:$0xff] %vm1304_vm12, %v1267_v25 }
 0x1fe   :  { %1309 = vst.msk [vmem:[#allocation2 + $0x60] sm:$0xff] %vm1304_vm12, %v1265_v26  ;;  %1577 = vrot.lane.b32.xlu1 %v7840_v51, %s7216_s15 }
 0x1ff   :  { %1575 = vrot.lane.b32.xlu0 %v7845_v52, %s7216_s15 }
 0x200   :  { %v1271_v29 = vpop.permute.xlu1 %1270 }
 0x201   :  { %v1269_v30 = vpop.permute.xlu0 %1268  ;;  %1312 = vst.msk [vmem:[#allocation2 + $0xa8] sm:$0xff] %vm1304_vm12, %v1271_v29 }
 0x202   :  { %1311 = vst.msk [vmem:[#allocation2 + $0x90] sm:$0xff] %vm1304_vm12, %v1269_v30  ;;  %1646 = vrot.lane.b32.xlu1 %v7728_v27, %s7217_s13 }
 0x203   :  { %1644 = vrot.lane.b32.xlu0 %v7733_v28, %s7217_s13 }
 0x204   :  { %v1275_v13 = vpop.permute.xlu1 %1274 }
 0x205   :  { %v1273_v14 = vpop.permute.xlu0 %1272  ;;  %1314 = vst.msk [vmem:[#allocation2 + $0xd8] sm:$0xff] %vm1304_vm12, %v1275_v13 }
 0x206   :  { %1313 = vst.msk [vmem:[#allocation2 + $0xc0] sm:$0xff] %vm1304_vm12, %v1273_v14  ;;  %1650 = vrot.lane.b32.xlu1 %v7744_v31, %s7217_s13 }
 0x207   :  { %1648 = vrot.lane.b32.xlu0 %v7749_v32, %s7217_s13 }
 0x208   :  { %v1279_v33 = vpop.permute.xlu1 %1278 }
 0x209   :  { %v1277_v34 = vpop.permute.xlu0 %1276  ;;  %1316 = vst.msk [vmem:[#allocation2 + $0x108] sm:$0xff] %vm1304_vm12, %v1279_v33  ;;  %v1809_v33 = vld [vmem:[%s10263_s1 + $0x50] sm:$0xff] }
 0x20a   :  { %1315 = vst.msk [vmem:[#allocation2 + $0xf0] sm:$0xff] %vm1304_vm12, %v1277_v34  ;;  %1654 = vrot.lane.b32.xlu1 %v7760_v15, %s7217_s13  ;;  %v1808_v34 = vld [vmem:[%s10263_s1 + $0x40] sm:$0xff] }
 0x20b   :  { %1652 = vrot.lane.b32.xlu0 %v7765_v16, %s7217_s13 }
 0x20c   :  { %v1283_v37 = vpop.permute.xlu1 %1282 }
 0x20d   :  { %v1281_v38 = vpop.permute.xlu0 %1280  ;;  %1318 = vst.msk [vmem:[#allocation2 + $0x138] sm:$0xff] %vm1304_vm12, %v1283_v37 }
 0x20e   :  { %1317 = vst.msk [vmem:[#allocation2 + $0x120] sm:$0xff] %vm1304_vm12, %v1281_v38  ;;  %1658 = vrot.lane.b32.xlu1 %v7776_v35, %s7217_s13 }
 0x20f   :  { %1656 = vrot.lane.b32.xlu0 %v7781_v36, %s7217_s13 }
 0x210   :  { %v1287_v41 = vpop.permute.xlu1 %1286 }
 0x211   :  { %v1285_v42 = vpop.permute.xlu0 %1284  ;;  %1320 = vst.msk [vmem:[#allocation2 + $0x168] sm:$0xff] %vm1304_vm12, %v1287_v41 }
 0x212   :  { %1319 = vst.msk [vmem:[#allocation2 + $0x150] sm:$0xff] %vm1304_vm12, %v1285_v42  ;;  %1662 = vrot.lane.b32.xlu1 %v7792_v39, %s7217_s13 }
 0x213   :  { %1660 = vrot.lane.b32.xlu0 %v7797_v40, %s7217_s13 }
 0x214   :  { %v1356_v45 = vpop.permute.xlu1 %1355 }
 0x215   :  { %v1354_v46 = vpop.permute.xlu0 %1353  ;;  %1403 = vst.msk [vmem:[#allocation2 + $0x18] sm:$0xff] %vm1401_vm13, %v1356_v45 }
 0x216   :  { %1402 = vst.msk [vmem:[#allocation2] sm:$0xff] %vm1401_vm13, %v1354_v46  ;;  %1666 = vrot.lane.b32.xlu1 %v7808_v43, %s7217_s13 }
 0x217   :  { %1664 = vrot.lane.b32.xlu0 %v7813_v44, %s7217_s13 }
 0x218   :  { %v1360_v49 = vpop.permute.xlu1 %1359 }
 0x219   :  { %v1358_v50 = vpop.permute.xlu0 %1357  ;;  %1405 = vst.msk [vmem:[#allocation2 + $0x48] sm:$0xff] %vm1401_vm13, %v1360_v49 }
 0x21a   :  { %1404 = vst.msk [vmem:[#allocation2 + $0x30] sm:$0xff] %vm1401_vm13, %v1358_v50  ;;  %1670 = vrot.lane.b32.xlu1 %v7824_v47, %s7217_s13 }
 0x21b   :  { %1668 = vrot.lane.b32.xlu0 %v7829_v48, %s7217_s13 }
 0x21c   :  { %v1364_v53 = vpop.permute.xlu1 %1363 }
 0x21d   :  { %v1362_v54 = vpop.permute.xlu0 %1361  ;;  %1407 = vst.msk [vmem:[#allocation2 + $0x78] sm:$0xff] %vm1401_vm13, %v1364_v53  ;;  %v8322_v53 = vld [vmem:[%s10263_s1 + $0x48] sm:$0xff] }
 0x21e   :  { %1406 = vst.msk [vmem:[#allocation2 + $0x60] sm:$0xff] %vm1401_vm13, %v1362_v54  ;;  %1674 = vrot.lane.b32.xlu1 %v7840_v51, %s7217_s13 }
 0x21f   :  { %1672 = vrot.lane.b32.xlu0 %v7845_v52, %s7217_s13 }
 0x220   :  { %v1368_v55 = vpop.permute.xlu1 %1367 }
 0x221   :  { %v1366_v56 = vpop.permute.xlu0 %1365  ;;  %1409 = vst.msk [vmem:[#allocation2 + $0xa8] sm:$0xff] %vm1401_vm13, %v1368_v55 }
 0x222   :  { %1408 = vst.msk [vmem:[#allocation2 + $0x90] sm:$0xff] %vm1401_vm13, %v1366_v56  ;;  %1742 = vrot.lane.b32.xlu1 %v7728_v27, %s7203_s19  ;;  %v8332_v56 = vld [vmem:[%s10263_s1 + $0x58] sm:$0xff] }
 0x223   :  { %1740 = vrot.lane.b32.xlu0 %v7733_v28, %s7203_s19 }
 0x224   :  { %v1372_v57 = vpop.permute.xlu1 %1371 }
 0x225   :  { %v1370_v58 = vpop.permute.xlu0 %1369  ;;  %1411 = vst.msk [vmem:[#allocation2 + $0xd8] sm:$0xff] %vm1401_vm13, %v1372_v57 }
 0x226   :  { %1410 = vst.msk [vmem:[#allocation2 + $0xc0] sm:$0xff] %vm1401_vm13, %v1370_v58  ;;  %1746 = vrot.lane.b32.xlu1 %v7744_v31, %s7203_s19 }
 0x227   :  { %1744 = vrot.lane.b32.xlu0 %v7749_v32, %s7203_s19 }
 0x228   :  { %v1376_v59 = vpop.permute.xlu1 %1375 }
 0x229   :  { %v1374_v60 = vpop.permute.xlu0 %1373  ;;  %1413 = vst.msk [vmem:[#allocation2 + $0x108] sm:$0xff] %vm1401_vm13, %v1376_v59 }
 0x22a   :  { %1412 = vst.msk [vmem:[#allocation2 + $0xf0] sm:$0xff] %vm1401_vm13, %v1374_v60  ;;  %1750 = vrot.lane.b32.xlu1 %v7760_v15, %s7203_s19 }
 0x22b   :  { %1748 = vrot.lane.b32.xlu0 %v7765_v16, %s7203_s19 }
 0x22c   :  { %v1380_v27 = vpop.permute.xlu1 %1379 }
 0x22d   :  { %v1378_v28 = vpop.permute.xlu0 %1377  ;;  %1415 = vst.msk [vmem:[#allocation2 + $0x138] sm:$0xff] %vm1401_vm13, %v1380_v27 }
 0x22e   :  { %1414 = vst.msk [vmem:[#allocation2 + $0x120] sm:$0xff] %vm1401_vm13, %v1378_v28  ;;  %1754 = vrot.lane.b32.xlu1 %v7776_v35, %s7203_s19 }
 0x22f   :  { %1752 = vrot.lane.b32.xlu0 %v7781_v36, %s7203_s19 }
 0x230   :  { %v1384_v31 = vpop.permute.xlu1 %1383 }
 0x231   :  { %v1382_v32 = vpop.permute.xlu0 %1381  ;;  %1417 = vst.msk [vmem:[#allocation2 + $0x168] sm:$0xff] %vm1401_vm13, %v1384_v31 }
 0x232   :  { %1416 = vst.msk [vmem:[#allocation2 + $0x150] sm:$0xff] %vm1401_vm13, %v1382_v32  ;;  %1758 = vrot.lane.b32.xlu1 %v7792_v39, %s7203_s19 }
 0x233   :  { %1756 = vrot.lane.b32.xlu0 %v7797_v40, %s7203_s19 }
 0x234   :  { %v1453_v15 = vpop.permute.xlu1 %1452 }
 0x235   :  { %v1451_v16 = vpop.permute.xlu0 %1450  ;;  %1500 = vst.msk [vmem:[#allocation2 + $0x20] sm:$0xff] %vm1498_vm14, %v1453_v15 }
 0x236   :  { %1499 = vst.msk [vmem:[#allocation2 + $0x8] sm:$0xff] %vm1498_vm14, %v1451_v16  ;;  %1762 = vrot.lane.b32.xlu1 %v7808_v43, %s7203_s19  ;;  %v1805_v43 = vld [vmem:[%s10263_s1 + $0x10] sm:$0xff] }
 0x237   :  { %1760 = vrot.lane.b32.xlu0 %v7813_v44, %s7203_s19  ;;  %v1804_v44 = vld [vmem:[%s10263_s1] sm:$0xff] }
 0x238   :  { %v1457_v35 = vpop.permute.xlu1 %1456 }
 0x239   :  { %v1455_v36 = vpop.permute.xlu0 %1454  ;;  %1502 = vst.msk [vmem:[#allocation2 + $0x50] sm:$0xff] %vm1498_vm14, %v1457_v35 }
 0x23a   :  { %1501 = vst.msk [vmem:[#allocation2 + $0x38] sm:$0xff] %vm1498_vm14, %v1455_v36  ;;  %1766 = vrot.lane.b32.xlu1 %v7824_v47, %s7203_s19 }
 0x23b   :  { %1764 = vrot.lane.b32.xlu0 %v7829_v48, %s7203_s19 }
 0x23c   :  { %v1461_v39 = vpop.permute.xlu1 %1460 }
 0x23d   :  { %v1459_v40 = vpop.permute.xlu0 %1458  ;;  %1504 = vst.msk [vmem:[#allocation2 + $0x80] sm:$0xff] %vm1498_vm14, %v1461_v39  ;;  %v1811_v39 = vld [vmem:[%s10263_s1 + $0x70] sm:$0xff] }
 0x23e   :  { %1503 = vst.msk [vmem:[#allocation2 + $0x68] sm:$0xff] %vm1498_vm14, %v1459_v40  ;;  %1770 = vrot.lane.b32.xlu1 %v7840_v51, %s7203_s19  ;;  %v1807_v51 = vld [vmem:[%s10263_s1 + $0x30] sm:$0xff]  ;;  %v1810_v40 = vld [vmem:[%s10263_s1 + $0x60] sm:$0xff] }
 0x23f   :  { %1768 = vrot.lane.b32.xlu0 %v7845_v52, %s7203_s19  ;;  %v1806_v52 = vld [vmem:[%s10263_s1 + $0x20] sm:$0xff] }
 0x240   :  { %v1465_v47 = vpop.permute.xlu1 %1464 }
 0x241   :  { %v1463_v48 = vpop.permute.xlu0 %1462  ;;  %1506 = vst.msk [vmem:[#allocation2 + $0xb0] sm:$0xff] %vm1498_vm14, %v1465_v47 }
 0x242   :  { %1505 = vst.msk [vmem:[#allocation2 + $0x98] sm:$0xff] %vm1498_vm14, %v1463_v48  ;;  %1838 = vrot.lane.b32.xlu1 %v1805_v43, %s7218_s21 }
 0x243   :  { %1836 = vrot.lane.b32.xlu0 %v1804_v44, %s7218_s21 }
 0x244   :  { %v1469_v61 = vpop.permute.xlu1 %1468 }
 0x245   :  { %v1467_v62 = vpop.permute.xlu0 %1466  ;;  %1508 = vst.msk [vmem:[#allocation2 + $0xe0] sm:$0xff] %vm1498_vm14, %v1469_v61 }
 0x246   :  { %1507 = vst.msk [vmem:[#allocation2 + $0xc8] sm:$0xff] %vm1498_vm14, %v1467_v62  ;;  %1842 = vrot.lane.b32.xlu1 %v1807_v51, %s7218_s21 }
 0x247   :  { %1840 = vrot.lane.b32.xlu0 %v1806_v52, %s7218_s21 }
 0x248   :  { %v1473_v63 = vpop.permute.xlu1 %1472 }
 0x249   :  { %v1471_v0 = vpop.permute.xlu0 %1470  ;;  %1510 = vst.msk [vmem:[#allocation2 + $0x110] sm:$0xff] %vm1498_vm14, %v1473_v63  ;;  %v8398_v63 = vld [vmem:[%s10263_s1 + $0x68] sm:$0xff] }
 0x24a   :  { %1509 = vst.msk [vmem:[#allocation2 + $0xf8] sm:$0xff] %vm1498_vm14, %v1471_v0  ;;  %1934 = vrot.lane.b32.xlu1 %v1805_v43, %s7205_s22 }
 0x24b   :  { %1932 = vrot.lane.b32.xlu0 %v1804_v44, %s7205_s22 }
 0x24c   :  { %v1477_v2 = vpop.permute.xlu1 %1476 }
 0x24d   :  { %v1475_v3 = vpop.permute.xlu0 %1474  ;;  %1512 = vst.msk [vmem:[#allocation2 + $0x140] sm:$0xff] %vm1498_vm14, %v1477_v2  ;;  %v8408_v2 = vld [vmem:[%s10263_s1 + $0x78] sm:$0xff] }
 0x24e   :  { %1511 = vst.msk [vmem:[#allocation2 + $0x128] sm:$0xff] %vm1498_vm14, %v1475_v3  ;;  %2062 = vrot.lane.b32.xlu1 %v8216_v1, %s7219_s30 }
 0x24f   :  { %2060 = vrot.lane.b32.xlu0 %v1804_v44, %s7219_s30 }
 0x250   :  { %v1481_v5 = vpop.permute.xlu1 %1480 }
 0x251   :  { %v1479_v6 = vpop.permute.xlu0 %1478  ;;  %1514 = vst.msk [vmem:[#allocation2 + $0x170] sm:$0xff] %vm1498_vm14, %v1481_v5 }
 0x252   :  { %1513 = vst.msk [vmem:[#allocation2 + $0x158] sm:$0xff] %vm1498_vm14, %v1479_v6  ;;  %2066 = vrot.lane.b32.xlu1 %v8226_v4, %s7219_s30 }
 0x253   :  { %2064 = vrot.lane.b32.xlu0 %v1805_v43, %s7219_s30 }
 0x254   :  { %v1550_v7 = vpop.permute.xlu1 %1549 }
 0x255   :  { %v1548_v8 = vpop.permute.xlu0 %1547  ;;  %1597 = vst.msk [vmem:[#allocation2 + $0x20] sm:$0xff] %vm1595_vm15, %v1550_v7 }
 0x256   :  { %1596 = vst.msk [vmem:[#allocation2 + $0x8] sm:$0xff] %vm1595_vm15, %v1548_v8  ;;  %2207 = vrot.lane.b32.xlu1 %v8226_v4, %s7207_s24 }
 0x257   :  { %2205 = vrot.lane.b32.xlu0 %v8216_v1, %s7207_s24 }
 0x258   :  { %v1554_v9 = vpop.permute.xlu1 %1553 }
 0x259   :  { %v1552_v10 = vpop.permute.xlu0 %1551  ;;  %1599 = vst.msk [vmem:[#allocation2 + $0x50] sm:$0xff] %vm1595_vm15, %v1554_v9 }
 0x25a   :  { %1598 = vst.msk [vmem:[#allocation2 + $0x38] sm:$0xff] %vm1595_vm15, %v1552_v10  ;;  %2303 = vrot.lane.b32.xlu1 %v8226_v4, %s7220_s6 }
 0x25b   :  { %2301 = vrot.lane.b32.xlu0 %v8216_v1, %s7220_s6 }
 0x25c   :  { %v1558_v11 = vpop.permute.xlu1 %1557 }
 0x25d   :  { %v1556_v12 = vpop.permute.xlu0 %1555  ;;  %1601 = vst.msk [vmem:[#allocation2 + $0x80] sm:$0xff] %vm1595_vm15, %v1558_v11 }
 0x25e   :  { %1600 = vst.msk [vmem:[#allocation2 + $0x68] sm:$0xff] %vm1595_vm15, %v1556_v12  ;;  %1938 = vrot.lane.b32.xlu1 %v1807_v51, %s7205_s22 }
 0x25f   :  { %1936 = vrot.lane.b32.xlu0 %v1806_v52, %s7205_s22 }
 0x260   :  { %v1562_v18 = vpop.permute.xlu1 %1561 }
 0x261   :  { %v1560_v19 = vpop.permute.xlu0 %1559  ;;  %1603 = vst.msk [vmem:[#allocation2 + $0xb0] sm:$0xff] %vm1595_vm15, %v1562_v18 }
 0x262   :  { %1602 = vst.msk [vmem:[#allocation2 + $0x98] sm:$0xff] %vm1595_vm15, %v1560_v19  ;;  %2070 = vrot.lane.b32.xlu1 %v8252_v17, %s7219_s30 }
 0x263   :  { %2068 = vrot.lane.b32.xlu0 %v1806_v52, %s7219_s30 }
 0x264   :  { %v1566_v21 = vpop.permute.xlu1 %1565 }
 0x265   :  { %v1564_v22 = vpop.permute.xlu0 %1563  ;;  %1605 = vst.msk [vmem:[#allocation2 + $0xe0] sm:$0xff] %vm1595_vm15, %v1566_v21  ;;  %v1813_v21 = vld [vmem:[%s10263_s1 + $0x90] sm:$0xff] }
 0x266   :  { %1604 = vst.msk [vmem:[#allocation2 + $0xc8] sm:$0xff] %vm1595_vm15, %v1564_v22  ;;  %2074 = vrot.lane.b32.xlu1 %v8262_v20, %s7219_s30  ;;  %v1812_v22 = vld [vmem:[%s10263_s1 + $0x80] sm:$0xff] }
 0x267   :  { %2072 = vrot.lane.b32.xlu0 %v1807_v51, %s7219_s30 }
 0x268   :  { %v1570_v23 = vpop.permute.xlu1 %1569 }
 0x269   :  { %v1568_v24 = vpop.permute.xlu0 %1567  ;;  %1607 = vst.msk [vmem:[#allocation2 + $0x110] sm:$0xff] %vm1595_vm15, %v1570_v23 }
 0x26a   :  { %1606 = vst.msk [vmem:[#allocation2 + $0xf8] sm:$0xff] %vm1595_vm15, %v1568_v24  ;;  %2399 = vrot.lane.b32.xlu1 %v8226_v4, %s7209_s26 }
 0x26b   :  { %2397 = vrot.lane.b32.xlu0 %v8216_v1, %s7209_s26 }
 0x26c   :  { %v1574_v25 = vpop.permute.xlu1 %1573 }
 0x26d   :  { %v1572_v26 = vpop.permute.xlu0 %1571  ;;  %1609 = vst.msk [vmem:[#allocation2 + $0x140] sm:$0xff] %vm1595_vm15, %v1574_v25 }
 0x26e   :  { %1608 = vst.msk [vmem:[#allocation2 + $0x128] sm:$0xff] %vm1595_vm15, %v1572_v26  ;;  %2495 = vrot.lane.b32.xlu1 %v8226_v4, %s7221_s12 }
 0x26f   :  { %2493 = vrot.lane.b32.xlu0 %v8216_v1, %s7221_s12 }
 0x270   :  { %v1578_v29 = vpop.permute.xlu1 %1577 }
 0x271   :  { %v1576_v30 = vpop.permute.xlu0 %1575  ;;  %1611 = vst.msk [vmem:[#allocation2 + $0x170] sm:$0xff] %vm1595_vm15, %v1578_v29 }
 0x272   :  { %1610 = vst.msk [vmem:[#allocation2 + $0x158] sm:$0xff] %vm1595_vm15, %v1576_v30  ;;  %2211 = vrot.lane.b32.xlu1 %v8262_v20, %s7207_s24 }
 0x273   :  { %2209 = vrot.lane.b32.xlu0 %v8252_v17, %s7207_s24 }
 0x274   :  { %v1647_v13 = vpop.permute.xlu1 %1646 }
 0x275   :  { %v1645_v14 = vpop.permute.xlu0 %1644  ;;  %1693 = vst.msk [vmem:[#allocation2 + $0x20] sm:$0xff] %vm140_vm0, %v1647_v13 }
 0x276   :  { %1692 = vst.msk [vmem:[#allocation2 + $0x8] sm:$0xff] %vm140_vm0, %v1645_v14  ;;  %2591 = vrot.lane.b32.xlu1 %v8226_v4, %s7211_s4 }
 0x277   :  { %2589 = vrot.lane.b32.xlu0 %v8216_v1, %s7211_s4 }
 0x278   :  { %v1651_v37 = vpop.permute.xlu1 %1650 }
 0x279   :  { %v1649_v38 = vpop.permute.xlu0 %1648  ;;  %1695 = vst.msk [vmem:[#allocation2 + $0x50] sm:$0xff] %vm140_vm0, %v1651_v37  ;;  %v8474_v37 = vld [vmem:[%s10263_s1 + $0x88] sm:$0xff] }
 0x27a   :  { %1694 = vst.msk [vmem:[#allocation2 + $0x38] sm:$0xff] %vm140_vm0, %v1649_v38  ;;  %1846 = vrot.lane.b32.xlu1 %v1809_v33, %s7218_s21 }
 0x27b   :  { %1844 = vrot.lane.b32.xlu0 %v1808_v34, %s7218_s21 }
 0x27c   :  { %v1655_v41 = vpop.permute.xlu1 %1654 }
 0x27d   :  { %v1653_v42 = vpop.permute.xlu0 %1652  ;;  %1697 = vst.msk [vmem:[#allocation2 + $0x80] sm:$0xff] %vm140_vm0, %v1655_v41 }
 0x27e   :  { %1696 = vst.msk [vmem:[#allocation2 + $0x68] sm:$0xff] %vm140_vm0, %v1653_v42  ;;  %2307 = vrot.lane.b32.xlu1 %v8262_v20, %s7220_s6  ;;  %v8484_v42 = vld [vmem:[%s10263_s1 + $0x98] sm:$0xff] }
 0x27f   :  { %2305 = vrot.lane.b32.xlu0 %v8252_v17, %s7220_s6 }
 0x280   :  { %v1659_v45 = vpop.permute.xlu1 %1658 }
 0x281   :  { %v1657_v46 = vpop.permute.xlu0 %1656  ;;  %1699 = vst.msk [vmem:[#allocation2 + $0xb0] sm:$0xff] %vm140_vm0, %v1659_v45 }
 0x282   :  { %1698 = vst.msk [vmem:[#allocation2 + $0x98] sm:$0xff] %vm140_vm0, %v1657_v46  ;;  %2687 = vrot.lane.b32.xlu1 %v8226_v4, %s7222_s17 }
 0x283   :  { %2685 = vrot.lane.b32.xlu0 %v8216_v1, %s7222_s17 }
 0x284   :  { %v1663_v49 = vpop.permute.xlu1 %1662 }
 0x285   :  { %v1661_v50 = vpop.permute.xlu0 %1660  ;;  %1701 = vst.msk [vmem:[#allocation2 + $0xe0] sm:$0xff] %vm140_vm0, %v1663_v49 }
 0x286   :  { %1700 = vst.msk [vmem:[#allocation2 + $0xc8] sm:$0xff] %vm140_vm0, %v1661_v50  ;;  %1942 = vrot.lane.b32.xlu1 %v1809_v33, %s7205_s22 }
 0x287   :  { %1940 = vrot.lane.b32.xlu0 %v1808_v34, %s7205_s22 }
 0x288   :  { %v1667_v54 = vpop.permute.xlu1 %1666 }
 0x289   :  { %v1665_v55 = vpop.permute.xlu0 %1664  ;;  %1703 = vst.msk [vmem:[#allocation2 + $0x110] sm:$0xff] %vm140_vm0, %v1667_v54 }
 0x28a   :  { %1702 = vst.msk [vmem:[#allocation2 + $0xf8] sm:$0xff] %vm140_vm0, %v1665_v55  ;;  %2078 = vrot.lane.b32.xlu1 %v8322_v53, %s7219_s30 }
 0x28b   :  { %2076 = vrot.lane.b32.xlu0 %v1808_v34, %s7219_s30 }
 0x28c   :  { %v1671_v57 = vpop.permute.xlu1 %1670 }
 0x28d   :  { %v1669_v58 = vpop.permute.xlu0 %1668  ;;  %1705 = vst.msk [vmem:[#allocation2 + $0x140] sm:$0xff] %vm140_vm0, %v1671_v57 }
 0x28e   :  { %1704 = vst.msk [vmem:[#allocation2 + $0x128] sm:$0xff] %vm140_vm0, %v1669_v58  ;;  %2082 = vrot.lane.b32.xlu1 %v8332_v56, %s7219_s30 }
 0x28f   :  { %2080 = vrot.lane.b32.xlu0 %v1809_v33, %s7219_s30 }
 0x290   :  { %v1675_v59 = vpop.permute.xlu1 %1674 }
 0x291   :  { %v1673_v60 = vpop.permute.xlu0 %1672  ;;  %1707 = vst.msk [vmem:[#allocation2 + $0x170] sm:$0xff] %vm140_vm0, %v1675_v59 }
 0x292   :  { %1706 = vst.msk [vmem:[#allocation2 + $0x158] sm:$0xff] %vm140_vm0, %v1673_v60  ;;  %2403 = vrot.lane.b32.xlu1 %v8262_v20, %s7209_s26  ;;  %vm2124_vm0 = vcmask 424960  }
 0x293   :  { %2401 = vrot.lane.b32.xlu0 %v8252_v17, %s7209_s26 }
 0x294   :  { %v1743_v27 = vpop.permute.xlu1 %1742 }
 0x295   :  { %v1741_v28 = vpop.permute.xlu0 %1740  ;;  %1789 = vst.msk [vmem:[#allocation2 + $0x20] sm:$0xff] %vm237_vm1, %v1743_v27  ;;  %v1815_v27 = vld [vmem:[%s10263_s1 + $0xb0] sm:$0xff] }
 0x296   :  { %1788 = vst.msk [vmem:[#allocation2 + $0x8] sm:$0xff] %vm237_vm1, %v1741_v28  ;;  %2783 = vrot.lane.b32.xlu1 %v8226_v4, %s7213_s11  ;;  %v1814_v28 = vld [vmem:[%s10263_s1 + $0xa0] sm:$0xff] }
 0x297   :  { %2781 = vrot.lane.b32.xlu0 %v8216_v1, %s7213_s11 }
 0x298   :  { %v1747_v31 = vpop.permute.xlu1 %1746 }
 0x299   :  { %v1745_v32 = vpop.permute.xlu0 %1744  ;;  %1791 = vst.msk [vmem:[#allocation2 + $0x50] sm:$0xff] %vm237_vm1, %v1747_v31 }
 0x29a   :  { %1790 = vst.msk [vmem:[#allocation2 + $0x38] sm:$0xff] %vm237_vm1, %v1745_v32  ;;  %2499 = vrot.lane.b32.xlu1 %v8262_v20, %s7221_s12 }
 0x29b   :  { %2497 = vrot.lane.b32.xlu0 %v8252_v17, %s7221_s12 }
 0x29c   :  { %v1751_v15 = vpop.permute.xlu1 %1750 }
 0x29d   :  { %v1749_v16 = vpop.permute.xlu0 %1748  ;;  %1793 = vst.msk [vmem:[#allocation2 + $0x80] sm:$0xff] %vm237_vm1, %v1751_v15 }
 0x29e   :  { %1792 = vst.msk [vmem:[#allocation2 + $0x68] sm:$0xff] %vm237_vm1, %v1749_v16  ;;  %2215 = vrot.lane.b32.xlu1 %v8332_v56, %s7207_s24 }
 0x29f   :  { %2213 = vrot.lane.b32.xlu0 %v8322_v53, %s7207_s24 }
 0x2a0   :  { %v1755_v35 = vpop.permute.xlu1 %1754 }
 0x2a1   :  { %v1753_v36 = vpop.permute.xlu0 %1752  ;;  %1795 = vst.msk [vmem:[#allocation2 + $0xb0] sm:$0xff] %vm237_vm1, %v1755_v35 }
 0x2a2   :  { %1794 = vst.msk [vmem:[#allocation2 + $0x98] sm:$0xff] %vm237_vm1, %v1753_v36  ;;  %2595 = vrot.lane.b32.xlu1 %v8262_v20, %s7211_s4 }
 0x2a3   :  { %2593 = vrot.lane.b32.xlu0 %v8252_v17, %s7211_s4 }
 0x2a4   :  { %v1759_v43 = vpop.permute.xlu1 %1758 }
 0x2a5   :  { %v1757_v44 = vpop.permute.xlu0 %1756  ;;  %1797 = vst.msk [vmem:[#allocation2 + $0xe0] sm:$0xff] %vm237_vm1, %v1759_v43 }
 0x2a6   :  { %1796 = vst.msk [vmem:[#allocation2 + $0xc8] sm:$0xff] %vm237_vm1, %v1757_v44  ;;  %1850 = vrot.lane.b32.xlu1 %v1811_v39, %s7218_s21 }
 0x2a7   :  { %1848 = vrot.lane.b32.xlu0 %v1810_v40, %s7218_s21 }
 0x2a8   :  { %v1763_v47 = vpop.permute.xlu1 %1762 }
 0x2a9   :  { %v1761_v48 = vpop.permute.xlu0 %1760  ;;  %1799 = vst.msk [vmem:[#allocation2 + $0x110] sm:$0xff] %vm237_vm1, %v1763_v47  ;;  %v8550_v47 = vld [vmem:[%s10263_s1 + $0xa8] sm:$0xff] }
 0x2aa   :  { %1798 = vst.msk [vmem:[#allocation2 + $0xf8] sm:$0xff] %vm237_vm1, %v1761_v48  ;;  %2311 = vrot.lane.b32.xlu1 %v8332_v56, %s7220_s6 }
 0x2ab   :  { %2309 = vrot.lane.b32.xlu0 %v8322_v53, %s7220_s6 }
 0x2ac   :  { %v1767_v51 = vpop.permute.xlu1 %1766 }
 0x2ad   :  { %v1765_v52 = vpop.permute.xlu0 %1764  ;;  %1801 = vst.msk [vmem:[#allocation2 + $0x140] sm:$0xff] %vm237_vm1, %v1767_v51 }
 0x2ae   :  { %1800 = vst.msk [vmem:[#allocation2 + $0x128] sm:$0xff] %vm237_vm1, %v1765_v52  ;;  %2691 = vrot.lane.b32.xlu1 %v8262_v20, %s7222_s17  ;;  %v8560_v52 = vld [vmem:[%s10263_s1 + $0xb8] sm:$0xff] }
 0x2af   :  { %2689 = vrot.lane.b32.xlu0 %v8252_v17, %s7222_s17 }
 0x2b0   :  { %v1771_v61 = vpop.permute.xlu1 %1770 }
 0x2b1   :  { %v1769_v62 = vpop.permute.xlu0 %1768  ;;  %1803 = vst.msk [vmem:[#allocation2 + $0x170] sm:$0xff] %vm237_vm1, %v1771_v61  ;;  %v2845_v61 = vld [vmem:[#allocation2] sm:$0xff] }
 0x2b2   :  { %1802 = vst.msk [vmem:[#allocation2 + $0x158] sm:$0xff] %vm237_vm1, %v1769_v62  ;;  %1946 = vrot.lane.b32.xlu1 %v1811_v39, %s7205_s22  ;;  %v2847_v62 = vld [vmem:[#allocation2 + $0x18] sm:$0xff]  ;;  %vm3632_vm1 = vcmask 908288  }
 0x2b3   :  { %1944 = vrot.lane.b32.xlu0 %v1810_v40, %s7205_s22 }
 0x2b4   :  { %v1839_v0 = vpop.permute.xlu1 %1838 }
 0x2b5   :  { %v1837_v1 = vpop.permute.xlu0 %1836  ;;  %1885 = vst.msk [vmem:[#allocation2 + $0x20] sm:$0xff] %vm334_vm2, %v1839_v0 }
 0x2b6   :  { %1884 = vst.msk [vmem:[#allocation2 + $0x8] sm:$0xff] %vm334_vm2, %v1837_v1  ;;  %2086 = vrot.lane.b32.xlu1 %v8398_v63, %s7219_s30 }
 0x2b7   :  { %2084 = vrot.lane.b32.xlu0 %v1810_v40, %s7219_s30 }
 0x2b8   :  { %v1843_v3 = vpop.permute.xlu1 %1842 }
 0x2b9   :  { %v1841_v4 = vpop.permute.xlu0 %1840  ;;  %1887 = vst.msk [vmem:[#allocation2 + $0x50] sm:$0xff] %vm334_vm2, %v1843_v3 }
 0x2ba   :  { %1886 = vst.msk [vmem:[#allocation2 + $0x38] sm:$0xff] %vm334_vm2, %v1841_v4  ;;  %2090 = vrot.lane.b32.xlu1 %v8408_v2, %s7219_s30 }
 0x2bb   :  { %2088 = vrot.lane.b32.xlu0 %v1811_v39, %s7219_s30 }
 0x2bc   :  { %v1935_v5 = vpop.permute.xlu1 %1934 }
 0x2bd   :  { %v1933_v6 = vpop.permute.xlu0 %1932  ;;  %1981 = vst.msk [vmem:[#allocation2 + $0x20] sm:$0xff] %vm431_vm3, %v1935_v5 }
 0x2be   :  { %1980 = vst.msk [vmem:[#allocation2 + $0x8] sm:$0xff] %vm431_vm3, %v1933_v6  ;;  %2407 = vrot.lane.b32.xlu1 %v8332_v56, %s7209_s26  ;;  %v8569_v6 = vpack.c.bf16 %v2847_v62, %v2845_v61 }
 0x2bf   :  { %2405 = vrot.lane.b32.xlu0 %v8322_v53, %s7209_s26 }
 0x2c0   :  { %v2063_v7 = vpop.permute.xlu1 %2062 }
 0x2c1   :  { %v2061_v8 = vpop.permute.xlu0 %2060 }
 0x2c2   :  { %v2125_v9 = vsel %vm2124_vm0, %v2061_v8, %v2063_v7  ;;  %2787 = vrot.lane.b32.xlu1 %v8262_v20, %s7213_s11 }
 0x2c3   :  { %2157 = vst.msk [vmem:[#allocation2 + $0x8] sm:$0xff] %vm528_vm4, %v2125_v9  ;;  %2785 = vrot.lane.b32.xlu0 %v8252_v17, %s7213_s11 }
 0x2c4   :  { %v2067_v10 = vpop.permute.xlu1 %2066 }
 0x2c5   :  { %v2065_v11 = vpop.permute.xlu0 %2064 }
 0x2c6   :  { %v2126_v12 = vsel %vm2124_vm0, %v2065_v11, %v2067_v10  ;;  %2503 = vrot.lane.b32.xlu1 %v8332_v56, %s7221_s12 }
 0x2c7   :  { %2158 = vst.msk [vmem:[#allocation2 + $0x20] sm:$0xff] %vm528_vm4, %v2126_v12  ;;  %2501 = vrot.lane.b32.xlu0 %v8322_v53, %s7221_s12 }
 0x2c8   :  { %v2208_v18 = vpop.permute.xlu1 %2207 }
 0x2c9   :  { %v2206_v19 = vpop.permute.xlu0 %2205  ;;  %2254 = vst.msk [vmem:[#allocation2 + $0x20] sm:$0xff] %vm625_vm5, %v2208_v18 }
 0x2ca   :  { %2253 = vst.msk [vmem:[#allocation2 + $0x8] sm:$0xff] %vm625_vm5, %v2206_v19  ;;  %2219 = vrot.lane.b32.xlu1 %v8408_v2, %s7207_s24 }
 0x2cb   :  { %2217 = vrot.lane.b32.xlu0 %v8398_v63, %s7207_s24 }
 0x2cc   :  { %v2304_v17 = vpop.permute.xlu1 %2303 }
 0x2cd   :  { %v2302_v20 = vpop.permute.xlu0 %2301  ;;  %2350 = vst.msk [vmem:[#allocation2 + $0x20] sm:$0xff] %vm722_vm6, %v2304_v17  ;;  %v1817_v17 = vld [vmem:[%s10263_s1 + $0xd0] sm:$0xff] }
 0x2ce   :  { %2349 = vst.msk [vmem:[#allocation2 + $0x8] sm:$0xff] %vm722_vm6, %v2302_v20  ;;  %2599 = vrot.lane.b32.xlu1 %v8332_v56, %s7211_s4  ;;  %v1816_v20 = vld [vmem:[%s10263_s1 + $0xc0] sm:$0xff] }
 0x2cf   :  { %2597 = vrot.lane.b32.xlu0 %v8322_v53, %s7211_s4 }
 0x2d0   :  { %v1939_v23 = vpop.permute.xlu1 %1938 }
 0x2d1   :  { %v1937_v24 = vpop.permute.xlu0 %1936  ;;  %1983 = vst.msk [vmem:[#allocation2 + $0x50] sm:$0xff] %vm431_vm3, %v1939_v23 }
 0x2d2   :  { %1982 = vst.msk [vmem:[#allocation2 + $0x38] sm:$0xff] %vm431_vm3, %v1937_v24  ;;  %1854 = vrot.lane.b32.xlu1 %v1813_v21, %s7218_s21 }
 0x2d3   :  { %1852 = vrot.lane.b32.xlu0 %v1812_v22, %s7218_s21 }
 0x2d4   :  { %v2071_v25 = vpop.permute.xlu1 %2070 }
 0x2d5   :  { %v2069_v26 = vpop.permute.xlu0 %2068 }
 0x2d6   :  { %v2127_v29 = vsel %vm2124_vm0, %v2069_v26, %v2071_v25  ;;  %2315 = vrot.lane.b32.xlu1 %v8408_v2, %s7220_s6 }
 0x2d7   :  { %2159 = vst.msk [vmem:[#allocation2 + $0x38] sm:$0xff] %vm528_vm4, %v2127_v29  ;;  %2313 = vrot.lane.b32.xlu0 %v8398_v63, %s7220_s6 }
 0x2d8   :  { %v2075_v30 = vpop.permute.xlu1 %2074 }
 0x2d9   :  { %v2073_v13 = vpop.permute.xlu0 %2072 }
 0x2da   :  { %v2128_v14 = vsel %vm2124_vm0, %v2073_v13, %v2075_v30  ;;  %2695 = vrot.lane.b32.xlu1 %v8332_v56, %s7222_s17 }
 0x2db   :  { %2160 = vst.msk [vmem:[#allocation2 + $0x50] sm:$0xff] %vm528_vm4, %v2128_v14  ;;  %2693 = vrot.lane.b32.xlu0 %v8322_v53, %s7222_s17 }
 0x2dc   :  { %v2400_v33 = vpop.permute.xlu1 %2399 }
 0x2dd   :  { %v2398_v34 = vpop.permute.xlu0 %2397  ;;  %2446 = vst.msk [vmem:[#allocation2 + $0x20] sm:$0xff] %vm819_vm7, %v2400_v33  ;;  %v8632_v33 = vld [vmem:[%s10263_s1 + $0xc8] sm:$0xff] }
 0x2de   :  { %2445 = vst.msk [vmem:[#allocation2 + $0x8] sm:$0xff] %vm819_vm7, %v2398_v34  ;;  %1950 = vrot.lane.b32.xlu1 %v1813_v21, %s7205_s22 }
 0x2df   :  { %1948 = vrot.lane.b32.xlu0 %v1812_v22, %s7205_s22 }
 0x2e0   :  { %v2496_v38 = vpop.permute.xlu1 %2495 }
 0x2e1   :  { %v2494_v41 = vpop.permute.xlu0 %2493  ;;  %2542 = vst.msk [vmem:[#allocation2 + $0x20] sm:$0xff] %vm916_vm8, %v2496_v38 }
 0x2e2   :  { %2541 = vst.msk [vmem:[#allocation2 + $0x8] sm:$0xff] %vm916_vm8, %v2494_v41  ;;  %2094 = vrot.lane.b32.xlu1 %v8474_v37, %s7219_s30  ;;  %v8642_v41 = vld [vmem:[%s10263_s1 + $0xd8] sm:$0xff] }
 0x2e3   :  { %2092 = vrot.lane.b32.xlu0 %v1812_v22, %s7219_s30 }
 0x2e4   :  { %v2212_v45 = vpop.permute.xlu1 %2211 }
 0x2e5   :  { %v2210_v46 = vpop.permute.xlu0 %2209  ;;  %2256 = vst.msk [vmem:[#allocation2 + $0x50] sm:$0xff] %vm625_vm5, %v2212_v45  ;;  %v2849_v45 = vld [vmem:[#allocation2 + $0x30] sm:$0xff] }
 0x2e6   :  { %2255 = vst.msk [vmem:[#allocation2 + $0x38] sm:$0xff] %vm625_vm5, %v2210_v46  ;;  %2098 = vrot.lane.b32.xlu1 %v8484_v42, %s7219_s30  ;;  %v2851_v46 = vld [vmem:[#allocation2 + $0x48] sm:$0xff] }
 0x2e7   :  { %2096 = vrot.lane.b32.xlu0 %v1813_v21, %s7219_s30 }
 0x2e8   :  { %v2592_v49 = vpop.permute.xlu1 %2591 }
 0x2e9   :  { %v2590_v50 = vpop.permute.xlu0 %2589  ;;  %2638 = vst.msk [vmem:[#allocation2 + $0x20] sm:$0xff] %vm1013_vm9, %v2592_v49 }
 0x2ea   :  { %2637 = vst.msk [vmem:[#allocation2 + $0x8] sm:$0xff] %vm1013_vm9, %v2590_v50  ;;  %2411 = vrot.lane.b32.xlu1 %v8408_v2, %s7209_s26 }
 0x2eb   :  { %2409 = vrot.lane.b32.xlu0 %v8398_v63, %s7209_s26 }
 0x2ec   :  { %v1847_v54 = vpop.permute.xlu1 %1846 }
 0x2ed   :  { %v1845_v55 = vpop.permute.xlu0 %1844  ;;  %1889 = vst.msk [vmem:[#allocation2 + $0x80] sm:$0xff] %vm334_vm2, %v1847_v54 }
 0x2ee   :  { %1888 = vst.msk [vmem:[#allocation2 + $0x68] sm:$0xff] %vm334_vm2, %v1845_v55  ;;  %2791 = vrot.lane.b32.xlu1 %v8332_v56, %s7213_s11 }
 0x2ef   :  { %2789 = vrot.lane.b32.xlu0 %v8322_v53, %s7213_s11 }
 0x2f0   :  { %v2308_v57 = vpop.permute.xlu1 %2307 }
 0x2f1   :  { %v2306_v58 = vpop.permute.xlu0 %2305  ;;  %2352 = vst.msk [vmem:[#allocation2 + $0x50] sm:$0xff] %vm722_vm6, %v2308_v57 }
 0x2f2   :  { %2351 = vst.msk [vmem:[#allocation2 + $0x38] sm:$0xff] %vm722_vm6, %v2306_v58  ;;  %2507 = vrot.lane.b32.xlu1 %v8408_v2, %s7221_s12  ;;  %v8651_v58 = vpack.c.bf16 %v2851_v46, %v2849_v45 }
 0x2f3   :  { %2505 = vrot.lane.b32.xlu0 %v8398_v63, %s7221_s12 }
 0x2f4   :  { %v2688_v59 = vpop.permute.xlu1 %2687 }
 0x2f5   :  { %v2686_v60 = vpop.permute.xlu0 %2685  ;;  %2734 = vst.msk [vmem:[#allocation2 + $0x20] sm:$0xff] %vm1110_vm10, %v2688_v59 }
 0x2f6   :  { %2733 = vst.msk [vmem:[#allocation2 + $0x8] sm:$0xff] %vm1110_vm10, %v2686_v60  ;;  %2223 = vrot.lane.b32.xlu1 %v8484_v42, %s7207_s24 }
 0x2f7   :  { %2221 = vrot.lane.b32.xlu0 %v8474_v37, %s7207_s24 }
 0x2f8   :  { %v1943_v53 = vpop.permute.xlu1 %1942 }
 0x2f9   :  { %v1941_v56 = vpop.permute.xlu0 %1940  ;;  %1985 = vst.msk [vmem:[#allocation2 + $0x80] sm:$0xff] %vm431_vm3, %v1943_v53 }
 0x2fa   :  { %1984 = vst.msk [vmem:[#allocation2 + $0x68] sm:$0xff] %vm431_vm3, %v1941_v56  ;;  %2603 = vrot.lane.b32.xlu1 %v8408_v2, %s7211_s4 }
 0x2fb   :  { %2601 = vrot.lane.b32.xlu0 %v8398_v63, %s7211_s4 }
 0x2fc   :  { %v2079_v31 = vpop.permute.xlu1 %2078 }
 0x2fd   :  { %v2077_v32 = vpop.permute.xlu0 %2076 }
 0x2fe   :  { %v2129_v15 = vsel %vm2124_vm0, %v2077_v32, %v2079_v31  ;;  %1858 = vrot.lane.b32.xlu1 %v1815_v27, %s7218_s21 }
 0x2ff   :  { %2161 = vst.msk [vmem:[#allocation2 + $0x68] sm:$0xff] %vm528_vm4, %v2129_v15  ;;  %1856 = vrot.lane.b32.xlu0 %v1814_v28, %s7218_s21  ;;  %v1819_v15 = vld [vmem:[%s10263_s1 + $0xf0] sm:$0xff] }
 0x300   :  { %v2083_v16 = vpop.permute.xlu1 %2082 }
 0x301   :  { %v2081_v35 = vpop.permute.xlu0 %2080 }
 0x302   :  { %v2130_v36 = vsel %vm2124_vm0, %v2081_v35, %v2083_v16  ;;  %2319 = vrot.lane.b32.xlu1 %v8484_v42, %s7220_s6  ;;  %v1818_v16 = vld [vmem:[%s10263_s1 + $0xe0] sm:$0xff] }
 0x303   :  { %2162 = vst.msk [vmem:[#allocation2 + $0x80] sm:$0xff] %vm528_vm4, %v2130_v36  ;;  %2317 = vrot.lane.b32.xlu0 %v8474_v37, %s7220_s6 }
 0x304   :  { %v2404_v39 = vpop.permute.xlu1 %2403 }
 0x305   :  { %v2402_v40 = vpop.permute.xlu0 %2401  ;;  %2448 = vst.msk [vmem:[#allocation2 + $0x50] sm:$0xff] %vm819_vm7, %v2404_v39 }
 0x306   :  { %2447 = vst.msk [vmem:[#allocation2 + $0x38] sm:$0xff] %vm819_vm7, %v2402_v40  ;;  %2699 = vrot.lane.b32.xlu1 %v8408_v2, %s7222_s17 }
 0x307   :  { %2697 = vrot.lane.b32.xlu0 %v8398_v63, %s7222_s17 }
 0x308   :  { %v2784_v43 = vpop.permute.xlu1 %2783 }
 0x309   :  { %v2782_v44 = vpop.permute.xlu0 %2781  ;;  %2830 = vst.msk [vmem:[#allocation2 + $0x20] sm:$0xff] %vm1207_vm11, %v2784_v43 }
 0x30a   :  { %2829 = vst.msk [vmem:[#allocation2 + $0x8] sm:$0xff] %vm1207_vm11, %v2782_v44  ;;  %1954 = vrot.lane.b32.xlu1 %v1815_v27, %s7205_s22 }
 0x30b   :  { %1952 = vrot.lane.b32.xlu0 %v1814_v28, %s7205_s22 }
 0x30c   :  { %v2500_v48 = vpop.permute.xlu1 %2499 }
 0x30d   :  { %v2498_v51 = vpop.permute.xlu0 %2497  ;;  %2544 = vst.msk [vmem:[#allocation2 + $0x50] sm:$0xff] %vm916_vm8, %v2500_v48 }
 0x30e   :  { %2543 = vst.msk [vmem:[#allocation2 + $0x38] sm:$0xff] %vm916_vm8, %v2498_v51  ;;  %2102 = vrot.lane.b32.xlu1 %v8550_v47, %s7219_s30 }
 0x30f   :  { %2100 = vrot.lane.b32.xlu0 %v1814_v28, %s7219_s30 }
 0x310   :  { %v2216_v0 = vpop.permute.xlu1 %2215  ;;  %v2848_v4 = vld [vmem:[#allocation2 + $0x20] sm:$0xff] }
 0x311   :  { %v2214_v1 = vpop.permute.xlu0 %2213  ;;  %v2846_v3 = vld [vmem:[#allocation2 + $0x8] sm:$0xff]  ;;  %2258 = vst.msk [vmem:[#allocation2 + $0x80] sm:$0xff] %vm625_vm5, %v2216_v0 }
 0x312   :  { %2257 = vst.msk [vmem:[#allocation2 + $0x68] sm:$0xff] %vm625_vm5, %v2214_v1  ;;  %v8564_v5 = vpack.c.bf16 %v2848_v4, %v2846_v3  ;;  %2106 = vrot.lane.b32.xlu1 %v8560_v52, %s7219_s30  ;;  %v8714_v0 = vld [vmem:[%s10263_s1 + $0xe8] sm:$0xff]  ;;  %v8724_v4 = vld [vmem:[%s10263_s1 + $0xf8] sm:$0xff]  ;;  %s7223_s1 = smov 111  }
 0x313   :  { %2104 = vrot.lane.b32.xlu0 %v1815_v27, %s7219_s30 }
 0x314   :  { %5493 = vmatprep.subr.bf16.mxu1 %v8564_v5  ;;  %v2596_v7 = vpop.permute.xlu1 %2595 }
 0x315   :  { %5494 = vmatpush1.bf16.msra.mxu1 %v8569_v6  ;;  %v2594_v8 = vpop.permute.xlu0 %2593  ;;  %2640 = vst.msk [vmem:[#allocation2 + $0x50] sm:$0xff] %vm1013_vm9, %v2596_v7  ;;  %v2853_v7 = vld [vmem:[#allocation2 + $0x60] sm:$0xff] }
 0x316   :  { %2639 = vst.msk [vmem:[#allocation2 + $0x38] sm:$0xff] %vm1013_vm9, %v2594_v8  ;;  %2415 = vrot.lane.b32.xlu1 %v8484_v42, %s7209_s26  ;;  %v2855_v8 = vld [vmem:[#allocation2 + $0x78] sm:$0xff] }
 0x317   :  { %2413 = vrot.lane.b32.xlu0 %v8474_v37, %s7209_s26 }
 0x318   :  { %v1851_v9 = vpop.permute.xlu1 %1850 }
 0x319   :  { %v1849_v10 = vpop.permute.xlu0 %1848  ;;  %1891 = vst.msk [vmem:[#allocation2 + $0xb0] sm:$0xff] %vm334_vm2, %v1851_v9 }
 0x31a   :  { %1890 = vst.msk [vmem:[#allocation2 + $0x98] sm:$0xff] %vm334_vm2, %v1849_v10  ;;  %2795 = vrot.lane.b32.xlu1 %v8408_v2, %s7213_s11 }
 0x31b   :  { %2793 = vrot.lane.b32.xlu0 %v8398_v63, %s7213_s11 }
 0x31c   :  { %v2312_v11 = vpop.permute.xlu1 %2311 }
 0x31d   :  { %v2310_v12 = vpop.permute.xlu0 %2309  ;;  %2354 = vst.msk [vmem:[#allocation2 + $0x80] sm:$0xff] %vm722_vm6, %v2312_v11 }
 0x31e   :  { %2353 = vst.msk [vmem:[#allocation2 + $0x68] sm:$0xff] %vm722_vm6, %v2310_v12  ;;  %2511 = vrot.lane.b32.xlu1 %v8484_v42, %s7221_s12 }
 0x31f   :  { %2509 = vrot.lane.b32.xlu0 %v8474_v37, %s7221_s12 }
 0x320   :  { %v2692_v18 = vpop.permute.xlu1 %2691 }
 0x321   :  { %v2690_v19 = vpop.permute.xlu0 %2689  ;;  %2736 = vst.msk [vmem:[#allocation2 + $0x50] sm:$0xff] %vm1110_vm10, %v2692_v18 }
 0x322   :  { %2735 = vst.msk [vmem:[#allocation2 + $0x38] sm:$0xff] %vm1110_vm10, %v2690_v19  ;;  %2227 = vrot.lane.b32.xlu1 %v8560_v52, %s7207_s24  ;;  %v8733_v19 = vpack.c.bf16 %v2855_v8, %v2853_v7  ;;  %v2861_v7 = vld [vmem:[#allocation2 + $0xc0] sm:$0xff]  ;;  %v2863_v8 = vld [vmem:[#allocation2 + $0xd8] sm:$0xff] }
 0x323   :  { %2225 = vrot.lane.b32.xlu0 %v8550_v47, %s7207_s24 }
 0x324   :  { %v1947_v63 = vpop.permute.xlu1 %1946 }
 0x325   :  { %v1945_v2 = vpop.permute.xlu0 %1944  ;;  %1987 = vst.msk [vmem:[#allocation2 + $0xb0] sm:$0xff] %vm431_vm3, %v1947_v63 }
 0x326   :  { %1986 = vst.msk [vmem:[#allocation2 + $0x98] sm:$0xff] %vm431_vm3, %v1945_v2  ;;  %2607 = vrot.lane.b32.xlu1 %v8484_v42, %s7211_s4 }
 0x327   :  { %2605 = vrot.lane.b32.xlu0 %v8474_v37, %s7211_s4 }
 0x328   :  { %v2087_v21 = vpop.permute.xlu1 %2086 }
 0x329   :  { %v2085_v22 = vpop.permute.xlu0 %2084 }
 0x32a   :  { %v2131_v23 = vsel %vm2124_vm0, %v2085_v22, %v2087_v21  ;;  %1862 = vrot.lane.b32.xlu1 %v1817_v17, %s7218_s21 }
 0x32b   :  { %2163 = vst.msk [vmem:[#allocation2 + $0x98] sm:$0xff] %vm528_vm4, %v2131_v23  ;;  %1860 = vrot.lane.b32.xlu0 %v1816_v20, %s7218_s21 }
 0x32c   :  { %v2091_v24 = vpop.permute.xlu1 %2090 }
 0x32d   :  { %v2089_v25 = vpop.permute.xlu0 %2088 }
 0x32e   :  { %v2132_v26 = vsel %vm2124_vm0, %v2089_v25, %v2091_v24  ;;  %2323 = vrot.lane.b32.xlu1 %v8560_v52, %s7220_s6 }
 0x32f   :  { %2164 = vst.msk [vmem:[#allocation2 + $0xb0] sm:$0xff] %vm528_vm4, %v2132_v26  ;;  %2321 = vrot.lane.b32.xlu0 %v8550_v47, %s7220_s6 }
 0x330   :  { %v2408_v29 = vpop.permute.xlu1 %2407 }
 0x331   :  { %v2406_v30 = vpop.permute.xlu0 %2405  ;;  %2450 = vst.msk [vmem:[#allocation2 + $0x80] sm:$0xff] %vm819_vm7, %v2408_v29 }
 0x332   :  { %2449 = vst.msk [vmem:[#allocation2 + $0x68] sm:$0xff] %vm819_vm7, %v2406_v30  ;;  %2703 = vrot.lane.b32.xlu1 %v8484_v42, %s7222_s17 }
 0x333   :  { %2701 = vrot.lane.b32.xlu0 %v8474_v37, %s7222_s17 }
 0x334   :  { %v2788_v13 = vpop.permute.xlu1 %2787 }
 0x335   :  { %v2786_v14 = vpop.permute.xlu0 %2785  ;;  %2832 = vst.msk [vmem:[#allocation2 + $0x50] sm:$0xff] %vm1207_vm11, %v2788_v13 }
 0x336   :  { %2831 = vst.msk [vmem:[#allocation2 + $0x38] sm:$0xff] %vm1207_vm11, %v2786_v14  ;;  %1958 = vrot.lane.b32.xlu1 %v1817_v17, %s7205_s22 }
 0x337   :  { %1956 = vrot.lane.b32.xlu0 %v1816_v20, %s7205_s22 }
 0x338   :  { %v2504_v34 = vpop.permute.xlu1 %2503 }
 0x339   :  { %v2502_v38 = vpop.permute.xlu0 %2501  ;;  %2546 = vst.msk [vmem:[#allocation2 + $0x80] sm:$0xff] %vm916_vm8, %v2504_v34 }
 0x33a   :  { %2545 = vst.msk [vmem:[#allocation2 + $0x68] sm:$0xff] %vm916_vm8, %v2502_v38  ;;  %2110 = vrot.lane.b32.xlu1 %v8632_v33, %s7219_s30 }
 0x33b   :  { %2108 = vrot.lane.b32.xlu0 %v1816_v20, %s7219_s30 }
 0x33c   :  { %v2220_v49 = vpop.permute.xlu1 %2219  ;;  %v2852_v55 = vld [vmem:[#allocation2 + $0x50] sm:$0xff] }
 0x33d   :  { %v2218_v50 = vpop.permute.xlu0 %2217  ;;  %v2850_v54 = vld [vmem:[#allocation2 + $0x38] sm:$0xff]  ;;  %2260 = vst.msk [vmem:[#allocation2 + $0xb0] sm:$0xff] %vm625_vm5, %v2220_v49 }
 0x33e   :  { %2259 = vst.msk [vmem:[#allocation2 + $0x98] sm:$0xff] %vm625_vm5, %v2218_v50  ;;  %v8646_v57 = vpack.c.bf16 %v2852_v55, %v2850_v54  ;;  %2114 = vrot.lane.b32.xlu1 %v8642_v41, %s7219_s30  ;;  %v2857_v54 = vld [vmem:[#allocation2 + $0x90] sm:$0xff]  ;;  %v2859_v55 = vld [vmem:[#allocation2 + $0xa8] sm:$0xff] }
 0x33f   :  { %2112 = vrot.lane.b32.xlu0 %v1817_v17, %s7219_s30 }
 0x340   :  { %5495 = vmatprep.subr.bf16.mxu1 %v8646_v57  ;;  %v2600_v59 = vpop.permute.xlu1 %2599 }
 0x341   :  { %5496 = vmatpush1.bf16.msra.mxu1 %v8651_v58  ;;  %v2598_v60 = vpop.permute.xlu0 %2597  ;;  %2642 = vst.msk [vmem:[#allocation2 + $0x80] sm:$0xff] %vm1013_vm9, %v2600_v59 }
 0x342   :  { %2641 = vst.msk [vmem:[#allocation2 + $0x68] sm:$0xff] %vm1013_vm9, %v2598_v60  ;;  %2419 = vrot.lane.b32.xlu1 %v8560_v52, %s7209_s26 }
 0x343   :  { %2417 = vrot.lane.b32.xlu0 %v8550_v47, %s7209_s26 }
 0x344   :  { %v1855_v53 = vpop.permute.xlu1 %1854 }
 0x345   :  { %v1853_v56 = vpop.permute.xlu0 %1852  ;;  %1893 = vst.msk [vmem:[#allocation2 + $0xe0] sm:$0xff] %vm334_vm2, %v1855_v53 }
 0x346   :  { %1892 = vst.msk [vmem:[#allocation2 + $0xc8] sm:$0xff] %vm334_vm2, %v1853_v56  ;;  %2799 = vrot.lane.b32.xlu1 %v8484_v42, %s7213_s11  ;;  %v8805_v56 = vpack.c.bf16 %v2859_v55, %v2857_v54 }
 0x347   :  { %2797 = vrot.lane.b32.xlu0 %v8474_v37, %s7213_s11 }
 0x348   :  { %v2316_v27 = vpop.permute.xlu1 %2315 }
 0x349   :  { %v2314_v28 = vpop.permute.xlu0 %2313  ;;  %2356 = vst.msk [vmem:[#allocation2 + $0xb0] sm:$0xff] %vm722_vm6, %v2316_v27 }
 0x34a   :  { %2355 = vst.msk [vmem:[#allocation2 + $0x98] sm:$0xff] %vm722_vm6, %v2314_v28  ;;  %2515 = vrot.lane.b32.xlu1 %v8560_v52, %s7221_s12 }
 0x34b   :  { %2513 = vrot.lane.b32.xlu0 %v8550_v47, %s7221_s12 }
 0x34c   :  { %v2696_v31 = vpop.permute.xlu1 %2695 }
 0x34d   :  { %v2694_v32 = vpop.permute.xlu0 %2693  ;;  %2738 = vst.msk [vmem:[#allocation2 + $0x80] sm:$0xff] %vm1110_vm10, %v2696_v31 }
 0x34e   :  { %2737 = vst.msk [vmem:[#allocation2 + $0x68] sm:$0xff] %vm1110_vm10, %v2694_v32  ;;  %2231 = vrot.lane.b32.xlu1 %v8642_v41, %s7207_s24 }
 0x34f   :  { %2229 = vrot.lane.b32.xlu0 %v8632_v33, %s7207_s24 }
 0x350   :  { %v1951_v37 = vpop.permute.xlu1 %1950 }
 0x351   :  { %v1949_v42 = vpop.permute.xlu0 %1948  ;;  %1989 = vst.msk [vmem:[#allocation2 + $0xe0] sm:$0xff] %vm431_vm3, %v1951_v37  ;;  %v7198_v37 = vld [vmem:[#allocation2 + $0x10] sm:$0xff] }
 0x352   :  { %1988 = vst.msk [vmem:[#allocation2 + $0xc8] sm:$0xff] %vm431_vm3, %v1949_v42  ;;  %2611 = vrot.lane.b32.xlu1 %v8560_v52, %s7211_s4  ;;  %v8821_v42 = vpack.c.bf16 %v7198_v37, %v7198_v37 }
 0x353   :  { %2609 = vrot.lane.b32.xlu0 %v8550_v47, %s7211_s4 }
 0x354   :  { %v2095_v35 = vpop.permute.xlu1 %2094 }
 0x355   :  { %v2093_v36 = vpop.permute.xlu0 %2092 }
 0x356   :  { %v2133_v39 = vsel %vm2124_vm0, %v2093_v36, %v2095_v35  ;;  %1866 = vrot.lane.b32.xlu1 %v1819_v15, %s7218_s21 }
 0x357   :  { %2165 = vst.msk [vmem:[#allocation2 + $0xc8] sm:$0xff] %vm528_vm4, %v2133_v39  ;;  %1864 = vrot.lane.b32.xlu0 %v1818_v16, %s7218_s21 }
 0x358   :  { %v2099_v40 = vpop.permute.xlu1 %2098 }
 0x359   :  { %v2097_v43 = vpop.permute.xlu0 %2096 }
 0x35a   :  { %v2134_v44 = vsel %vm2124_vm0, %v2097_v43, %v2099_v40  ;;  %2327 = vrot.lane.b32.xlu1 %v8642_v41, %s7220_s6 }
 0x35b   :  { %2166 = vst.msk [vmem:[#allocation2 + $0xe0] sm:$0xff] %vm528_vm4, %v2134_v44  ;;  %2325 = vrot.lane.b32.xlu0 %v8632_v33, %s7220_s6 }
 0x35c   :  { %v2412_v48 = vpop.permute.xlu1 %2411 }
 0x35d   :  { %v2410_v51 = vpop.permute.xlu0 %2409  ;;  %2452 = vst.msk [vmem:[#allocation2 + $0xb0] sm:$0xff] %vm819_vm7, %v2412_v48 }
 0x35e   :  { %2451 = vst.msk [vmem:[#allocation2 + $0x98] sm:$0xff] %vm819_vm7, %v2410_v51  ;;  %2707 = vrot.lane.b32.xlu1 %v8560_v52, %s7222_s17 }
 0x35f   :  { %2705 = vrot.lane.b32.xlu0 %v8550_v47, %s7222_s17 }
 0x360   :  { %v2792_v61 = vpop.permute.xlu1 %2791 }
 0x361   :  { %v2790_v62 = vpop.permute.xlu0 %2789  ;;  %2834 = vst.msk [vmem:[#allocation2 + $0x80] sm:$0xff] %vm1207_vm11, %v2792_v61 }
 0x362   :  { %2833 = vst.msk [vmem:[#allocation2 + $0x68] sm:$0xff] %vm1207_vm11, %v2790_v62  ;;  %1962 = vrot.lane.b32.xlu1 %v1819_v15, %s7205_s22 }
 0x363   :  { %1960 = vrot.lane.b32.xlu0 %v1818_v16, %s7205_s22  ;;  %s7224_s22 = smov 127  }
 0x364   :  { %v2508_v1 = vpop.permute.xlu1 %2507 }
 0x365   :  { %v2506_v3 = vpop.permute.xlu0 %2505  ;;  %2548 = vst.msk [vmem:[#allocation2 + $0xb0] sm:$0xff] %vm916_vm8, %v2508_v1 }
 0x366   :  { %2547 = vst.msk [vmem:[#allocation2 + $0x98] sm:$0xff] %vm916_vm8, %v2506_v3  ;;  %2118 = vrot.lane.b32.xlu1 %v8714_v0, %s7219_s30 }
 0x367   :  { %2116 = vrot.lane.b32.xlu0 %v1818_v16, %s7219_s30 }
 0x368   :  { %v2224_v9 = vpop.permute.xlu1 %2223  ;;  %v2856_v12 = vld [vmem:[#allocation2 + $0x80] sm:$0xff] }
 0x369   :  { %v2222_v10 = vpop.permute.xlu0 %2221  ;;  %v2854_v11 = vld [vmem:[#allocation2 + $0x68] sm:$0xff]  ;;  %2262 = vst.msk [vmem:[#allocation2 + $0xe0] sm:$0xff] %vm625_vm5, %v2224_v9 }
 0x36a   :  { %2261 = vst.msk [vmem:[#allocation2 + $0xc8] sm:$0xff] %vm625_vm5, %v2222_v10  ;;  %v8728_v18 = vpack.c.bf16 %v2856_v12, %v2854_v11  ;;  %2122 = vrot.lane.b32.xlu1 %v8724_v4, %s7219_s30 }
 0x36b   :  { %2120 = vrot.lane.b32.xlu0 %v1819_v15, %s7219_s30  ;;  %s7227_s30 = smov 95  }
 0x36c   :  { %5497 = vmatprep.subr.bf16.mxu1 %v8728_v18  ;;  %v2604_v63 = vpop.permute.xlu1 %2603 }
 0x36d   :  { %5498 = vmatpush1.bf16.msra.mxu1 %v8733_v19  ;;  %v2602_v2 = vpop.permute.xlu0 %2601  ;;  %2644 = vst.msk [vmem:[#allocation2 + $0xb0] sm:$0xff] %vm1013_vm9, %v2604_v63 }
 0x36e   :  { %2643 = vst.msk [vmem:[#allocation2 + $0x98] sm:$0xff] %vm1013_vm9, %v2602_v2  ;;  %2423 = vrot.lane.b32.xlu1 %v8642_v41, %s7209_s26  ;;  %v8869_v2 = vpack.c.bf16 %v2863_v8, %v2861_v7 }
 0x36f   :  { %2421 = vrot.lane.b32.xlu0 %v8632_v33, %s7209_s26 }
 0x370   :  { %v1859_v17 = vpop.permute.xlu1 %1858 }
 0x371   :  { %v1857_v20 = vpop.permute.xlu0 %1856  ;;  %1895 = vst.msk [vmem:[#allocation2 + $0x110] sm:$0xff] %vm334_vm2, %v1859_v17 }
 0x372   :  { %1894 = vst.msk [vmem:[#allocation2 + $0xf8] sm:$0xff] %vm334_vm2, %v1857_v20  ;;  %2803 = vrot.lane.b32.xlu1 %v8560_v52, %s7213_s11 }
 0x373   :  { %2801 = vrot.lane.b32.xlu0 %v8550_v47, %s7213_s11 }
 0x374   :  { %v2320_v21 = vpop.permute.xlu1 %2319 }
 0x375   :  { %v2318_v22 = vpop.permute.xlu0 %2317  ;;  %2358 = vst.msk [vmem:[#allocation2 + $0xe0] sm:$0xff] %vm722_vm6, %v2320_v21 }
 0x376   :  { %2357 = vst.msk [vmem:[#allocation2 + $0xc8] sm:$0xff] %vm722_vm6, %v2318_v22  ;;  %2519 = vrot.lane.b32.xlu1 %v8642_v41, %s7221_s12 }
 0x377   :  { %2517 = vrot.lane.b32.xlu0 %v8632_v33, %s7221_s12 }
 0x378   :  { %v2700_v23 = vpop.permute.xlu1 %2699 }
 0x379   :  { %v2698_v24 = vpop.permute.xlu0 %2697  ;;  %2740 = vst.msk [vmem:[#allocation2 + $0xb0] sm:$0xff] %vm1110_vm10, %v2700_v23 }
 0x37a   :  { %2739 = vst.msk [vmem:[#allocation2 + $0x98] sm:$0xff] %vm1110_vm10, %v2698_v24  ;;  %2235 = vrot.lane.b32.xlu1 %v8724_v4, %s7207_s24 }
 0x37b   :  { %2233 = vrot.lane.b32.xlu0 %v8714_v0, %s7207_s24  ;;  %s7225_s24 = smov 110  }
 0x37c   :  { %v1955_v47 = vpop.permute.xlu1 %1954 }
 0x37d   :  { %v1953_v52 = vpop.permute.xlu0 %1952  ;;  %1991 = vst.msk [vmem:[#allocation2 + $0x110] sm:$0xff] %vm431_vm3, %v1955_v47 }
 0x37e   :  { %1990 = vst.msk [vmem:[#allocation2 + $0xf8] sm:$0xff] %vm431_vm3, %v1953_v52  ;;  %2615 = vrot.lane.b32.xlu1 %v8642_v41, %s7211_s4 }
 0x37f   :  { %2613 = vrot.lane.b32.xlu0 %v8632_v33, %s7211_s4 }
 0x380   :  { %v2103_v25 = vpop.permute.xlu1 %2102 }
 0x381   :  { %v2101_v26 = vpop.permute.xlu0 %2100 }
 0x382   :  { %v2135_v29 = vsel %vm2124_vm0, %v2101_v26, %v2103_v25  ;;  %2331 = vrot.lane.b32.xlu1 %v8724_v4, %s7220_s6 }
 0x383   :  { %2167 = vst.msk [vmem:[#allocation2 + $0xf8] sm:$0xff] %vm528_vm4, %v2135_v29  ;;  %2329 = vrot.lane.b32.xlu0 %v8714_v0, %s7220_s6  ;;  %s7229_s6 = smov 112  }
 0x384   :  { %v2107_v30 = vpop.permute.xlu1 %2106 }
 0x385   :  { %v2105_v13 = vpop.permute.xlu0 %2104 }
 0x386   :  { %v2136_v14 = vsel %vm2124_vm0, %v2105_v13, %v2107_v30  ;;  %2711 = vrot.lane.b32.xlu1 %v8642_v41, %s7222_s17 }
 0x387   :  { %2168 = vst.msk [vmem:[#allocation2 + $0x110] sm:$0xff] %vm528_vm4, %v2136_v14  ;;  %2709 = vrot.lane.b32.xlu0 %v8632_v33, %s7222_s17 }
 0x388   :  { %v2416_v34 = vpop.permute.xlu1 %2415 }
 0x389   :  { %v2414_v38 = vpop.permute.xlu0 %2413  ;;  %2454 = vst.msk [vmem:[#allocation2 + $0xe0] sm:$0xff] %vm819_vm7, %v2416_v34 }
 0x38a   :  { %2453 = vst.msk [vmem:[#allocation2 + $0xc8] sm:$0xff] %vm819_vm7, %v2414_v38  ;;  %2427 = vrot.lane.b32.xlu1 %v8724_v4, %s7209_s26 }
 0x38b   :  { %2425 = vrot.lane.b32.xlu0 %v8714_v0, %s7209_s26 }
 0x38c   :  { %v2796_v45 = vpop.permute.xlu1 %2795 }
 0x38d   :  { %v2794_v46 = vpop.permute.xlu0 %2793  ;;  %2836 = vst.msk [vmem:[#allocation2 + $0xb0] sm:$0xff] %vm1207_vm11, %v2796_v45 }
 0x38e   :  { %2835 = vst.msk [vmem:[#allocation2 + $0x98] sm:$0xff] %vm1207_vm11, %v2794_v46  ;;  %2807 = vrot.lane.b32.xlu1 %v8642_v41, %s7213_s11 }
 0x38f   :  { %2805 = vrot.lane.b32.xlu0 %v8632_v33, %s7213_s11 }
 0x390   :  { %v2512_v49 = vpop.permute.xlu1 %2511 }
 0x391   :  { %v2510_v50 = vpop.permute.xlu0 %2509  ;;  %2550 = vst.msk [vmem:[#allocation2 + $0xe0] sm:$0xff] %vm916_vm8, %v2512_v49 }
 0x392   :  { %2549 = vst.msk [vmem:[#allocation2 + $0xc8] sm:$0xff] %vm916_vm8, %v2510_v50  ;;  %2523 = vrot.lane.b32.xlu1 %v8724_v4, %s7221_s12 }
 0x393   :  { %2521 = vrot.lane.b32.xlu0 %v8714_v0, %s7221_s12 }
 0x394   :  { %v2228_v59 = vpop.permute.xlu1 %2227  ;;  %v2860_v53 = vld [vmem:[#allocation2 + $0xb0] sm:$0xff] }
 0x395   :  { %v2226_v60 = vpop.permute.xlu0 %2225  ;;  %v2858_v41 = vld [vmem:[#allocation2 + $0x98] sm:$0xff]  ;;  %2264 = vst.msk [vmem:[#allocation2 + $0x110] sm:$0xff] %vm625_vm5, %v2228_v59  ;;  %v2865_v59 = vld [vmem:[#allocation2 + $0xf0] sm:$0xff] }
 0x396   :  { %2263 = vst.msk [vmem:[#allocation2 + $0xf8] sm:$0xff] %vm625_vm5, %v2226_v60  ;;  %v8799_v33 = vpack.c.bf16 %v2860_v53, %v2858_v41  ;;  %2619 = vrot.lane.b32.xlu1 %v8724_v4, %s7211_s4  ;;  %v2867_v60 = vld [vmem:[#allocation2 + $0x108] sm:$0xff] }
 0x397   :  { %2617 = vrot.lane.b32.xlu0 %v8714_v0, %s7211_s4 }
 0x398   :  { %5499 = vmatprep.subr.bf16.mxu1 %v8799_v33  ;;  %v2608_v27 = vpop.permute.xlu1 %2607 }
 0x399   :  { %5500 = vmatpush1.bf16.msra.mxu1 %v8805_v56  ;;  %v2606_v28 = vpop.permute.xlu0 %2605  ;;  %2646 = vst.msk [vmem:[#allocation2 + $0xe0] sm:$0xff] %vm1013_vm9, %v2608_v27 }
 0x39a   :  { %2645 = vst.msk [vmem:[#allocation2 + $0xc8] sm:$0xff] %vm1013_vm9, %v2606_v28  ;;  %2715 = vrot.lane.b32.xlu1 %v8724_v4, %s7222_s17 }
 0x39b   :  { %2713 = vrot.lane.b32.xlu0 %v8714_v0, %s7222_s17  ;;  %s7228_s17 = smov 126  }
 0x39c   :  { %v1863_v31 = vpop.permute.xlu1 %1862 }
 0x39d   :  { %v1861_v32 = vpop.permute.xlu0 %1860  ;;  %1897 = vst.msk [vmem:[#allocation2 + $0x140] sm:$0xff] %vm334_vm2, %v1863_v31 }
 0x39e   :  { %1896 = vst.msk [vmem:[#allocation2 + $0x128] sm:$0xff] %vm334_vm2, %v1861_v32  ;;  %2811 = vrot.lane.b32.xlu1 %v8724_v4, %s7213_s11  ;;  %v8903_v32 = vpack.c.bf16 %v2867_v60, %v2865_v59 }
 0x39f   :  { %2809 = vrot.lane.b32.xlu0 %v8714_v0, %s7213_s11  ;;  %s7226_s11 = smov 96  }
 0x3a0   :  { %v2324_v15 = vpop.permute.xlu1 %2323 }
 0x3a1   :  { %v2322_v16 = vpop.permute.xlu0 %2321  ;;  %2360 = vst.msk [vmem:[#allocation2 + $0x110] sm:$0xff] %vm722_vm6, %v2324_v15 }
 0x3a2   :  { %2359 = vst.msk [vmem:[#allocation2 + $0xf8] sm:$0xff] %vm722_vm6, %v2322_v16  ;;  %3588 = vrot.lane.b32.xlu1 %v8821_v42, %s7223_s1 }
 0x3a3   :  { %3586 = vrot.lane.b32.xlu0 %v8564_v5, %s7223_s1 }
 0x3a4   :  { %v2704_v35 = vpop.permute.xlu1 %2703 }
 0x3a5   :  { %v2702_v36 = vpop.permute.xlu0 %2701  ;;  %2742 = vst.msk [vmem:[#allocation2 + $0xe0] sm:$0xff] %vm1110_vm10, %v2704_v35 }
 0x3a6   :  { %2741 = vst.msk [vmem:[#allocation2 + $0xc8] sm:$0xff] %vm1110_vm10, %v2702_v36  ;;  %3592 = vrot.lane.b32.xlu1 %v8646_v57, %s7223_s1 }
 0x3a7   :  { %3584 = vrot.lane.b32.xlu0 %v8569_v6, %s7223_s1 }
 0x3a8   :  { %v1959_v39 = vpop.permute.xlu1 %1958 }
 0x3a9   :  { %v1957_v40 = vpop.permute.xlu0 %1956  ;;  %1993 = vst.msk [vmem:[#allocation2 + $0x140] sm:$0xff] %vm431_vm3, %v1959_v39 }
 0x3aa   :  { %1992 = vst.msk [vmem:[#allocation2 + $0x128] sm:$0xff] %vm431_vm3, %v1957_v40  ;;  %3590 = vrot.lane.b32.xlu1 %v8651_v58, %s7223_s1 }
 0x3ab   :  { %3594 = vrot.lane.b32.xlu0 %v8821_v42, %s7223_s1 }
 0x3ac   :  { %v2111_v5 = vpop.permute.xlu1 %2110 }
 0x3ad   :  { %v2109_v43 = vpop.permute.xlu0 %2108 }
 0x3ae   :  { %v2137_v44 = vsel %vm2124_vm0, %v2109_v43, %v2111_v5  ;;  %3600 = vrot.lane.b32.xlu1 %v8821_v42, %s7223_s1 }
 0x3af   :  { %2169 = vst.msk [vmem:[#allocation2 + $0x128] sm:$0xff] %vm528_vm4, %v2137_v44  ;;  %3598 = vrot.lane.b32.xlu0 %v8728_v18, %s7223_s1 }
 0x3b0   :  { %v2115_v6 = vpop.permute.xlu1 %2114 }
 0x3b1   :  { %v2113_v48 = vpop.permute.xlu0 %2112 }
 0x3b2   :  { %v2138_v51 = vsel %vm2124_vm0, %v2113_v48, %v2115_v6  ;;  %3604 = vrot.lane.b32.xlu1 %v8799_v33, %s7223_s1 }
 0x3b3   :  { %2170 = vst.msk [vmem:[#allocation2 + $0x140] sm:$0xff] %vm528_vm4, %v2138_v51  ;;  %3596 = vrot.lane.b32.xlu0 %v8733_v19, %s7223_s1  ;;  %v2869_v51 = vld [vmem:[#allocation2 + $0x120] sm:$0xff] }
 0x3b4   :  { %v2420_v61 = vpop.permute.xlu1 %2419 }
 0x3b5   :  { %v2418_v62 = vpop.permute.xlu0 %2417  ;;  %2456 = vst.msk [vmem:[#allocation2 + $0x110] sm:$0xff] %vm819_vm7, %v2420_v61  ;;  %v2871_v61 = vld [vmem:[#allocation2 + $0x138] sm:$0xff] }
 0x3b6   :  { %2455 = vst.msk [vmem:[#allocation2 + $0xf8] sm:$0xff] %vm819_vm7, %v2418_v62  ;;  %3602 = vrot.lane.b32.xlu1 %v8805_v56, %s7223_s1  ;;  %v8929_v7 = vpack.c.bf16 %v2871_v61, %v2869_v51  ;;  %v3887_v51 = vld [vmem:[#allocation2 + $0x68] sm:$0xff]  ;;  %v3890_v61 = vld [vmem:[#allocation2 + $0x80] sm:$0xff] }
 0x3b7   :  { %3606 = vrot.lane.b32.xlu0 %v8821_v42, %s7223_s1 }
 0x3b8   :  { %v2800_v0 = vpop.permute.xlu1 %2799 }
 0x3b9   :  { %v2798_v1 = vpop.permute.xlu0 %2797  ;;  %2838 = vst.msk [vmem:[#allocation2 + $0xe0] sm:$0xff] %vm1207_vm11, %v2800_v0 }
 0x3ba   :  { %2837 = vst.msk [vmem:[#allocation2 + $0xc8] sm:$0xff] %vm1207_vm11, %v2798_v1  ;;  %3612 = vrot.lane.b32.xlu1 %v8821_v42, %s7223_s1 }
 0x3bc   :  { %v2516_v3 = vpop.permute.xlu1 %2515 }
 0x3bd   :  { %v2514_v4 = vpop.permute.xlu0 %2513  ;;  %2552 = vst.msk [vmem:[#allocation2 + $0x110] sm:$0xff] %vm916_vm8, %v2516_v3 }
 0x3be   :  { %2551 = vst.msk [vmem:[#allocation2 + $0xf8] sm:$0xff] %vm916_vm8, %v2514_v4 }
 0x3c0   :  { %v2232_v9 = vpop.permute.xlu1 %2231  ;;  %v3516_v12 = vld [vmem:[#allocation2 + $0xe0] sm:$0xff] }
 0x3c1   :  { %v2230_v10 = vpop.permute.xlu0 %2229  ;;  %v3513_v11 = vld [vmem:[#allocation2 + $0xc8] sm:$0xff]  ;;  %2266 = vst.msk [vmem:[#allocation2 + $0x140] sm:$0xff] %vm625_vm5, %v2232_v9 }
 0x3c2   :  { %2265 = vst.msk [vmem:[#allocation2 + $0x128] sm:$0xff] %vm625_vm5, %v2230_v10  ;;  %v8867_v63 = vpack.c.bf16 %v3516_v12, %v3513_v11  ;;  %v2910_v12 = vld [vmem:[#allocation2 + $0x8] sm:$0xff] }
 0x3c4   :  { %3610 = vrot.lane.b32.xlu0 %v8867_v63, %s7223_s1  ;;  %5501 = vmatprep.subr.bf16.mxu1 %v8867_v63  ;;  %v2612_v17 = vpop.permute.xlu1 %2611 }
 0x3c5   :  { %5502 = vmatpush1.bf16.msra.mxu1 %v8869_v2  ;;  %v2610_v20 = vpop.permute.xlu0 %2609  ;;  %2648 = vst.msk [vmem:[#allocation2 + $0x110] sm:$0xff] %vm1013_vm9, %v2612_v17  ;;  %v2913_v17 = vld [vmem:[#allocation2 + $0x20] sm:$0xff] }
 0x3c6   :  { %2647 = vst.msk [vmem:[#allocation2 + $0xf8] sm:$0xff] %vm1013_vm9, %v2610_v20 }
 0x3c8   :  { %3608 = vrot.lane.b32.xlu0 %v8869_v2, %s7223_s1  ;;  %v1867_v21 = vpop.permute.xlu1 %1866 }
 0x3c9   :  { %v1865_v22 = vpop.permute.xlu0 %1864  ;;  %1899 = vst.msk [vmem:[#allocation2 + $0x170] sm:$0xff] %vm334_vm2, %v1867_v21 }
 0x3ca   :  { %1898 = vst.msk [vmem:[#allocation2 + $0x158] sm:$0xff] %vm334_vm2, %v1865_v22  ;;  %vm3053_vm2 = vcmask 1039360  }
 0x3cc   :  { %3618 = vrot.lane.b32.xlu0 %v8821_v42, %s7223_s1  ;;  %v2328_v23 = vpop.permute.xlu1 %2327 }
 0x3cd   :  { %v2326_v24 = vpop.permute.xlu0 %2325  ;;  %2362 = vst.msk [vmem:[#allocation2 + $0x140] sm:$0xff] %vm722_vm6, %v2328_v23  ;;  %v8946_v23 = vpack.c.bf16 %v2913_v17, %v2910_v12 }
 0x3ce   :  { %2361 = vst.msk [vmem:[#allocation2 + $0x128] sm:$0xff] %vm722_vm6, %v2326_v24  ;;  %v2873_v24 = vld [vmem:[#allocation2 + $0x150] sm:$0xff] }
 0x3d0   :  { %v2708_v47 = vpop.permute.xlu1 %2707 }
 0x3d1   :  { %v2706_v52 = vpop.permute.xlu0 %2705  ;;  %2744 = vst.msk [vmem:[#allocation2 + $0x110] sm:$0xff] %vm1110_vm10, %v2708_v47 }
 0x3d2   :  { %2743 = vst.msk [vmem:[#allocation2 + $0xf8] sm:$0xff] %vm1110_vm10, %v2706_v52 }
 0x3d4   :  { %v1963_v25 = vpop.permute.xlu1 %1962 }
 0x3d5   :  { %v1961_v26 = vpop.permute.xlu0 %1960  ;;  %1995 = vst.msk [vmem:[#allocation2 + $0x170] sm:$0xff] %vm431_vm3, %v1963_v25 }
 0x3d6   :  { %1994 = vst.msk [vmem:[#allocation2 + $0x158] sm:$0xff] %vm431_vm3, %v1961_v26  ;;  %vm3825_vm3 = vcmask 900096  }
 0x3d8   :  { %v2119_v29 = vpop.permute.xlu1 %2118 }
 0x3d9   :  { %v2117_v30 = vpop.permute.xlu0 %2116 }
 0x3da   :  { %v2139_v13 = vsel %vm2124_vm0, %v2117_v30, %v2119_v29  ;;  %v2875_v29 = vld [vmem:[#allocation2 + $0x168] sm:$0xff] }
 0x3db   :  { %2171 = vst.msk [vmem:[#allocation2 + $0x158] sm:$0xff] %vm528_vm4, %v2139_v13 }
 0x3dc   :  { %v2123_v14 = vpop.permute.xlu1 %2122 }
 0x3dd   :  { %v2121_v34 = vpop.permute.xlu0 %2120 }
 0x3de   :  { %v2140_v38 = vsel %vm2124_vm0, %v2121_v34, %v2123_v14  ;;  %v2909_v14 = vld [vmem:[#allocation2] sm:$0xff]  ;;  %v2912_v34 = vld [vmem:[#allocation2 + $0x18] sm:$0xff] }
 0x3df   :  { %2172 = vst.msk [vmem:[#allocation2 + $0x170] sm:$0xff] %vm528_vm4, %v2140_v38  ;;  %v8961_v38 = vpack.c.bf16 %v2875_v29, %v2873_v24  ;;  %vm4018_vm4 = vcmask 785408  }
 0x3e0   :  { %v2424_v45 = vpop.permute.xlu1 %2423 }
 0x3e1   :  { %v2422_v46 = vpop.permute.xlu0 %2421  ;;  %2458 = vst.msk [vmem:[#allocation2 + $0x140] sm:$0xff] %vm819_vm7, %v2424_v45 }
 0x3e2   :  { %2457 = vst.msk [vmem:[#allocation2 + $0x128] sm:$0xff] %vm819_vm7, %v2422_v46 }
 0x3e4   :  { %v2804_v49 = vpop.permute.xlu1 %2803 }
 0x3e5   :  { %v2802_v50 = vpop.permute.xlu0 %2801  ;;  %2840 = vst.msk [vmem:[#allocation2 + $0x110] sm:$0xff] %vm1207_vm11, %v2804_v49 }
 0x3e6   :  { %2839 = vst.msk [vmem:[#allocation2 + $0xf8] sm:$0xff] %vm1207_vm11, %v2802_v50  ;;  %v8968_v50 = vpack.c.bf16 %v2912_v34, %v2909_v14  ;;  %v3892_v14 = vld [vmem:[#allocation2 + $0x90] sm:$0xff]  ;;  %v3895_v34 = vld [vmem:[#allocation2 + $0xa8] sm:$0xff] }
 0x3e8   :  { %v2520_v54 = vpop.permute.xlu1 %2519 }
 0x3e9   :  { %v2518_v55 = vpop.permute.xlu0 %2517  ;;  %2554 = vst.msk [vmem:[#allocation2 + $0x140] sm:$0xff] %vm916_vm8, %v2520_v54 }
 0x3ea   :  { %2553 = vst.msk [vmem:[#allocation2 + $0x128] sm:$0xff] %vm916_vm8, %v2518_v55 }
 0x3ec   :  { %v2236_v41 = vpop.permute.xlu1 %2235  ;;  %v3522_v28 = vld [vmem:[#allocation2 + $0x110] sm:$0xff] }
 0x3ed   :  { %v2234_v53 = vpop.permute.xlu0 %2233  ;;  %v3519_v27 = vld [vmem:[#allocation2 + $0xf8] sm:$0xff]  ;;  %2268 = vst.msk [vmem:[#allocation2 + $0x170] sm:$0xff] %vm625_vm5, %v2236_v41 }
 0x3ee   :  { %2267 = vst.msk [vmem:[#allocation2 + $0x158] sm:$0xff] %vm625_vm5, %v2234_v53  ;;  %v8901_v31 = vpack.c.bf16 %v3522_v28, %v3519_v27  ;;  %vm4211_vm5 = vcmask 777216  }
 0x3f0   :  { %3616 = vrot.lane.b32.xlu1 %v8901_v31, %s7223_s1  ;;  %5503 = vmatprep.subr.bf16.mxu1 %v8901_v31  ;;  %v2616_v37 = vpop.permute.xlu1 %2615 }
 0x3f1   :  { %5504 = vmatpush1.bf16.msra.mxu1 %v8903_v32  ;;  %v2614_v15 = vpop.permute.xlu0 %2613  ;;  %2650 = vst.msk [vmem:[#allocation2 + $0x140] sm:$0xff] %vm1013_vm9, %v2616_v37 }
 0x3f2   :  { %2649 = vst.msk [vmem:[#allocation2 + $0x128] sm:$0xff] %vm1013_vm9, %v2614_v15 }
 0x3f4   :  { %3614 = vrot.lane.b32.xlu1 %v8903_v32, %s7223_s1  ;;  %v2332_v16 = vpop.permute.xlu1 %2331 }
 0x3f5   :  { %v2330_v35 = vpop.permute.xlu0 %2329  ;;  %2364 = vst.msk [vmem:[#allocation2 + $0x170] sm:$0xff] %vm722_vm6, %v2332_v16 }
 0x3f6   :  { %2363 = vst.msk [vmem:[#allocation2 + $0x158] sm:$0xff] %vm722_vm6, %v2330_v35  ;;  %v3690_v35 = vld [vmem:[#allocation2 + $0x48] sm:$0xff]  ;;  %vm3246_vm6 = vcmask 1031168  }
 0x3f8   :  { %3624 = vrot.lane.b32.xlu1 %v8821_v42, %s7223_s1  ;;  %v2712_v36 = vpop.permute.xlu1 %2711 }
 0x3f9   :  { %v2710_v39 = vpop.permute.xlu0 %2709  ;;  %2746 = vst.msk [vmem:[#allocation2 + $0x140] sm:$0xff] %vm1110_vm10, %v2712_v36 }
 0x3fa   :  { %2745 = vst.msk [vmem:[#allocation2 + $0x128] sm:$0xff] %vm1110_vm10, %v2710_v39 }
 0x3fc   :  { %v2428_v40 = vpop.permute.xlu1 %2427 }
 0x3fd   :  { %v2426_v5 = vpop.permute.xlu0 %2425  ;;  %2460 = vst.msk [vmem:[#allocation2 + $0x170] sm:$0xff] %vm819_vm7, %v2428_v40 }
 0x3fe   :  { %2459 = vst.msk [vmem:[#allocation2 + $0x158] sm:$0xff] %vm819_vm7, %v2426_v5  ;;  %vm3439_vm7 = vcmask 916480  }
 0x400   :  { %v2808_v43 = vpop.permute.xlu1 %2807 }
 0x401   :  { %v2806_v44 = vpop.permute.xlu0 %2805  ;;  %2842 = vst.msk [vmem:[#allocation2 + $0x140] sm:$0xff] %vm1207_vm11, %v2808_v43 }
 0x402   :  { %2841 = vst.msk [vmem:[#allocation2 + $0x128] sm:$0xff] %vm1207_vm11, %v2806_v44 }
 0x404   :  { %v2524_v6 = vpop.permute.xlu1 %2523 }
 0x405   :  { %v2522_v48 = vpop.permute.xlu0 %2521  ;;  %2556 = vst.msk [vmem:[#allocation2 + $0x170] sm:$0xff] %vm916_vm8, %v2524_v6  ;;  %v6992_v6 = vld [vmem:[%s10264_s0 + $0x14] ss:$36 sps:$4 sm:$0xff]  }
 0x406   :  { %2555 = vst.msk [vmem:[#allocation2 + $0x158] sm:$0xff] %vm916_vm8, %v2522_v48  ;;  %5911 = vmatprep.mubr.bf16.mxu0 %v6992_v6  ;;  %vm4404_vm8 = vcmask 769024  }
 0x408   :  { %v2620_v62 = vpop.permute.xlu1 %2619  ;;  %v3528_v3 = vld [vmem:[#allocation2 + $0x140] sm:$0xff] }
 0x409   :  { %v2618_v0 = vpop.permute.xlu0 %2617  ;;  %v3525_v1 = vld [vmem:[#allocation2 + $0x128] sm:$0xff]  ;;  %2652 = vst.msk [vmem:[#allocation2 + $0x170] sm:$0xff] %vm1013_vm9, %v2620_v62 }
 0x40a   :  { %2651 = vst.msk [vmem:[#allocation2 + $0x158] sm:$0xff] %vm1013_vm9, %v2618_v0  ;;  %v8927_v4 = vpack.c.bf16 %v3528_v3, %v3525_v1  ;;  %v3881_v1 = vld [vmem:[#allocation2 + $0x38] sm:$0xff]  ;;  %v3884_v3 = vld [vmem:[#allocation2 + $0x50] sm:$0xff] }
 0x40c   :  { %3622 = vrot.lane.b32.xlu0 %v8927_v4, %s7223_s1  ;;  %5505 = vmatprep.subr.bf16.mxu1 %v8927_v4  ;;  %v2716_v8 = vpop.permute.xlu1 %2715 }
 0x40d   :  { %5506 = vmatpush1.bf16.msra.mxu1 %v8929_v7  ;;  %v2714_v9 = vpop.permute.xlu0 %2713  ;;  %2748 = vst.msk [vmem:[#allocation2 + $0x170] sm:$0xff] %vm1110_vm10, %v2716_v8  ;;  %v3886_v8 = vld [vmem:[#allocation2 + $0x60] sm:$0xff] }
 0x40e   :  { %2747 = vst.msk [vmem:[#allocation2 + $0x158] sm:$0xff] %vm1110_vm10, %v2714_v9  ;;  %v3889_v9 = vld [vmem:[#allocation2 + $0x78] sm:$0xff] }
 0x410   :  { %3620 = vrot.lane.b32.xlu0 %v8929_v7, %s7223_s1  ;;  %v2812_v10 = vpop.permute.xlu1 %2811 }
 0x411   :  { %v2810_v11 = vpop.permute.xlu0 %2809  ;;  %2844 = vst.msk [vmem:[#allocation2 + $0x170] sm:$0xff] %vm1207_vm11, %v2812_v10 }
 0x412   :  { %2843 = vst.msk [vmem:[#allocation2 + $0x158] sm:$0xff] %vm1207_vm11, %v2810_v11  ;;  %v9116_v11 = vpack.c.bf16 %v3890_v61, %v3887_v51 }
 0x414   :  { %3630 = vrot.lane.b32.xlu0 %v8821_v42, %s7223_s1  ;;  %v3589_v20 = vpop.permute.xlu1 %3588 }
 0x415   :  { %v3587_v21 = vpop.permute.xlu0 %3586 }
 0x416   :  { %v8944_v22 = vsel %vm3632_vm1, %v3587_v21, %v3589_v20  ;;  %v9126_v20 = vpack.c.bf16 %v3884_v3, %v3881_v1 }
 0x417   :  { %5879 = vmatprep.subr.bf16.mxu0 %v8944_v22 }
 0x418   :  { %3007 = vrot.lane.b32.xlu0 %v8946_v23, %s7224_s22  ;;  %v3593_v47 = vpop.permute.xlu1 %3592  ;;  %v3534_v26 = vld [vmem:[#allocation2 + $0x170] sm:$0xff] }
 0x419   :  { %v3585_v52 = vpop.permute.xlu0 %3584  ;;  %v3531_v25 = vld [vmem:[#allocation2 + $0x158] sm:$0xff] }
 0x41a   :  { %v8952_v30 = vsel %vm3632_vm1, %v3585_v52, %v3587_v21  ;;  %v8954_v13 = vpack.c.bf16 %v3534_v26, %v3531_v25  ;;  %v9128_v21 = vpack.c.bf16 %v3889_v9, %v3886_v8  ;;  %v3896_v52 = vld [vmem:[#allocation2 + $0xb0] sm:$0xff] }
 0x41b   :  { %5880 = vmatpush1.bf16.msra.mxu0 %v8952_v30 }
 0x41c   :  { %3779 = vrot.lane.b32.xlu0 %v8946_v23, %s7225_s24  ;;  %3628 = vrot.lane.b32.xlu1 %v8954_v13, %s7223_s1  ;;  %v3591_v45 = vpop.permute.xlu1 %3590 }
 0x41d   :  { %5507 = vmatprep.subr.bf16.mxu1 %v8954_v13  ;;  %v3595_v46 = vpop.permute.xlu0 %3594  ;;  %v8971_v54 = vsel %vm3632_vm1, %v3591_v45, %v3593_v47 }
 0x41e   :  { %5508 = vmatpush1.bf16.msra.mxu1 %v8961_v38  ;;  %v8966_v49 = vsel %vm3632_vm1, %v3593_v47, %v3595_v46  ;;  %v3893_v47 = vld [vmem:[#allocation2 + $0x98] sm:$0xff] }
 0x41f   :  { %5881 = vmatprep.subr.bf16.mxu0 %v8966_v49 }
 0x420   :  { %3005 = vrot.lane.b32.xlu0 %v8968_v50, %s7224_s22  ;;  %3626 = vrot.lane.b32.xlu1 %v8961_v38, %s7223_s1  ;;  %v3601_v55 = vpop.permute.xlu1 %3600 }
 0x421   :  { %5882 = vmatpush1.bf16.msra.mxu0 %v8971_v54  ;;  %v3599_v59 = vpop.permute.xlu0 %3598 }
 0x422   :  { %v8980_v60 = vsel %vm3632_vm1, %v3599_v59, %v3601_v55  ;;  %v9146_v55 = vpack.c.bf16 %v3896_v52, %v3893_v47  ;;  %v4092_v52 = vld [vmem:[#allocation2 + $0xc8] sm:$0xff] }
 0x423   :  { %5883 = vmatprep.subr.bf16.mxu0 %v8980_v60 }
 0x424   :  { %3013 = vrot.lane.b32.xlu0 %v8646_v57, %s7224_s22  ;;  %3009 = vrot.lane.b32.xlu1 %v8821_v42, %s7224_s22  ;;  %v3605_v41 = vpop.permute.xlu1 %3604 }
 0x425   :  { %v3597_v53 = vpop.permute.xlu0 %3596 }
 0x426   :  { %v8988_v27 = vsel %vm3632_vm1, %v3597_v53, %v3599_v59  ;;  %v9156_v53 = vpack.c.bf16 %v3895_v34, %v3892_v14 }
 0x427   :  { %5884 = vmatpush1.bf16.msra.mxu0 %v8988_v27 }
 0x428   :  { %3785 = vrot.lane.b32.xlu0 %v8646_v57, %s7225_s24  ;;  %3781 = vrot.lane.b32.xlu1 %v8821_v42, %s7225_s24  ;;  %v3603_v28 = vpop.permute.xlu1 %3602  ;;  %v3687_v57 = vld [vmem:[#allocation2 + $0x30] sm:$0xff] }
 0x429   :  { %v3607_v37 = vpop.permute.xlu0 %3606  ;;  %v8999_v16 = vsel %vm3632_vm1, %v3603_v28, %v3605_v41  ;;  %v9015_v39 = vpack.c.bf16 %v3690_v35, %v3687_v57 }
 0x42a   :  { %v8996_v15 = vsel %vm3632_vm1, %v3605_v41, %v3607_v37 }
 0x42b   :  { %5885 = vmatprep.subr.bf16.mxu0 %v8996_v15 }
 0x42c   :  { %3011 = vrot.lane.b32.xlu0 %v8651_v58, %s7224_s22  ;;  %3777 = vrot.lane.b32.xlu1 %v8968_v50, %s7225_s24  ;;  %v3613_v58 = vpop.permute.xlu1 %3612 }
 0x42d   :  { %5886 = vmatpush1.bf16.msra.mxu0 %v8999_v16 }
 0x430   :  { %3019 = vrot.lane.b32.xlu0 %v8728_v18, %s7224_s22  ;;  %3015 = vrot.lane.b32.xlu1 %v8821_v42, %s7224_s22 }
 0x434   :  { %3791 = vrot.lane.b32.xlu0 %v8728_v18, %s7225_s24  ;;  %3787 = vrot.lane.b32.xlu1 %v8821_v42, %s7225_s24 }
 0x436   :  { %v3611_v36 = vpop.permute.xlu0 %3610 }
 0x437   :  { %v9018_v40 = vsel %vm3632_vm1, %v3611_v36, %v3613_v58 }
 0x438   :  { %3017 = vrot.lane.b32.xlu0 %v8733_v19, %s7224_s22  ;;  %3783 = vrot.lane.b32.xlu1 %v9015_v39, %s7225_s24 }
 0x439   :  { %5887 = vmatprep.subr.bf16.mxu0 %v9018_v40 }
 0x43a   :  { %v3609_v5 = vpop.permute.xlu0 %3608 }
 0x43b   :  { %v9026_v18 = vsel %vm3632_vm1, %v3609_v5, %v3611_v36 }
 0x43c   :  { %3025 = vrot.lane.b32.xlu0 %v8799_v33, %s7224_s22  ;;  %3021 = vrot.lane.b32.xlu1 %v8821_v42, %s7224_s22 }
 0x43d   :  { %5888 = vmatpush1.bf16.msra.mxu0 %v9026_v18 }
 0x440   :  { %3797 = vrot.lane.b32.xlu0 %v8799_v33, %s7225_s24  ;;  %3793 = vrot.lane.b32.xlu1 %v8821_v42, %s7225_s24 }
 0x444   :  { %3023 = vrot.lane.b32.xlu0 %v8805_v56, %s7224_s22  ;;  %3789 = vrot.lane.b32.xlu1 %v8733_v19, %s7225_s24  ;;  %v3619_v19 = vpop.permute.xlu0 %3618 }
 0x448   :  { %3031 = vrot.lane.b32.xlu0 %v8867_v63, %s7224_s22  ;;  %3027 = vrot.lane.b32.xlu1 %v8821_v42, %s7224_s22 }
 0x44c   :  { %3803 = vrot.lane.b32.xlu0 %v8867_v63, %s7225_s24  ;;  %3799 = vrot.lane.b32.xlu1 %v8821_v42, %s7225_s24 }
 0x450   :  { %3029 = vrot.lane.b32.xlu0 %v8869_v2, %s7224_s22  ;;  %3795 = vrot.lane.b32.xlu1 %v8805_v56, %s7225_s24 }
 0x454   :  { %3037 = vrot.lane.b32.xlu0 %v8901_v31, %s7224_s22  ;;  %3033 = vrot.lane.b32.xlu1 %v8821_v42, %s7224_s22 }
 0x458   :  { %3809 = vrot.lane.b32.xlu0 %v8901_v31, %s7225_s24  ;;  %3805 = vrot.lane.b32.xlu1 %v8821_v42, %s7225_s24 }
 0x45c   :  { %3035 = vrot.lane.b32.xlu0 %v8903_v32, %s7224_s22  ;;  %3801 = vrot.lane.b32.xlu1 %v8869_v2, %s7225_s24 }
 0x460   :  { %3043 = vrot.lane.b32.xlu0 %v8927_v4, %s7224_s22  ;;  %3039 = vrot.lane.b32.xlu1 %v8821_v42, %s7224_s22 }
 0x462   :  { %v3617_v33 = vpop.permute.xlu1 %3616 }
 0x463   :  { %v9070_v56 = vsel %vm3632_vm1, %v3617_v33, %v3619_v19 }
 0x464   :  { %3815 = vrot.lane.b32.xlu0 %v8927_v4, %s7225_s24  ;;  %3811 = vrot.lane.b32.xlu1 %v8821_v42, %s7225_s24 }
 0x465   :  { %5889 = vmatprep.subr.bf16.mxu0 %v9070_v56 }
 0x466   :  { %v3615_v43 = vpop.permute.xlu1 %3614 }
 0x467   :  { %v9078_v44 = vsel %vm3632_vm1, %v3615_v43, %v3617_v33 }
 0x468   :  { %3041 = vrot.lane.b32.xlu0 %v8929_v7, %s7224_s22  ;;  %3807 = vrot.lane.b32.xlu1 %v8903_v32, %s7225_s24 }
 0x469   :  { %5890 = vmatpush1.bf16.msra.mxu0 %v9078_v44 }
 0x46a   :  { %v3625_v48 = vpop.permute.xlu1 %3624 }
 0x46c   :  { %3045 = vrot.lane.b32.xlu1 %v8821_v42, %s7224_s22  ;;  %3049 = vrot.lane.b32.xlu0 %v8954_v13, %s7224_s22 }
 0x470   :  { %3817 = vrot.lane.b32.xlu1 %v8821_v42, %s7225_s24  ;;  %3821 = vrot.lane.b32.xlu0 %v8954_v13, %s7225_s24 }
 0x474   :  { %3813 = vrot.lane.b32.xlu1 %v8929_v7, %s7225_s24  ;;  %3047 = vrot.lane.b32.xlu0 %v8961_v38, %s7224_s22 }
 0x478   :  { %3051 = vrot.lane.b32.xlu1 %v8821_v42, %s7224_s22  ;;  %3972 = vrot.lane.b32.xlu0 %v8946_v23, %s7226_s11 }
 0x47c   :  { %3823 = vrot.lane.b32.xlu1 %v8821_v42, %s7225_s24  ;;  %3970 = vrot.lane.b32.xlu0 %v8968_v50, %s7226_s11 }
 0x47e   :  { %v3623_v62 = vpop.permute.xlu0 %3622 }
 0x47f   :  { %v9109_v0 = vsel %vm3632_vm1, %v3623_v62, %v3625_v48 }
 0x480   :  { %3819 = vrot.lane.b32.xlu1 %v8961_v38, %s7225_s24  ;;  %3980 = vrot.lane.b32.xlu0 %v8821_v42, %s7226_s11 }
 0x481   :  { %5891 = vmatprep.subr.bf16.mxu0 %v9109_v0 }
 0x482   :  { %v3621_v10 = vpop.permute.xlu0 %3620 }
 0x483   :  { %v9119_v12 = vsel %vm3632_vm1, %v3621_v10, %v3623_v62 }
 0x484   :  { %3974 = vrot.lane.b32.xlu1 %v8821_v42, %s7226_s11  ;;  %3984 = vrot.lane.b32.xlu0 %v9116_v11, %s7226_s11 }
 0x485   :  { %5892 = vmatpush1.bf16.msra.mxu0 %v9119_v12 }
 0x486   :  { %v3631_v17 = vpop.permute.xlu0 %3630 }
 0x488   :  { %3978 = vrot.lane.b32.xlu1 %v9126_v20, %s7226_s11  ;;  %3982 = vrot.lane.b32.xlu0 %v9128_v21, %s7226_s11 }
 0x48a   :  { %v3008_v24 = vpop.permute.xlu0 %3007 }
 0x48c   :  { %3976 = vrot.lane.b32.xlu1 %v9015_v39, %s7226_s11  ;;  %3992 = vrot.lane.b32.xlu0 %v8821_v42, %s7226_s11 }
 0x48e   :  { %v3629_v25 = vpop.permute.xlu1 %3628  ;;  %v3780_v26 = vpop.permute.xlu0 %3779 }
 0x48f   :  { %v9139_v29 = vsel %vm3632_vm1, %v3629_v25, %v3631_v17 }
 0x490   :  { %3986 = vrot.lane.b32.xlu1 %v8821_v42, %s7226_s11  ;;  %3996 = vrot.lane.b32.xlu0 %v8867_v63, %s7226_s11 }
 0x491   :  { %5893 = vmatprep.subr.bf16.mxu0 %v9139_v29 }
 0x492   :  { %v3627_v45 = vpop.permute.xlu1 %3626  ;;  %v3006_v46 = vpop.permute.xlu0 %3005 }
 0x493   :  { %v9149_v59 = vsel %vm3632_vm1, %v3627_v45, %v3629_v25  ;;  %v3054_v37 = vsel %vm3053_vm2, %v3006_v46, %v3008_v24  ;;  %v4095_v25 = vld [vmem:[#allocation2 + $0xe0] sm:$0xff] }
 0x494   :  { %3990 = vrot.lane.b32.xlu1 %v9146_v55, %s7226_s11  ;;  %3994 = vrot.lane.b32.xlu0 %v8869_v2, %s7226_s11  ;;  %v9233_v45 = vpack.c.bf16 %v4095_v25, %v4092_v52 }
 0x495   :  { %5894 = vmatpush1.bf16.msra.mxu0 %v9149_v59 }
 0x496   :  { %v3010_v63 = vpop.permute.xlu1 %3009  ;;  %v3014_v41 = vpop.permute.xlu0 %3013 }
 0x497   :  { %v3055_v28 = vsel %vm3053_vm2, %v3008_v24, %v3010_v63  ;;  %v4091_v63 = vld [vmem:[#allocation2 + $0xc0] sm:$0xff] }
 0x498   :  { %3988 = vrot.lane.b32.xlu1 %v9156_v53, %s7226_s11  ;;  %4004 = vrot.lane.b32.xlu0 %v8821_v42, %s7226_s11 }
 0x499   :  { %5509 = vmatprep.subr.bf16.mxu1 %v3055_v28 }
 0x49a   :  { %5510 = vmatpush1.bf16.msra.mxu1 %v3054_v37  ;;  %v3782_v2 = vpop.permute.xlu1 %3781  ;;  %v3786_v57 = vpop.permute.xlu0 %3785 }
 0x49b   :  { %v9165_v35 = vsel %vm3825_vm3, %v3780_v26, %v3782_v2 }
 0x49c   :  { %3998 = vrot.lane.b32.xlu1 %v8821_v42, %s7226_s11  ;;  %4008 = vrot.lane.b32.xlu0 %v8927_v4, %s7226_s11 }
 0x49d   :  { %5895 = vmatprep.subr.bf16.mxu0 %v9165_v35 }
 0x49e   :  { %v3778_v58 = vpop.permute.xlu1 %3777  ;;  %v3012_v36 = vpop.permute.xlu0 %3011 }
 0x49f   :  { %v9173_v5 = vsel %vm3825_vm3, %v3778_v58, %v3780_v26  ;;  %v3056_v4 = vsel %vm3053_vm2, %v3012_v36, %v3014_v41 }
 0x4a0   :  { %4002 = vrot.lane.b32.xlu1 %v8901_v31, %s7226_s11  ;;  %4006 = vrot.lane.b32.xlu0 %v8929_v7, %s7226_s11 }
 0x4a1   :  { %5896 = vmatpush1.bf16.msra.mxu0 %v9173_v5 }
 0x4a2   :  { %v3016_v19 = vpop.permute.xlu1 %3015  ;;  %v3020_v33 = vpop.permute.xlu0 %3019 }
 0x4a3   :  { %v3057_v43 = vsel %vm3053_vm2, %v3014_v41, %v3016_v19  ;;  %v4094_v41 = vld [vmem:[#allocation2 + $0xd8] sm:$0xff] }
 0x4a4   :  { %4000 = vrot.lane.b32.xlu1 %v8903_v32, %s7226_s11  ;;  %4016 = vrot.lane.b32.xlu0 %v8821_v42, %s7226_s11  ;;  %v9243_v2 = vpack.c.bf16 %v4094_v41, %v4091_v63  ;;  %v3106_v63 = vld [vmem:[#allocation2 + $0x20] sm:$0xff] }
 0x4a5   :  { %5511 = vmatprep.subr.bf16.mxu1 %v3057_v43  ;;  %v4107_v43 = vld [vmem:[#allocation2 + $0x140] sm:$0xff] }
 0x4a6   :  { %5512 = vmatpush1.bf16.msra.mxu1 %v3056_v4  ;;  %v3788_v31 = vpop.permute.xlu1 %3787  ;;  %v3792_v6 = vpop.permute.xlu0 %3791 }
 0x4a7   :  { %v9187_v7 = vsel %vm3825_vm3, %v3786_v57, %v3788_v31 }
 0x4a8   :  { %4010 = vrot.lane.b32.xlu1 %v8821_v42, %s7226_s11  ;;  %4165 = vrot.lane.b32.xlu0 %v8946_v23, %s7227_s30 }
 0x4a9   :  { %5897 = vmatprep.subr.bf16.mxu0 %v9187_v7 }
 0x4aa   :  { %v3784_v32 = vpop.permute.xlu1 %3783  ;;  %v3018_v48 = vpop.permute.xlu0 %3017 }
 0x4ab   :  { %v9195_v51 = vsel %vm3825_vm3, %v3784_v32, %v3786_v57  ;;  %v3058_v23 = vsel %vm3053_vm2, %v3018_v48, %v3020_v33  ;;  %v4103_v48 = vld [vmem:[#allocation2 + $0x120] sm:$0xff] }
 0x4ac   :  { %4014 = vrot.lane.b32.xlu1 %v8954_v13, %s7226_s11  ;;  %4163 = vrot.lane.b32.xlu0 %v8968_v50, %s7227_s30 }
 0x4ad   :  { %5898 = vmatpush1.bf16.msra.mxu0 %v9195_v51 }
 0x4ae   :  { %v3022_v61 = vpop.permute.xlu1 %3021  ;;  %v3026_v62 = vpop.permute.xlu0 %3025 }
 0x4af   :  { %v3059_v1 = vsel %vm3053_vm2, %v3020_v33, %v3022_v61  ;;  %v4104_v33 = vld [vmem:[#allocation2 + $0x128] sm:$0xff] }
 0x4b0   :  { %4012 = vrot.lane.b32.xlu1 %v8961_v38, %s7226_s11  ;;  %4173 = vrot.lane.b32.xlu0 %v8821_v42, %s7227_s30  ;;  %v6998_v38 = vld [vmem:[%s10264_s0 + $0x4] ss:$36 sps:$4 sm:$0xff]   ;;  %v9259_v32 = vpack.c.bf16 %v4107_v43, %v4104_v33  ;;  %v4110_v33 = vld [vmem:[#allocation2 + $0x158] sm:$0xff]  ;;  %v4113_v43 = vld [vmem:[#allocation2 + $0x170] sm:$0xff] }
 0x4b1   :  { %5513 = vmatprep.subr.bf16.mxu1 %v3059_v1  ;;  %5525 = vmatprep.mubr.bf16.mxu1 %v6998_v38  ;;  %v4101_v1 = vld [vmem:[#allocation2 + $0x110] sm:$0xff] }
 0x4b2   :  { %5514 = vmatpush1.bf16.msra.mxu1 %v3058_v23  ;;  %v3794_v13 = vpop.permute.xlu1 %3793  ;;  %v3798_v3 = vpop.permute.xlu0 %3797  ;;  %v4106_v23 = vld [vmem:[#allocation2 + $0x138] sm:$0xff] }
 0x4b3   :  { %v9209_v50 = vsel %vm3825_vm3, %v3792_v6, %v3794_v13 }
 0x4b4   :  { %4167 = vrot.lane.b32.xlu1 %v8821_v42, %s7227_s30  ;;  %4177 = vrot.lane.b32.xlu0 %v9116_v11, %s7227_s30 }
 0x4b5   :  { %5899 = vmatprep.subr.bf16.mxu0 %v9209_v50 }
 0x4b6   :  { %v3790_v8 = vpop.permute.xlu1 %3789  ;;  %v3024_v9 = vpop.permute.xlu0 %3023 }
 0x4b7   :  { %v9220_v10 = vsel %vm3825_vm3, %v3790_v8, %v3792_v6  ;;  %v3060_v26 = vsel %vm3053_vm2, %v3024_v9, %v3026_v62  ;;  %v9271_v8 = vpack.c.bf16 %v4106_v23, %v4103_v48  ;;  %v9299_v48 = vpack.c.bf16 %v4113_v43, %v4110_v33  ;;  %v4109_v23 = vld [vmem:[#allocation2 + $0x150] sm:$0xff] }
 0x4b8   :  { %4171 = vrot.lane.b32.xlu1 %v9126_v20, %s7227_s30  ;;  %4175 = vrot.lane.b32.xlu0 %v9128_v21, %s7227_s30 }
 0x4b9   :  { %5900 = vmatpush1.bf16.msra.mxu0 %v9220_v10 }
 0x4ba   :  { %v3028_v17 = vpop.permute.xlu1 %3027  ;;  %v3032_v24 = vpop.permute.xlu0 %3031 }
 0x4bb   :  { %v3061_v47 = vsel %vm3053_vm2, %v3026_v62, %v3028_v17  ;;  %v4098_v62 = vld [vmem:[#allocation2 + $0xf8] sm:$0xff]  ;;  %v4097_v17 = vld [vmem:[#allocation2 + $0xf0] sm:$0xff] }
 0x4bc   :  { %4169 = vrot.lane.b32.xlu1 %v9015_v39, %s7227_s30  ;;  %4185 = vrot.lane.b32.xlu0 %v8821_v42, %s7227_s30  ;;  %v9269_v38 = vpack.c.bf16 %v4101_v1, %v4098_v62 }
 0x4bd   :  { %5515 = vmatprep.subr.bf16.mxu1 %v3061_v47 }
 0x4be   :  { %5516 = vmatpush1.bf16.msra.mxu1 %v3060_v26  ;;  %v3800_v14 = vpop.permute.xlu1 %3799  ;;  %v3804_v34 = vpop.permute.xlu0 %3803 }
 0x4bf   :  { %v9236_v46 = vsel %vm3825_vm3, %v3798_v3, %v3800_v14  ;;  %v3103_v14 = vld [vmem:[#allocation2 + $0x8] sm:$0xff] }
 0x4c0   :  { %4179 = vrot.lane.b32.xlu1 %v8821_v42, %s7227_s30  ;;  %4189 = vrot.lane.b32.xlu0 %v9233_v45, %s7227_s30 }
 0x4c1   :  { %5901 = vmatprep.subr.bf16.mxu0 %v9236_v46 }
 0x4c2   :  { %v3796_v28 = vpop.permute.xlu1 %3795  ;;  %v3030_v37 = vpop.permute.xlu0 %3029 }
 0x4c3   :  { %v9246_v57 = vsel %vm3825_vm3, %v3796_v28, %v3798_v3  ;;  %v3062_v4 = vsel %vm3053_vm2, %v3030_v37, %v3032_v24  ;;  %v9289_v37 = vpack.c.bf16 %v3106_v63, %v3103_v14 }
 0x4c4   :  { %4183 = vrot.lane.b32.xlu1 %v9146_v55, %s7227_s30  ;;  %4187 = vrot.lane.b32.xlu0 %v9243_v2, %s7227_s30 }
 0x4c5   :  { %5902 = vmatpush1.bf16.msra.mxu0 %v9246_v57 }
 0x4c6   :  { %v3034_v58 = vpop.permute.xlu1 %3033  ;;  %v3038_v36 = vpop.permute.xlu0 %3037 }
 0x4c7   :  { %v3063_v19 = vsel %vm3053_vm2, %v3032_v24, %v3034_v58  ;;  %v4100_v24 = vld [vmem:[#allocation2 + $0x108] sm:$0xff]  ;;  %v3102_v58 = vld [vmem:[#allocation2] sm:$0xff] }
 0x4c8   :  { %4181 = vrot.lane.b32.xlu1 %v9156_v53, %s7227_s30  ;;  %4197 = vrot.lane.b32.xlu0 %v8821_v42, %s7227_s30  ;;  %v9281_v25 = vpack.c.bf16 %v4100_v24, %v4097_v17 }
 0x4c9   :  { %5517 = vmatprep.subr.bf16.mxu1 %v3063_v19 }
 0x4ca   :  { %5518 = vmatpush1.bf16.msra.mxu1 %v3062_v4  ;;  %v3806_v31 = vpop.permute.xlu1 %3805  ;;  %v3810_v6 = vpop.permute.xlu0 %3809  ;;  %v3105_v4 = vld [vmem:[#allocation2 + $0x18] sm:$0xff] }
 0x4cb   :  { %v9262_v61 = vsel %vm3825_vm3, %v3804_v34, %v3806_v31  ;;  %v9301_v62 = vpack.c.bf16 %v3105_v4, %v3102_v58  ;;  %v6996_v4 = vld [vmem:[%s10264_s0] ss:$36 sps:$4 sm:$0xff]  }
 0x4cc   :  { %4191 = vrot.lane.b32.xlu1 %v8821_v42, %s7227_s30  ;;  %4201 = vrot.lane.b32.xlu0 %v9259_v32, %s7227_s30 }
 0x4cd   :  { %5903 = vmatprep.subr.bf16.mxu0 %v9262_v61 }
 0x4ce   :  { %v3802_v13 = vpop.permute.xlu1 %3801  ;;  %v3036_v3 = vpop.permute.xlu0 %3035 }
 0x4cf   :  { %v9274_v9 = vsel %vm3825_vm3, %v3802_v13, %v3804_v34  ;;  %v3064_v34 = vsel %vm3053_vm2, %v3036_v3, %v3038_v36  ;;  %v4112_v13 = vld [vmem:[#allocation2 + $0x168] sm:$0xff] }
 0x4d0   :  { %4195 = vrot.lane.b32.xlu1 %v9269_v38, %s7227_s30  ;;  %4199 = vrot.lane.b32.xlu0 %v9271_v8, %s7227_s30  ;;  %v9311_v24 = vpack.c.bf16 %v4112_v13, %v4109_v23  ;;  %v7002_v23 = vld [vmem:[%s10264_s0 + $0x4c] ss:$36 sps:$4 sm:$0xff]  }
 0x4d1   :  { %5904 = vmatpush1.bf16.msra.mxu0 %v9274_v9 }
 0x4d2   :  { %v3040_v47 = vpop.permute.xlu1 %3039  ;;  %v3044_v52 = vpop.permute.xlu0 %3043 }
 0x4d3   :  { %v3065_v26 = vsel %vm3053_vm2, %v3038_v36, %v3040_v47 }
 0x4d4   :  { %4193 = vrot.lane.b32.xlu1 %v9281_v25, %s7227_s30  ;;  %4209 = vrot.lane.b32.xlu0 %v8821_v42, %s7227_s30 }
 0x4d5   :  { %5519 = vmatprep.subr.bf16.mxu1 %v3065_v26 }
 0x4d6   :  { %5520 = vmatpush1.bf16.msra.mxu1 %v3064_v34  ;;  %v3812_v41 = vpop.permute.xlu1 %3811  ;;  %v3816_v28 = vpop.permute.xlu0 %3815 }
 0x4d7   :  { %v9292_v19 = vsel %vm3825_vm3, %v3810_v6, %v3812_v41 }
 0x4d8   :  { %4203 = vrot.lane.b32.xlu1 %v8821_v42, %s7227_s30  ;;  %3200 = vrot.lane.b32.xlu0 %v9289_v37, %s7228_s17 }
 0x4d9   :  { %5905 = vmatprep.subr.bf16.mxu0 %v9292_v19 }
 0x4da   :  { %v3808_v36 = vpop.permute.xlu1 %3807  ;;  %v3042_v31 = vpop.permute.xlu0 %3041 }
 0x4db   :  { %v9304_v1 = vsel %vm3825_vm3, %v3808_v36, %v3810_v6  ;;  %v3066_v6 = vsel %vm3053_vm2, %v3042_v31, %v3044_v52 }
 0x4dc   :  { %4207 = vrot.lane.b32.xlu1 %v9299_v48, %s7227_s30  ;;  %3198 = vrot.lane.b32.xlu0 %v9301_v62, %s7228_s17 }
 0x4dd   :  { %5906 = vmatpush1.bf16.msra.mxu0 %v9304_v1 }
 0x4de   :  { %v3046_v3 = vpop.permute.xlu1 %3045  ;;  %v3050_v17 = vpop.permute.xlu0 %3049 }
 0x4df   :  { %v3067_v47 = vsel %vm3053_vm2, %v3044_v52, %v3046_v3 }
 0x4e0   :  { %4205 = vrot.lane.b32.xlu1 %v9311_v24, %s7227_s30  ;;  %3208 = vrot.lane.b32.xlu0 %v8821_v42, %s7228_s17 }
 0x4e1   :  { %5521 = vmatprep.subr.bf16.mxu1 %v3067_v47  ;;  %v6990_v47 = vld [vmem:[%s10264_s0 + $0x10] ss:$36 sps:$4 sm:$0xff]  }
 0x4e2   :  { %5522 = vmatpush1.bf16.msra.mxu1 %v3066_v6  ;;  %v3818_v26 = vpop.permute.xlu1 %3817  ;;  %v3822_v14 = vpop.permute.xlu0 %3821 }
 0x4e3   :  { %v9320_v63 = vsel %vm3825_vm3, %v3816_v28, %v3818_v26 }
 0x4e4   :  { %3202 = vrot.lane.b32.xlu1 %v8821_v42, %s7228_s17  ;;  %3212 = vrot.lane.b32.xlu0 %v9116_v11, %s7228_s17 }
 0x4e5   :  { %5907 = vmatprep.subr.bf16.mxu0 %v9320_v63 }
 0x4e6   :  { %v3814_v34 = vpop.permute.xlu1 %3813  ;;  %v3048_v41 = vpop.permute.xlu0 %3047 }
 0x4e7   :  { %v9328_v58 = vsel %vm3825_vm3, %v3814_v34, %v3816_v28  ;;  %v3068_v28 = vsel %vm3053_vm2, %v3048_v41, %v3050_v17  ;;  %v7006_v41 = vld [vmem:[%s10264_s0 + $0x48] ss:$36 sps:$4 sm:$0xff]  }
 0x4e8   :  { %3206 = vrot.lane.b32.xlu1 %v9126_v20, %s7228_s17  ;;  %3210 = vrot.lane.b32.xlu0 %v9128_v21, %s7228_s17 }
 0x4e9   :  { %5908 = vmatpush1.bf16.msra.mxu0 %v9328_v58 }
 0x4ea   :  { %v3052_v52 = vpop.permute.xlu1 %3051  ;;  %v3973_v33 = vpop.permute.xlu0 %3972 }
 0x4eb   :  { %v3069_v43 = vsel %vm3053_vm2, %v3050_v17, %v3052_v52 }
 0x4ec   :  { %3204 = vrot.lane.b32.xlu1 %v9015_v39, %s7228_s17  ;;  %3220 = vrot.lane.b32.xlu0 %v8821_v42, %s7228_s17 }
 0x4ed   :  { %5523 = vmatprep.subr.bf16.mxu1 %v3069_v43  ;;  %v7008_v43 = vld [vmem:[%s10264_s0 + $0x94] ss:$36 sps:$4 sm:$0xff]  }
 0x4ee   :  { %5524 = vmatpush1.bf16.msra.mxu1 %v3068_v28  ;;  %v3824_v36 = vpop.permute.xlu1 %3823  ;;  %v3971_v31 = vpop.permute.xlu0 %3970 }
 0x4ef   :  { %v9348_v13 = vsel %vm3825_vm3, %v3822_v14, %v3824_v36  ;;  %v4019_v52 = vsel %vm4018_vm4, %v3971_v31, %v3973_v33 }
 0x4f0   :  { %3214 = vrot.lane.b32.xlu1 %v8821_v42, %s7228_s17  ;;  %3224 = vrot.lane.b32.xlu0 %v9233_v45, %s7228_s17 }
 0x4f1   :  { %5909 = vmatprep.subr.bf16.mxu0 %v9348_v13  ;;  %5526 = vmatmul.mubr.bf16.vlgmr.msra.gmra.mrb[0].mxu1 %v6996_v4 }
 0x4f2   :  { %v3820_v39 = vpop.permute.xlu1 %3819  ;;  %v3981_v3 = vpop.permute.xlu0 %3980  ;;  %5535 = vmatprep.mubr.bf16.mxu1 %v7002_v23  ;;  %v6995_v23 = vld [vmem:[%s10264_s0 + $0x58] ss:$36 sps:$4 sm:$0xff]  }
 0x4f3   :  { %v9356_v17 = vsel %vm3825_vm3, %v3820_v39, %v3822_v14  ;;  %v6993_v14 = vld [vmem:[%s10264_s0 + $0x5c] ss:$36 sps:$4 sm:$0xff]  }
 0x4f4   :  { %3218 = vrot.lane.b32.xlu1 %v9146_v55, %s7228_s17  ;;  %3222 = vrot.lane.b32.xlu0 %v9243_v2, %s7228_s17 }
 0x4f5   :  { %5910 = vmatpush1.bf16.msra.mxu0 %v9356_v17 }
 0x4f6   :  { %v3975_v6 = vpop.permute.xlu1 %3974  ;;  %v3985_v26 = vpop.permute.xlu0 %3984 }
 0x4f7   :  { %v4020_v34 = vsel %vm4018_vm4, %v3973_v33, %v3975_v6  ;;  %v7014_v6 = vld [vmem:[%s10264_s0 + $0xdc] ss:$36 sps:$4 sm:$0xff]  }
 0x4f8   :  { %3216 = vrot.lane.b32.xlu1 %v9156_v53, %s7228_s17  ;;  %3232 = vrot.lane.b32.xlu0 %v8821_v42, %s7228_s17 }
 0x4f9   :  { %6072 = vmatprep.subr.bf16.mxu0 %v4020_v34  ;;  %5912 = vmatmul.mubr.bf16.vlgmr.msra.gmra.mrb[0].mxu0 %v6990_v47  ;;  %v7012_v47 = vld [vmem:[%s10264_s0 + $0x90] ss:$36 sps:$4 sm:$0xff]  }
 0x4fa   :  { %6073 = vmatpush1.bf16.msra.mxu0 %v4019_v52  ;;  %v3979_v28 = vpop.permute.xlu1 %3978  ;;  %v3983_v4 = vpop.permute.xlu0 %3982  ;;  %5921 = vmatprep.mubr.bf16.mxu0 %v6993_v14 }
 0x4fb   :  { %v4022_v36 = vsel %vm4018_vm4, %v3979_v28, %v3981_v3  ;;  %5536 = vmatmul.mubr.bf16.gmra.mrb[4].mxu1 %v7006_v41  ;;  %v6999_v3 = vld [vmem:[%s10264_s0 + $0xa4] ss:$36 sps:$4 sm:$0xff]   ;;  %v4023_v52 = vsel %vm4018_vm4, %v3983_v4, %v3985_v26 }
 0x4fc   :  { %3226 = vrot.lane.b32.xlu1 %v8821_v42, %s7228_s17  ;;  %3236 = vrot.lane.b32.xlu0 %v9259_v32, %s7228_s17 }
 0x4fd   :  { %6074 = vmatprep.subr.bf16.mxu0 %v4022_v36  ;;  %5545 = vmatprep.mubr.bf16.mxu1 %v7008_v43  ;;  %v7001_v36 = vld [vmem:[%s10264_s0 + $0xa0] ss:$36 sps:$4 sm:$0xff]  }
 0x4fe   :  { %v3977_v33 = vpop.permute.xlu1 %3976  ;;  %v3993_v31 = vpop.permute.xlu0 %3992 }
 0x4ff   :  { %v4021_v39 = vsel %vm4018_vm4, %v3977_v33, %v3979_v28 }
 0x500   :  { %3230 = vrot.lane.b32.xlu1 %v9269_v38, %s7228_s17  ;;  %3234 = vrot.lane.b32.xlu0 %v9271_v8, %s7228_s17 }
 0x501   :  { %6075 = vmatpush1.bf16.msra.mxu0 %v4021_v39  ;;  %v7018_v39 = vld [vmem:[%s10264_s0 + $0xd8] ss:$36 sps:$4 sm:$0xff]  }
 0x502   :  { %v3987_v14 = vpop.permute.xlu1 %3986  ;;  %v3997_v34 = vpop.permute.xlu0 %3996  ;;  %5922 = vmatmul.mubr.bf16.gmra.mrb[4].mxu0 %v6995_v23  ;;  %v7004_v23 = vld [vmem:[%s10264_s0 + $0xec] ss:$36 sps:$4 sm:$0xff]  }
 0x503   :  { %v4024_v41 = vsel %vm4018_vm4, %v3985_v26, %v3987_v14  ;;  %5931 = vmatprep.mubr.bf16.mxu0 %v6999_v3  ;;  %5546 = vmatmul.mubr.bf16.gmra.mrb[8].mxu1 %v7012_v47  ;;  %v7020_v26 = vld [vmem:[%s10264_s0 + $0x124] ss:$36 sps:$4 sm:$0xff]  }
 0x504   :  { %3228 = vrot.lane.b32.xlu1 %v9281_v25, %s7228_s17  ;;  %3244 = vrot.lane.b32.xlu0 %v8821_v42, %s7228_s17 }
 0x505   :  { %6076 = vmatprep.subr.bf16.mxu0 %v4024_v41  ;;  %5555 = vmatprep.mubr.bf16.mxu1 %v7014_v6  ;;  %v7007_v41 = vld [vmem:[%s10264_s0 + $0xe8] ss:$36 sps:$4 sm:$0xff]  }
 0x506   :  { %6077 = vmatpush1.bf16.msra.mxu0 %v4023_v52  ;;  %v3991_v43 = vpop.permute.xlu1 %3990  ;;  %v3995_v28 = vpop.permute.xlu0 %3994  ;;  %v7024_v52 = vld [vmem:[%s10264_s0 + $0x120] ss:$36 sps:$4 sm:$0xff]  }
 0x507   :  { %v4026_v33 = vsel %vm4018_vm4, %v3991_v43, %v3993_v31 }
 0x508   :  { %3238 = vrot.lane.b32.xlu1 %v8821_v42, %s7228_s17  ;;  %3393 = vrot.lane.b32.xlu0 %v9289_v37, %s7229_s6 }
 0x509   :  { %6078 = vmatprep.subr.bf16.mxu0 %v4026_v33 }
 0x50a   :  { %v3989_v4 = vpop.permute.xlu1 %3988  ;;  %v4005_v31 = vpop.permute.xlu0 %4004  ;;  %5932 = vmatmul.mubr.bf16.gmra.mrb[8].mxu0 %v7001_v36  ;;  %v7010_v36 = vld [vmem:[%s10264_s0 + $0x134] ss:$36 sps:$4 sm:$0xff]  }
 0x50b   :  { %v4025_v3 = vsel %vm4018_vm4, %v3989_v4, %v3991_v43  ;;  %5941 = vmatprep.mubr.bf16.mxu0 %v7004_v23  ;;  %5556 = vmatmul.mubr.bf16.gmra.mrb[12].mxu1 %v7018_v39  ;;  %v4027_v43 = vsel %vm4018_vm4, %v3995_v28, %v3997_v34  ;;  %v7026_v39 = vld [vmem:[%s10264_s0 + $0x16c] ss:$36 sps:$4 sm:$0xff]  }
 0x50c   :  { %3242 = vrot.lane.b32.xlu1 %v9299_v48, %s7228_s17  ;;  %3391 = vrot.lane.b32.xlu0 %v9301_v62, %s7229_s6  ;;  %v3301_v4 = vld [vmem:[#allocation2 + $0x30] sm:$0xff] }
 0x50d   :  { %6079 = vmatpush1.bf16.msra.mxu0 %v4025_v3  ;;  %5565 = vmatprep.mubr.bf16.mxu1 %v7020_v26 }
 0x50e   :  { %v3999_v47 = vpop.permute.xlu1 %3998  ;;  %v4009_v6 = vpop.permute.xlu0 %4008 }
 0x50f   :  { %v4028_v14 = vsel %vm4018_vm4, %v3997_v34, %v3999_v47  ;;  %v3304_v47 = vld [vmem:[#allocation2 + $0x48] sm:$0xff] }
 0x510   :  { %3240 = vrot.lane.b32.xlu1 %v9311_v24, %s7228_s17  ;;  %3401 = vrot.lane.b32.xlu0 %v8821_v42, %s7229_s6 }
 0x511   :  { %6080 = vmatprep.subr.bf16.mxu0 %v4028_v14  ;;  %v7030_v14 = vld [vmem:[%s10264_s0 + $0x168] ss:$36 sps:$4 sm:$0xff]  }
 0x512   :  { %6081 = vmatpush1.bf16.msra.mxu0 %v4027_v43  ;;  %v4003_v33 = vpop.permute.xlu1 %4002  ;;  %v4007_v23 = vpop.permute.xlu0 %4006  ;;  %v9468_v43 = vpack.c.bf16 %v3304_v47, %v3301_v4  ;;  %v7037_v4 = vld [vmem:[%s10264_s0 + $0x1b0] ss:$36 sps:$4 sm:$0xff]  }
 0x513   :  { %v4030_v26 = vsel %vm4018_vm4, %v4003_v33, %v4005_v31  ;;  %5942 = vmatmul.mubr.bf16.gmra.mrb[12].mxu0 %v7007_v41  ;;  %5566 = vmatmul.mubr.bf16.gmra.mrb[16].mxu1 %v7024_v52  ;;  %v7013_v31 = vld [vmem:[%s10264_s0 + $0x130] ss:$36 sps:$4 sm:$0xff]  }
 0x514   :  { %3395 = vrot.lane.b32.xlu1 %v8821_v42, %s7229_s6  ;;  %3405 = vrot.lane.b32.xlu0 %v9116_v11, %s7229_s6  ;;  %v7016_v11 = vld [vmem:[%s10264_s0 + $0x17c] ss:$36 sps:$4 sm:$0xff]  }
 0x515   :  { %6082 = vmatprep.subr.bf16.mxu0 %v4030_v26  ;;  %5951 = vmatprep.mubr.bf16.mxu0 %v7010_v36  ;;  %v7032_v36 = vld [vmem:[%s10264_s0 + $0x1b4] ss:$36 sps:$4 sm:$0xff]  }
 0x516   :  { %v4001_v34 = vpop.permute.xlu1 %4000  ;;  %v4017_v28 = vpop.permute.xlu0 %4016  ;;  %5575 = vmatprep.mubr.bf16.mxu1 %v7026_v39 }
 0x517   :  { %v4029_v3 = vsel %vm4018_vm4, %v4001_v34, %v4003_v33  ;;  %v7019_v34 = vld [vmem:[%s10264_s0 + $0x178] ss:$36 sps:$4 sm:$0xff]  }
 0x518   :  { %3399 = vrot.lane.b32.xlu1 %v9126_v20, %s7229_s6  ;;  %3403 = vrot.lane.b32.xlu0 %v9128_v21, %s7229_s6  ;;  %v4031_v20 = vsel %vm4018_vm4, %v4007_v23, %v4009_v6 }
 0x519   :  { %6083 = vmatpush1.bf16.msra.mxu0 %v4029_v3  ;;  %v7038_v3 = vld [vmem:[%s10264_s0 + $0x1fc] ss:$36 sps:$4 sm:$0xff]  }
 0x51a   :  { %v4011_v41 = vpop.permute.xlu1 %4010  ;;  %v4166_v52 = vpop.permute.xlu0 %4165 }
 0x51b   :  { %v4032_v33 = vsel %vm4018_vm4, %v4009_v6, %v4011_v41  ;;  %5952 = vmatmul.mubr.bf16.gmra.mrb[16].mxu0 %v7013_v31  ;;  %5576 = vmatmul.mubr.bf16.gmra.mrb[20].mxu1 %v7030_v14  ;;  %v7022_v6 = vld [vmem:[%s10264_s0 + $0x1c4] ss:$36 sps:$4 sm:$0xff]   ;;  %v7042_v41 = vld [vmem:[%s10264_s0 + $0x1f8] ss:$36 sps:$4 sm:$0xff]  }
 0x51c   :  { %3397 = vrot.lane.b32.xlu1 %v9468_v43, %s7229_s6  ;;  %3413 = vrot.lane.b32.xlu0 %v8821_v42, %s7229_s6 }
 0x51d   :  { %6084 = vmatprep.subr.bf16.mxu0 %v4032_v33  ;;  %5961 = vmatprep.mubr.bf16.mxu0 %v7016_v11  ;;  %v7025_v11 = vld [vmem:[%s10264_s0 + $0x1c0] ss:$36 sps:$4 sm:$0xff]   ;;  %v7028_v33 = vld [vmem:[%s10264_s0 + $0x20c] ss:$36 sps:$4 sm:$0xff]  }
 0x51e   :  { %6085 = vmatpush1.bf16.msra.mxu0 %v4031_v20  ;;  %v4015_v21 = vpop.permute.xlu1 %4014  ;;  %v4164_v39 = vpop.permute.xlu0 %4163  ;;  %5585 = vmatprep.mubr.bf16.mxu1 %v7032_v36 }
 0x51f   :  { %v4034_v26 = vsel %vm4018_vm4, %v4015_v21, %v4017_v28  ;;  %v4212_v36 = vsel %vm4211_vm5, %v4164_v39, %v4166_v52 }
 0x520   :  { %3407 = vrot.lane.b32.xlu1 %v8821_v42, %s7229_s6  ;;  %3417 = vrot.lane.b32.xlu0 %v9233_v45, %s7229_s6 }
 0x521   :  { %6086 = vmatprep.subr.bf16.mxu0 %v4034_v26 }
 0x522   :  { %v4013_v23 = vpop.permute.xlu1 %4012  ;;  %v4174_v28 = vpop.permute.xlu0 %4173 }
 0x523   :  { %v4033_v47 = vsel %vm4018_vm4, %v4013_v23, %v4015_v21  ;;  %5962 = vmatmul.mubr.bf16.gmra.mrb[20].mxu0 %v7019_v34  ;;  %5586 = vmatmul.mubr.bf16.gmra.mrb[24].mxu1 %v7037_v4  ;;  %v7031_v34 = vld [vmem:[%s10264_s0 + $0x208] ss:$36 sps:$4 sm:$0xff]   ;;  %v7048_v4 = vld [vmem:[%s10264_s0 + $0x240] ss:$36 sps:$4 sm:$0xff]  }
 0x524   :  { %3411 = vrot.lane.b32.xlu1 %v9146_v55, %s7229_s6  ;;  %3415 = vrot.lane.b32.xlu0 %v9243_v2, %s7229_s6  ;;  %v7199_v55 = vld [vmem:[#allocation2 + $0x10] sm:$0xff] }
 0x525   :  { %6087 = vmatpush1.bf16.msra.mxu0 %v4033_v47  ;;  %5971 = vmatprep.mubr.bf16.mxu0 %v7022_v6  ;;  %v9512_v2 = vpack.c.bf16 %v7199_v55, %v7199_v55 }
 0x526   :  { %v4168_v45 = vpop.permute.xlu1 %4167  ;;  %v4178_v31 = vpop.permute.xlu0 %4177  ;;  %5595 = vmatprep.mubr.bf16.mxu1 %v7038_v3 }
 0x527   :  { %v4213_v14 = vsel %vm4211_vm5, %v4166_v52, %v4168_v45 }
 0x528   :  { %3409 = vrot.lane.b32.xlu1 %v9156_v53, %s7229_s6  ;;  %3425 = vrot.lane.b32.xlu0 %v8821_v42, %s7229_s6  ;;  %v7044_v53 = vld [vmem:[%s10264_s0 + $0x244] ss:$36 sps:$4 sm:$0xff]  }
 0x529   :  { %6088 = vmatprep.subr.bf16.mxu0 %v4213_v14  ;;  %v7054_v14 = vld [vmem:[%s10264_s0 + $0x288] ss:$36 sps:$4 sm:$0xff]  }
 0x52a   :  { %6089 = vmatpush1.bf16.msra.mxu0 %v4212_v36  ;;  %v4172_v20 = vpop.permute.xlu1 %4171  ;;  %v4176_v21 = vpop.permute.xlu0 %4175 }
 0x52b   :  { %v4215_v26 = vsel %vm4211_vm5, %v4172_v20, %v4174_v28  ;;  %5972 = vmatmul.mubr.bf16.gmra.mrb[24].mxu0 %v7025_v11  ;;  %5596 = vmatmul.mubr.bf16.gmra.mrb[28].mxu1 %v7042_v41  ;;  %v7050_v28 = vld [vmem:[%s10264_s0 + $0x28c] ss:$36 sps:$4 sm:$0xff]  }
 0x52c   :  { %3419 = vrot.lane.b32.xlu1 %v9512_v2, %s7229_s6  ;;  %3429 = vrot.lane.b32.xlu0 %v9259_v32, %s7229_s6  ;;  %v7036_v32 = vld [vmem:[%s10264_s0 + $0x1c] ss:$36 sps:$4 sm:$0xff]  }
 0x52d   :  { %6090 = vmatprep.subr.bf16.mxu0 %v4215_v26  ;;  %5981 = vmatprep.mubr.bf16.mxu0 %v7028_v33  ;;  %v4273_v33 = vld [vmem:[#allocation2 + $0x68] sm:$0xff] }
 0x52e   :  { %v4170_v42 = vpop.permute.xlu1 %4169  ;;  %v4186_v52 = vpop.permute.xlu0 %4185  ;;  %5605 = vmatprep.mubr.bf16.mxu1 %v7044_v53 }
 0x52f   :  { %v4214_v39 = vsel %vm4211_vm5, %v4170_v42, %v4172_v20  ;;  %v4276_v20 = vld [vmem:[#allocation2 + $0x80] sm:$0xff] }
 0x530   :  { %3423 = vrot.lane.b32.xlu1 %v9269_v38, %s7229_s6  ;;  %3427 = vrot.lane.b32.xlu0 %v9271_v8, %s7229_s6  ;;  %v4216_v38 = vsel %vm4211_vm5, %v4176_v21, %v4178_v31  ;;  %v7060_v21 = vld [vmem:[%s10264_s0 + $0x2d0] ss:$36 sps:$4 sm:$0xff]   ;;  %v4315_v42 = vpack.c.bf16 %v4276_v20, %v4273_v33  ;;  %v4284_v33 = vld [vmem:[#allocation2 + $0xc0] sm:$0xff]  ;;  %v4287_v20 = vld [vmem:[#allocation2 + $0xd8] sm:$0xff] }
 0x531   :  { %6091 = vmatpush1.bf16.msra.mxu0 %v4214_v39 }
 0x532   :  { %v4180_v6 = vpop.permute.xlu1 %4179  ;;  %v4190_v23 = vpop.permute.xlu0 %4189 }
 0x533   :  { %v4217_v3 = vsel %vm4211_vm5, %v4178_v31, %v4180_v6  ;;  %5982 = vmatmul.mubr.bf16.gmra.mrb[28].mxu0 %v7031_v34  ;;  %5606 = vmatmul.mubr.bf16.gmra.mrb[32].mxu1 %v7048_v4  ;;  %v4267_v34 = vld [vmem:[#allocation2 + $0x38] sm:$0xff]  ;;  %v4270_v4 = vld [vmem:[#allocation2 + $0x50] sm:$0xff] }
 0x534   :  { %3421 = vrot.lane.b32.xlu1 %v9281_v25, %s7229_s6  ;;  %3437 = vrot.lane.b32.xlu0 %v9512_v2, %s7229_s6  ;;  %v7056_v25 = vld [vmem:[%s10264_s0 + $0x2d4] ss:$36 sps:$4 sm:$0xff]  }
 0x535   :  { %6092 = vmatprep.subr.bf16.mxu0 %v4217_v3  ;;  %6104 = vmatprep.mubr.bf16.mxu0 %v7036_v32 }
 0x536   :  { %6093 = vmatpush1.bf16.msra.mxu0 %v4216_v38  ;;  %v4184_v8 = vpop.permute.xlu1 %4183  ;;  %v4188_v47 = vpop.permute.xlu0 %4187  ;;  %5615 = vmatprep.mubr.bf16.mxu1 %v7050_v28  ;;  %v7066_v38 = vld [vmem:[%s10264_s0 + $0x318] ss:$36 sps:$4 sm:$0xff]  }
 0x537   :  { %v4219_v45 = vsel %vm4211_vm5, %v4184_v8, %v4186_v52  ;;  %v4272_v52 = vld [vmem:[#allocation2 + $0x60] sm:$0xff] }
 0x538   :  { %3431 = vrot.lane.b32.xlu1 %v9512_v2, %s7229_s6  ;;  %4358 = vrot.lane.b32.xlu0 %v9289_v37, %s7230_s23 }
 0x539   :  { %6094 = vmatprep.subr.bf16.mxu0 %v4219_v45 }
 0x53a   :  { %v4182_v31 = vpop.permute.xlu1 %4181  ;;  %v4198_v11 = vpop.permute.xlu0 %4197 }
 0x53b   :  { %v4218_v41 = vsel %vm4211_vm5, %v4182_v31, %v4184_v8  ;;  %5616 = vmatmul.mubr.bf16.gmra.mrb[36].mxu1 %v7054_v14  ;;  %v7068_v8 = vld [vmem:[%s10264_s0 + $0x364] ss:$36 sps:$4 sm:$0xff]  }
 0x53c   :  { %3435 = vrot.lane.b32.xlu1 %v9299_v48, %s7229_s6  ;;  %4356 = vrot.lane.b32.xlu0 %v9301_v62, %s7230_s23  ;;  %v4220_v48 = vsel %vm4211_vm5, %v4188_v47, %v4190_v23  ;;  %v7062_v62 = vld [vmem:[%s10264_s0 + $0x31c] ss:$36 sps:$4 sm:$0xff]  }
 0x53d   :  { %6095 = vmatpush1.bf16.msra.mxu0 %v4218_v41  ;;  %5625 = vmatprep.mubr.bf16.mxu1 %v7056_v25  ;;  %v4285_v25 = vld [vmem:[#allocation2 + $0xc8] sm:$0xff]  ;;  %v4288_v31 = vld [vmem:[#allocation2 + $0xe0] sm:$0xff] }
 0x53e   :  { %v4192_v55 = vpop.permute.xlu1 %4191  ;;  %v4202_v37 = vpop.permute.xlu0 %4201 }
 0x53f   :  { %v4221_v36 = vsel %vm4211_vm5, %v4190_v23, %v4192_v55  ;;  %v4312_v23 = vpack.c.bf16 %v4270_v4, %v4267_v34  ;;  %v4278_v34 = vld [vmem:[#allocation2 + $0x90] sm:$0xff]  ;;  %v4281_v4 = vld [vmem:[#allocation2 + $0xa8] sm:$0xff] }
 0x540   :  { %3433 = vrot.lane.b32.xlu1 %v9311_v24, %s7229_s6  ;;  %4366 = vrot.lane.b32.xlu0 %v9512_v2, %s7230_s23  ;;  %v4275_v24 = vld [vmem:[#allocation2 + $0x78] sm:$0xff] }
 0x541   :  { %6096 = vmatprep.subr.bf16.mxu0 %v4221_v36  ;;  %v4314_v28 = vpack.c.bf16 %v4275_v24, %v4272_v52  ;;  %v4321_v36 = vpack.c.bf16 %v4288_v31, %v4285_v25  ;;  %v4320_v52 = vpack.c.bf16 %v4287_v20, %v4284_v33  ;;  %v7034_v24 = vld [vmem:[%s10264_s0 + $0x18] ss:$36 sps:$4 sm:$0xff]  }
 0x542   :  { %6097 = vmatpush1.bf16.msra.mxu0 %v4220_v48  ;;  %v4196_v53 = vpop.permute.xlu1 %4195  ;;  %v4200_v26 = vpop.permute.xlu0 %4199  ;;  %v4279_v48 = vld [vmem:[#allocation2 + $0x98] sm:$0xff] }
 0x543   :  { %v4223_v39 = vsel %vm4211_vm5, %v4196_v53, %v4198_v11  ;;  %5626 = vmatmul.mubr.bf16.gmra.mrb[40].mxu1 %v7060_v21  ;;  %v4224_v11 = vsel %vm4211_vm5, %v4200_v26, %v4202_v37  ;;  %v7080_v25 = vld [vmem:[%s10264_s0 + $0x3f4] ss:$36 sps:$4 sm:$0xff]  }
 0x544   :  { %4360 = vrot.lane.b32.xlu1 %v9512_v2, %s7230_s23  ;;  %4370 = vrot.lane.b32.xlu0 %v4315_v42, %s7230_s23  ;;  %v4291_v20 = vld [vmem:[#allocation2 + $0xf8] sm:$0xff] }
 0x545   :  { %6098 = vmatprep.subr.bf16.mxu0 %v4223_v39  ;;  %5635 = vmatprep.mubr.bf16.mxu1 %v7062_v62  ;;  %v4282_v62 = vld [vmem:[#allocation2 + $0xb0] sm:$0xff] }
 0x546   :  { %v4194_v32 = vpop.permute.xlu1 %4193  ;;  %v4210_v6 = vpop.permute.xlu0 %4209  ;;  %v4318_v42 = vpack.c.bf16 %v4282_v62, %v4279_v48  ;;  %v4299_v48 = vld [vmem:[#allocation2 + $0x138] sm:$0xff] }
 0x547   :  { %v4222_v3 = vsel %vm4211_vm5, %v4194_v32, %v4196_v53 }
 0x548   :  { %4364 = vrot.lane.b32.xlu1 %v4312_v23, %s7230_s23  ;;  %4368 = vrot.lane.b32.xlu0 %v4314_v28, %s7230_s23  ;;  %v4317_v23 = vpack.c.bf16 %v4281_v4, %v4278_v34  ;;  %v7040_v28 = vld [vmem:[%s10264_s0 + $0x64] ss:$36 sps:$4 sm:$0xff]  }
 0x549   :  { %6099 = vmatpush1.bf16.msra.mxu0 %v4222_v3 }
 0x54a   :  { %v4204_v47 = vpop.permute.xlu1 %4203  ;;  %v3201_v45 = vpop.permute.xlu0 %3200 }
 0x54b   :  { %v4225_v14 = vsel %vm4211_vm5, %v4202_v37, %v4204_v47  ;;  %5636 = vmatmul.mubr.bf16.gmra.mrb[44].mxu1 %v7066_v38  ;;  %v7074_v37 = vld [vmem:[%s10264_s0 + $0x3ac] ss:$36 sps:$4 sm:$0xff]  }
 0x54c   :  { %4362 = vrot.lane.b32.xlu1 %v9468_v43, %s7230_s23  ;;  %4378 = vrot.lane.b32.xlu0 %v9512_v2, %s7230_s23  ;;  %v7072_v43 = vld [vmem:[%s10264_s0 + $0x360] ss:$36 sps:$4 sm:$0xff]   ;;  %v4297_v38 = vld [vmem:[#allocation2 + $0x128] sm:$0xff] }
 0x54d   :  { %6100 = vmatprep.subr.bf16.mxu0 %v4225_v14  ;;  %5645 = vmatprep.mubr.bf16.mxu1 %v7068_v8  ;;  %v4300_v8 = vld [vmem:[#allocation2 + $0x140] sm:$0xff]  ;;  %v7078_v47 = vld [vmem:[%s10264_s0 + $0x3a8] ss:$36 sps:$4 sm:$0xff]  }
 0x54e   :  { %6101 = vmatpush1.bf16.msra.mxu0 %v4224_v11  ;;  %v4208_v41 = vpop.permute.xlu1 %4207  ;;  %v3199_v55 = vpop.permute.xlu0 %3198 }
 0x54f   :  { %v4227_v21 = vsel %vm4211_vm5, %v4208_v41, %v4210_v6  ;;  %v3247_v14 = vsel %vm3246_vm6, %v3199_v55, %v3201_v45 }
 0x550   :  { %4372 = vrot.lane.b32.xlu1 %v9512_v2, %s7230_s23  ;;  %4382 = vrot.lane.b32.xlu0 %v4321_v36, %s7230_s23  ;;  %v4296_v36 = vld [vmem:[#allocation2 + $0x120] sm:$0xff] }
 0x551   :  { %6102 = vmatprep.subr.bf16.mxu0 %v4227_v21  ;;  %v4294_v21 = vld [vmem:[#allocation2 + $0x110] sm:$0xff] }
 0x552   :  { %v4206_v53 = vpop.permute.xlu1 %4205  ;;  %v3209_v26 = vpop.permute.xlu0 %3208 }
 0x553   :  { %v4226_v39 = vsel %vm4211_vm5, %v4206_v53, %v4208_v41  ;;  %5646 = vmatmul.mubr.bf16.gmra.mrb[48].mxu1 %v7072_v43  ;;  %v4327_v41 = vpack.c.bf16 %v4300_v8, %v4297_v38  ;;  %v4324_v43 = vpack.c.bf16 %v4294_v21, %v4291_v20  ;;  %v7046_v53 = vld [vmem:[%s10264_s0 + $0xac] ss:$36 sps:$4 sm:$0xff]  }
 0x554   :  { %4376 = vrot.lane.b32.xlu1 %v4318_v42, %s7230_s23  ;;  %4380 = vrot.lane.b32.xlu0 %v4320_v52, %s7230_s23  ;;  %v4290_v42 = vld [vmem:[#allocation2 + $0xf0] sm:$0xff]  ;;  %v4293_v52 = vld [vmem:[#allocation2 + $0x108] sm:$0xff] }
 0x555   :  { %6103 = vmatpush1.bf16.msra.mxu0 %v4226_v39  ;;  %5655 = vmatprep.mubr.bf16.mxu1 %v7074_v37  ;;  %v4326_v37 = vpack.c.bf16 %v4299_v48, %v4296_v36  ;;  %v7084_v39 = vld [vmem:[%s10264_s0 + $0x3f0] ss:$36 sps:$4 sm:$0xff]   ;;  %v4305_v48 = vld [vmem:[#allocation2 + $0x168] sm:$0xff] }
 0x556   :  { %v3203_v32 = vpop.permute.xlu1 %3202  ;;  %v3213_v6 = vpop.permute.xlu0 %3212  ;;  %v4302_v21 = vld [vmem:[#allocation2 + $0x150] sm:$0xff] }
 0x557   :  { %v3248_v3 = vsel %vm3246_vm6, %v3201_v45, %v3203_v32  ;;  %v7043_v45 = vld [vmem:[%s10264_s0 + $0x60] ss:$36 sps:$4 sm:$0xff]  }
 0x558   :  { %4374 = vrot.lane.b32.xlu1 %v4317_v23, %s7230_s23  ;;  %4390 = vrot.lane.b32.xlu0 %v9512_v2, %s7230_s23  ;;  %v7086_v32 = vld [vmem:[%s10264_s0 + $0x43c] ss:$36 sps:$4 sm:$0xff]  }
 0x559   :  { %5686 = vmatprep.subr.bf16.mxu1 %v3248_v3  ;;  %6105 = vmatmul.mubr.bf16.vlgmr.msra.gmra.mrb[0].mxu0 %v7034_v24  ;;  %v4323_v24 = vpack.c.bf16 %v4293_v52, %v4290_v42  ;;  %v7049_v3 = vld [vmem:[%s10264_s0 + $0xa8] ss:$36 sps:$4 sm:$0xff]  }
 0x55a   :  { %5687 = vmatpush1.bf16.msra.mxu1 %v3247_v14  ;;  %v3207_v31 = vpop.permute.xlu1 %3206  ;;  %v3211_v11 = vpop.permute.xlu0 %3210  ;;  %6114 = vmatprep.mubr.bf16.mxu0 %v7040_v28  ;;  %v4303_v14 = vld [vmem:[#allocation2 + $0x158] sm:$0xff] }
 0x55b   :  { %v3250_v33 = vsel %vm3246_vm6, %v3207_v31, %v3209_v26  ;;  %5656 = vmatmul.mubr.bf16.gmra.mrb[52].mxu1 %v7078_v47  ;;  %v3251_v28 = vsel %vm3246_vm6, %v3211_v11, %v3213_v6  ;;  %v7052_v47 = vld [vmem:[%s10264_s0 + $0xf4] ss:$36 sps:$4 sm:$0xff]   ;;  %v7094_v11 = vld [vmem:[%s10264_s0 + $0xc] ss:$36 sps:$4 sm:$0xff]  }
 0x55c   :  { %4384 = vrot.lane.b32.xlu1 %v9512_v2, %s7230_s23  ;;  %4394 = vrot.lane.b32.xlu0 %v4327_v41, %s7230_s23 }
 0x55d   :  { %5688 = vmatprep.subr.bf16.mxu1 %v3250_v33  ;;  %5665 = vmatprep.mubr.bf16.mxu1 %v7080_v25  ;;  %v4306_v25 = vld [vmem:[#allocation2 + $0x170] sm:$0xff] }
 0x55e   :  { %v3205_v55 = vpop.permute.xlu1 %3204  ;;  %v3221_v62 = vpop.permute.xlu0 %3220  ;;  %v4330_v33 = vpack.c.bf16 %v4306_v25, %v4303_v14  ;;  %v7070_v14 = vld [vmem:[%s10264_s0 + $0x1cc] ss:$36 sps:$4 sm:$0xff]  }
 0x55f   :  { %v3249_v26 = vsel %vm3246_vm6, %v3205_v55, %v3207_v31  ;;  %v7090_v31 = vld [vmem:[%s10264_s0 + $0x438] ss:$36 sps:$4 sm:$0xff]  }
 0x560   :  { %4388 = vrot.lane.b32.xlu1 %v4324_v43, %s7230_s23  ;;  %4392 = vrot.lane.b32.xlu0 %v4326_v37, %s7230_s23  ;;  %v7058_v43 = vld [vmem:[%s10264_s0 + $0x13c] ss:$36 sps:$4 sm:$0xff]  }
 0x561   :  { %5689 = vmatpush1.bf16.msra.mxu1 %v3249_v26  ;;  %6115 = vmatmul.mubr.bf16.gmra.mrb[4].mxu0 %v7043_v45 }
 0x562   :  { %v3215_v34 = vpop.permute.xlu1 %3214  ;;  %v3225_v4 = vpop.permute.xlu0 %3224  ;;  %6124 = vmatprep.mubr.bf16.mxu0 %v7046_v53 }
 0x563   :  { %v3252_v23 = vsel %vm3246_vm6, %v3213_v6, %v3215_v34  ;;  %5666 = vmatmul.mubr.bf16.gmra.mrb[56].mxu1 %v7084_v39  ;;  %v7061_v39 = vld [vmem:[%s10264_s0 + $0x138] ss:$36 sps:$4 sm:$0xff]  }
 0x564   :  { %4386 = vrot.lane.b32.xlu1 %v4323_v24, %s7230_s23  ;;  %5690 = vmatprep.subr.bf16.mxu1 %v3252_v23 }
 0x565   :  { %5691 = vmatpush1.bf16.msra.mxu1 %v3251_v28  ;;  %4402 = vrot.lane.b32.xlu0 %v9512_v2, %s7230_s23 }
 0x566   :  { %v3219_v38 = vpop.permute.xlu1 %3218  ;;  %v3223_v8 = vpop.permute.xlu0 %3222  ;;  %5675 = vmatprep.mubr.bf16.mxu1 %v7086_v32 }
 0x567   :  { %v3254_v6 = vsel %vm3246_vm6, %v3219_v38, %v3221_v62  ;;  %v4329_v62 = vpack.c.bf16 %v4305_v48, %v4302_v21  ;;  %v3255_v53 = vsel %vm3246_vm6, %v3223_v8, %v3225_v4  ;;  %v7067_v8 = vld [vmem:[%s10264_s0 + $0x180] ss:$36 sps:$4 sm:$0xff]   ;;  %v7076_v21 = vld [vmem:[%s10264_s0 + $0x214] ss:$36 sps:$4 sm:$0xff]  }
 0x568   :  { %4396 = vrot.lane.b32.xlu1 %v9512_v2, %s7230_s23  ;;  %5692 = vmatprep.subr.bf16.mxu1 %v3254_v6  ;;  %v7055_v2 = vld [vmem:[%s10264_s0 + $0xf0] ss:$36 sps:$4 sm:$0xff]  }
 0x569   :  { %6125 = vmatmul.mubr.bf16.gmra.mrb[8].mxu0 %v7049_v3 }
 0x56a   :  { %v3217_v41 = vpop.permute.xlu1 %3216  ;;  %v3233_v36 = vpop.permute.xlu0 %3232  ;;  %6134 = vmatprep.mubr.bf16.mxu0 %v7052_v47 }
 0x56b   :  { %v3253_v20 = vsel %vm3246_vm6, %v3217_v41, %v3219_v38  ;;  %5676 = vmatmul.mubr.bf16.gmra.mrb[60].mxu1 %v7090_v31 }
 0x56c   :  { %4400 = vrot.lane.b32.xlu1 %v4330_v33, %s7230_s23  ;;  %5693 = vmatpush1.bf16.msra.mxu1 %v3253_v20 }
 0x56d   :  { %5718 = vmatprep.mubr.bf16.mxu1 %v7094_v11 }
 0x56e   :  { %v3227_v45 = vpop.permute.xlu1 %3226  ;;  %v3237_v55 = vpop.permute.xlu0 %3236 }
 0x56f   :  { %v3256_v37 = vsel %vm3246_vm6, %v3225_v4, %v3227_v45  ;;  %v7064_v4 = vld [vmem:[%s10264_s0 + $0x184] ss:$36 sps:$4 sm:$0xff]  }
 0x570   :  { %4398 = vrot.lane.b32.xlu1 %v4329_v62, %s7230_s23  ;;  %5694 = vmatprep.subr.bf16.mxu1 %v3256_v37 }
 0x571   :  { %5695 = vmatpush1.bf16.msra.mxu1 %v3255_v53  ;;  %6135 = vmatmul.mubr.bf16.gmra.mrb[12].mxu0 %v7055_v2 }
 0x572   :  { %v3231_v26 = vpop.permute.xlu1 %3230  ;;  %v3235_v42 = vpop.permute.xlu0 %3234  ;;  %6144 = vmatprep.mubr.bf16.mxu0 %v7058_v43  ;;  %v7079_v43 = vld [vmem:[%s10264_s0 + $0x210] ss:$36 sps:$4 sm:$0xff]  }
 0x573   :  { %v3258_v52 = vsel %vm3246_vm6, %v3231_v26, %v3233_v36  ;;  %v3259_v38 = vsel %vm3246_vm6, %v3235_v42, %v3237_v55  ;;  %v7073_v36 = vld [vmem:[%s10264_s0 + $0x1c8] ss:$36 sps:$4 sm:$0xff]  }
 0x574   :  { %5696 = vmatprep.subr.bf16.mxu1 %v3258_v52 }
 0x576   :  { %v3229_v34 = vpop.permute.xlu1 %3228  ;;  %v3245_v24 = vpop.permute.xlu0 %3244 }
 0x577   :  { %v3257_v32 = vsel %vm3246_vm6, %v3229_v34, %v3231_v26  ;;  %v7082_v26 = vld [vmem:[%s10264_s0 + $0x25c] ss:$36 sps:$4 sm:$0xff]  }
 0x578   :  { %5697 = vmatpush1.bf16.msra.mxu1 %v3257_v32 }
 0x579   :  { %6145 = vmatmul.mubr.bf16.gmra.mrb[16].mxu0 %v7061_v39 }
 0x57a   :  { %v3239_v23 = vpop.permute.xlu1 %3238  ;;  %v3394_v28 = vpop.permute.xlu0 %3393  ;;  %6154 = vmatprep.mubr.bf16.mxu0 %v7064_v4  ;;  %v7085_v4 = vld [vmem:[%s10264_s0 + $0x258] ss:$36 sps:$4 sm:$0xff]  }
 0x57b   :  { %v3260_v3 = vsel %vm3246_vm6, %v3237_v55, %v3239_v23 }
 0x57c   :  { %5698 = vmatprep.subr.bf16.mxu1 %v3260_v3 }
 0x57d   :  { %5699 = vmatpush1.bf16.msra.mxu1 %v3259_v38 }
 0x57e   :  { %v3243_v47 = vpop.permute.xlu1 %3242  ;;  %v3392_v6 = vpop.permute.xlu0 %3391 }
 0x57f   :  { %v3262_v25 = vsel %vm3246_vm6, %v3243_v47, %v3245_v24  ;;  %v3440_v2 = vsel %vm3439_vm7, %v3392_v6, %v3394_v28  ;;  %v7091_v6 = vld [vmem:[%s10264_s0 + $0x2a0] ss:$36 sps:$4 sm:$0xff]  }
 0x580   :  { %5700 = vmatprep.subr.bf16.mxu1 %v3262_v25 }
 0x581   :  { %6155 = vmatmul.mubr.bf16.gmra.mrb[20].mxu0 %v7067_v8 }
 0x582   :  { %v3241_v31 = vpop.permute.xlu1 %3240  ;;  %v3402_v11 = vpop.permute.xlu0 %3401  ;;  %6164 = vmatprep.mubr.bf16.mxu0 %v7070_v14 }
 0x583   :  { %v3261_v41 = vsel %vm3246_vm6, %v3241_v31, %v3243_v47  ;;  %v7095_v31 = vld [vmem:[%s10264_s0 + $0x2ec] ss:$36 sps:$4 sm:$0xff]  }
 0x584   :  { %5701 = vmatpush1.bf16.msra.mxu1 %v3261_v41 }
 0x586   :  { %v3396_v33 = vpop.permute.xlu1 %3395  ;;  %v3406_v20 = vpop.permute.xlu0 %3405 }
 0x587   :  { %v3441_v48 = vsel %vm3439_vm7, %v3394_v28, %v3396_v33  ;;  %v7088_v28 = vld [vmem:[%s10264_s0 + $0x2a4] ss:$36 sps:$4 sm:$0xff]  }
 0x588   :  { %5702 = vmatprep.subr.bf16.mxu1 %v3441_v48 }
 0x589   :  { %5703 = vmatpush1.bf16.msra.mxu1 %v3440_v2  ;;  %6165 = vmatmul.mubr.bf16.gmra.mrb[24].mxu0 %v7073_v36 }
 0x58a   :  { %v3400_v45 = vpop.permute.xlu1 %3399  ;;  %v3404_v55 = vpop.permute.xlu0 %3403  ;;  %6174 = vmatprep.mubr.bf16.mxu0 %v7076_v21  ;;  %v7097_v21 = vld [vmem:[%s10264_s0 + $0x2e8] ss:$36 sps:$4 sm:$0xff]  }
 0x58b   :  { %v3443_v62 = vsel %vm3439_vm7, %v3400_v45, %v3402_v11  ;;  %v3444_v24 = vsel %vm3439_vm7, %v3404_v55, %v3406_v20 }
 0x58c   :  { %5704 = vmatprep.subr.bf16.mxu1 %v3443_v62 }
 0x58e   :  { %v3398_v37 = vpop.permute.xlu1 %3397  ;;  %v3414_v53 = vpop.permute.xlu0 %3413 }
 0x58f   :  { %v3442_v42 = vsel %vm3439_vm7, %v3398_v37, %v3400_v45  ;;  %v7100_v45 = vld [vmem:[%s10264_s0 + $0x334] ss:$36 sps:$4 sm:$0xff]  }
 0x590   :  { %5705 = vmatpush1.bf16.msra.mxu1 %v3442_v42 }
 0x591   :  { %6175 = vmatmul.mubr.bf16.gmra.mrb[28].mxu0 %v7079_v43 }
 0x592   :  { %v3408_v52 = vpop.permute.xlu1 %3407  ;;  %v3418_v39 = vpop.permute.xlu0 %3417  ;;  %6184 = vmatprep.mubr.bf16.mxu0 %v7082_v26  ;;  %v7103_v26 = vld [vmem:[%s10264_s0 + $0x330] ss:$36 sps:$4 sm:$0xff]  }
 0x593   :  { %v3445_v34 = vsel %vm3439_vm7, %v3406_v20, %v3408_v52 }
 0x594   :  { %5706 = vmatprep.subr.bf16.mxu1 %v3445_v34 }
 0x595   :  { %5707 = vmatpush1.bf16.msra.mxu1 %v3444_v24 }
 0x596   :  { %v3412_v32 = vpop.permute.xlu1 %3411  ;;  %v3416_v23 = vpop.permute.xlu0 %3415 }
 0x597   :  { %v3447_v3 = vsel %vm3439_vm7, %v3412_v32, %v3414_v53  ;;  %v3448_v41 = vsel %vm3439_vm7, %v3416_v23, %v3418_v39  ;;  %v7092_v23 = vld [vmem:[%s10264_s0 + $0x8] ss:$36 sps:$4 sm:$0xff]  }
 0x598   :  { %5708 = vmatprep.subr.bf16.mxu1 %v3447_v3 }
 0x599   :  { %6185 = vmatmul.mubr.bf16.gmra.mrb[32].mxu0 %v7085_v4 }
 0x59a   :  { %v3410_v38 = vpop.permute.xlu1 %3409  ;;  %v3426_v8 = vpop.permute.xlu0 %3425  ;;  %6194 = vmatprep.mubr.bf16.mxu0 %v7088_v28 }
 0x59b   :  { %v3446_v47 = vsel %vm3439_vm7, %v3410_v38, %v3412_v32  ;;  %v7098_v38 = vld [vmem:[%s10264_s0 + $0x54] ss:$36 sps:$4 sm:$0xff]  }
 0x59c   :  { %5709 = vmatpush1.bf16.msra.mxu1 %v3446_v47 }
 0x59e   :  { %v3420_v14 = vpop.permute.xlu1 %3419  ;;  %v3430_v25 = vpop.permute.xlu0 %3429 }
 0x59f   :  { %v3449_v11 = vsel %vm3439_vm7, %v3418_v39, %v3420_v14  ;;  %v7106_v39 = vld [vmem:[%s10264_s0 + $0x37c] ss:$36 sps:$4 sm:$0xff]  }
 0x5a0   :  { %5710 = vmatprep.subr.bf16.mxu1 %v3449_v11  ;;  %v7102_v11 = vld [vmem:[%s10264_s0 + $0x50] ss:$36 sps:$4 sm:$0xff]  }
 0x5a1   :  { %5711 = vmatpush1.bf16.msra.mxu1 %v3448_v41  ;;  %6195 = vmatmul.mubr.bf16.gmra.mrb[36].mxu0 %v7091_v6  ;;  %v7112_v6 = vld [vmem:[%s10264_s0 + $0x3c4] ss:$36 sps:$4 sm:$0xff]  }
 0x5a2   :  { %v3424_v36 = vpop.permute.xlu1 %3423  ;;  %v3428_v33 = vpop.permute.xlu0 %3427  ;;  %6204 = vmatprep.mubr.bf16.mxu0 %v7095_v31 }
 0x5a3   :  { %v3451_v20 = vsel %vm3439_vm7, %v3424_v36, %v3426_v8  ;;  %v3452_v53 = vsel %vm3439_vm7, %v3428_v33, %v3430_v25  ;;  %v7109_v8 = vld [vmem:[%s10264_s0 + $0x378] ss:$36 sps:$4 sm:$0xff]  }
 0x5a4   :  { %5712 = vmatprep.subr.bf16.mxu1 %v3451_v20 }
 0x5a6   :  { %v3422_v48 = vpop.permute.xlu1 %3421  ;;  %v3438_v2 = vpop.permute.xlu0 %3437 }
 0x5a7   :  { %v3450_v55 = vsel %vm3439_vm7, %v3422_v48, %v3424_v36  ;;  %v7115_v36 = vld [vmem:[%s10264_s0 + $0x3c0] ss:$36 sps:$4 sm:$0xff]   ;;  %v7108_v48 = vld [vmem:[%s10264_s0 + $0x98] ss:$36 sps:$4 sm:$0xff]  }
 0x5a8   :  { %5713 = vmatpush1.bf16.msra.mxu1 %v3450_v55  ;;  %v7121_v55 = vld [vmem:[%s10264_s0 + $0x408] ss:$36 sps:$4 sm:$0xff]  }
 0x5a9   :  { %6205 = vmatmul.mubr.bf16.gmra.mrb[40].mxu0 %v7097_v21 }
 0x5aa   :  { %v3432_v62 = vpop.permute.xlu1 %3431  ;;  %v4359_v43 = vpop.permute.xlu0 %4358  ;;  %6214 = vmatprep.mubr.bf16.mxu0 %v7100_v45 }
 0x5ab   :  { %v3453_v37 = vsel %vm3439_vm7, %v3430_v25, %v3432_v62 }
 0x5ac   :  { %5714 = vmatprep.subr.bf16.mxu1 %v3453_v37  ;;  %v7114_v37 = vld [vmem:[%s10264_s0 + $0xe0] ss:$36 sps:$4 sm:$0xff]  }
 0x5ad   :  { %5715 = vmatpush1.bf16.msra.mxu1 %v3452_v53 }
 0x5ae   :  { %v3436_v42 = vpop.permute.xlu1 %3435  ;;  %v4357_v52 = vpop.permute.xlu0 %4356 }
 0x5af   :  { %v3455_v34 = vsel %vm3439_vm7, %v3436_v42, %v3438_v2  ;;  %v4405_v14 = vsel %vm4404_vm8, %v4357_v52, %v4359_v43 }
 0x5b0   :  { %5716 = vmatprep.subr.bf16.mxu1 %v3455_v34  ;;  %v7120_v34 = vld [vmem:[%s10264_s0 + $0x128] ss:$36 sps:$4 sm:$0xff]  }
 0x5b1   :  { %6215 = vmatmul.mubr.bf16.gmra.mrb[44].mxu0 %v7103_v26  ;;  %v7127_v26 = vld [vmem:[%s10264_s0 + $0x450] ss:$36 sps:$4 sm:$0xff]  }
 0x5b2   :  { %v3434_v24 = vpop.permute.xlu1 %3433  ;;  %v4367_v4 = vpop.permute.xlu0 %4366  ;;  %6224 = vmatprep.mubr.bf16.mxu0 %v7106_v39 }
 0x5b3   :  { %v3454_v32 = vsel %vm3439_vm7, %v3434_v24, %v3436_v42  ;;  %v7231_v24 = vmov 0  }
 0x5b4   :  { %5717 = vmatpush1.bf16.msra.mxu1 %v3454_v32 }
 0x5b5   :  { %6670 = vmatprep.subr.bf16.mxu1 %v8944_v22 }
 0x5b6   :  { %v4361_v28 = vpop.permute.xlu1 %4360  ;;  %v4371_v3 = vpop.permute.xlu0 %4370 }
 0x5b7   :  { %5719 = vmatmul.mubr.bf16.vlgmr.msra.gmra.mrb[0].mxu1 %v7092_v23  ;;  %v4406_v47 = vsel %vm4404_vm8, %v4359_v43, %v4361_v28 }
 0x5b8   :  { %6686 = vmatpush1.bf16.msra.mxu1 %v8952_v30  ;;  %6265 = vmatprep.subr.bf16.mxu0 %v4406_v47  ;;  %v7104_v30 = vld [vmem:[%s10264_s0 + $0x9c] ss:$36 sps:$4 sm:$0xff]  }
 0x5b9   :  { %6671 = vmatprep.subr.bf16.mxu1 %v8966_v49  ;;  %6266 = vmatpush1.bf16.msra.mxu0 %v4405_v14  ;;  %v7131_v47 = vld [vmem:[%s10264_s0 + $0x20] ss:$36 sps:$4 sm:$0xff]  }
 0x5ba   :  { %v4365_v22 = vpop.permute.xlu1 %4364  ;;  %v4369_v25 = vpop.permute.xlu0 %4368  ;;  %5728 = vmatprep.mubr.bf16.mxu1 %v7098_v38  ;;  %6225 = vmatmul.mubr.bf16.gmra.mrb[48].mxu0 %v7109_v8  ;;  %v7148_v14 = vld [vmem:[%s10264_s0 + $0x324] ss:$36 sps:$4 sm:$0xff]  }
 0x5bb   :  { %v4408_v31 = vsel %vm4404_vm8, %v4365_v22, %v4367_v4  ;;  %6234 = vmatprep.mubr.bf16.mxu0 %v7112_v6  ;;  %v4409_v2 = vsel %vm4404_vm8, %v4369_v25, %v4371_v3  ;;  %v7147_v6 = vld [vmem:[%s10264_s0 + $0x140] ss:$36 sps:$4 sm:$0xff]   ;;  %v7151_v25 = vld [vmem:[%s10264_s0 + $0x188] ss:$36 sps:$4 sm:$0xff]  }
 0x5bc   :  { %6687 = vmatpush1.bf16.msra.mxu1 %v8971_v54  ;;  %6267 = vmatprep.subr.bf16.mxu0 %v4408_v31  ;;  %v7118_v54 = vld [vmem:[%s10264_s0 + $0x40c] ss:$36 sps:$4 sm:$0xff]  }
 0x5bd   :  { %6672 = vmatprep.subr.bf16.mxu1 %v8980_v60  ;;  %v7152_v31 = vld [vmem:[%s10264_s0 + $0x36c] ss:$36 sps:$4 sm:$0xff]  }
 0x5be   :  { %v4363_v49 = vpop.permute.xlu1 %4362  ;;  %v4379_v41 = vpop.permute.xlu0 %4378 }
 0x5bf   :  { %v4407_v33 = vsel %vm4404_vm8, %v4363_v49, %v4365_v22  ;;  %5729 = vmatmul.mubr.bf16.gmra.mrb[4].mxu1 %v7102_v11  ;;  %v7150_v22 = vld [vmem:[%s10264_s0 + $0x320] ss:$36 sps:$4 sm:$0xff]   ;;  %v7154_v11 = vld [vmem:[%s10264_s0 + $0x368] ss:$36 sps:$4 sm:$0xff]   ;;  %v7156_v49 = vld [vmem:[%s10264_s0 + $0x3b4] ss:$36 sps:$4 sm:$0xff]  }
 0x5c0   :  { %6688 = vmatpush1.bf16.msra.mxu1 %v8988_v27  ;;  %6268 = vmatpush1.bf16.msra.mxu0 %v4407_v33  ;;  %v7110_v27 = vld [vmem:[%s10264_s0 + $0xe4] ss:$36 sps:$4 sm:$0xff]   ;;  %v7160_v33 = vld [vmem:[%s10264_s0 + $0x3fc] ss:$36 sps:$4 sm:$0xff]  }
 0x5c1   :  { %6673 = vmatprep.subr.bf16.mxu1 %v8996_v15  ;;  %5738 = vmatprep.mubr.bf16.mxu1 %v7104_v30  ;;  %v7155_v30 = vld [vmem:[%s10264_s0 + $0x1d0] ss:$36 sps:$4 sm:$0xff]  }
 0x5c2   :  { %v4373_v60 = vpop.permute.xlu1 %4372  ;;  %v4383_v20 = vpop.permute.xlu0 %4382  ;;  %6235 = vmatmul.mubr.bf16.gmra.mrb[52].mxu0 %v7115_v36  ;;  %v7159_v36 = vld [vmem:[%s10264_s0 + $0x218] ss:$36 sps:$4 sm:$0xff]  }
 0x5c3   :  { %v4410_v21 = vsel %vm4404_vm8, %v4371_v3, %v4373_v60  ;;  %6244 = vmatprep.mubr.bf16.mxu0 %v7118_v54  ;;  %v7162_v54 = vld [vmem:[%s10264_s0 + $0x3f8] ss:$36 sps:$4 sm:$0xff]   ;;  %v7163_v60 = vld [vmem:[%s10264_s0 + $0x260] ss:$36 sps:$4 sm:$0xff]  }
 0x5c4   :  { %6689 = vmatpush1.bf16.msra.mxu1 %v8999_v16  ;;  %6269 = vmatprep.subr.bf16.mxu0 %v4410_v21  ;;  %v7124_v16 = vld [vmem:[%s10264_s0 + $0x454] ss:$36 sps:$4 sm:$0xff]   ;;  %v7166_v21 = vld [vmem:[%s10264_s0 + $0x440] ss:$36 sps:$4 sm:$0xff]  }
 0x5c5   :  { %6674 = vmatprep.subr.bf16.mxu1 %v9018_v40  ;;  %6270 = vmatpush1.bf16.msra.mxu0 %v4409_v2  ;;  %v7170_v2 = vld [vmem:[%s10264_s0 + $0x254] ss:$36 sps:$4 sm:$0xff]  }
 0x5c6   :  { %v4377_v15 = vpop.permute.xlu1 %4376  ;;  %v4381_v45 = vpop.permute.xlu0 %4380 }
 0x5c7   :  { %5739 = vmatmul.mubr.bf16.gmra.mrb[8].mxu1 %v7108_v48  ;;  %v4412_v62 = vsel %vm4404_vm8, %v4377_v15, %v4379_v41  ;;  %v4413_v52 = vsel %vm4404_vm8, %v4381_v45, %v4383_v20  ;;  %v7158_v41 = vld [vmem:[%s10264_s0 + $0x3b0] ss:$36 sps:$4 sm:$0xff]   ;;  %v7167_v48 = vld [vmem:[%s10264_s0 + $0x2a8] ss:$36 sps:$4 sm:$0xff]   ;;  %v7172_v45 = vld [vmem:[%s10264_s0 + $0x29c] ss:$36 sps:$4 sm:$0xff]  }
 0x5c8   :  { %6690 = vmatpush1.bf16.msra.mxu1 %v9026_v18  ;;  %6271 = vmatprep.subr.bf16.mxu0 %v4412_v62  ;;  %v7175_v62 = vld [vmem:[%s10264_s0 + $0x338] ss:$36 sps:$4 sm:$0xff]  }
 0x5c9   :  { %6675 = vmatprep.subr.bf16.mxu1 %v9070_v56  ;;  %5748 = vmatprep.mubr.bf16.mxu1 %v7110_v27  ;;  %v7116_v56 = vld [vmem:[%s10264_s0 + $0x12c] ss:$36 sps:$4 sm:$0xff]  }
 0x5ca   :  { %v4375_v40 = vpop.permute.xlu1 %4374  ;;  %6245 = vmatmul.mubr.bf16.gmra.mrb[56].mxu0 %v7121_v55  ;;  %v4391_v53 = vpop.permute.xlu0 %4390  ;;  %v7168_v27 = vld [vmem:[%s10264_s0 + $0x250] ss:$36 sps:$4 sm:$0xff]   ;;  %v7174_v55 = vld [vmem:[%s10264_s0 + $0x298] ss:$36 sps:$4 sm:$0xff]  }
 0x5cb   :  { %v4411_v43 = vsel %vm4404_vm8, %v4375_v40, %v4377_v15  ;;  %6254 = vmatprep.mubr.bf16.mxu0 %v7124_v16  ;;  %v7171_v15 = vld [vmem:[%s10264_s0 + $0x2f0] ss:$36 sps:$4 sm:$0xff]   ;;  %v7176_v16 = vld [vmem:[%s10264_s0 + $0x2e4] ss:$36 sps:$4 sm:$0xff]  }
 0x5cc   :  { %6691 = vmatpush1.bf16.msra.mxu1 %v9078_v44  ;;  %6272 = vmatpush1.bf16.msra.mxu0 %v4411_v43  ;;  %v7178_v40 = vld [vmem:[%s10264_s0 + $0x2e0] ss:$36 sps:$4 sm:$0xff]  }
 0x5cd   :  { %6676 = vmatprep.subr.bf16.mxu1 %v9109_v0  ;;  %v7179_v43 = vld [vmem:[%s10264_s0 + $0x380] ss:$36 sps:$4 sm:$0xff]  }
 0x5ce   :  { %v4385_v18 = vpop.permute.xlu1 %4384  ;;  %v4395_v44 = vpop.permute.xlu0 %4394 }
 0x5cf   :  { %5749 = vmatmul.mubr.bf16.gmra.mrb[12].mxu1 %v7114_v37  ;;  %v4414_v42 = vsel %vm4404_vm8, %v4383_v20, %v4385_v18  ;;  %v7164_v20 = vld [vmem:[%s10264_s0 + $0x444] ss:$36 sps:$4 sm:$0xff]   ;;  %v7180_v37 = vld [vmem:[%s10264_s0 + $0x32c] ss:$36 sps:$4 sm:$0xff]  }
 0x5d0   :  { %6692 = vmatpush1.bf16.msra.mxu1 %v9119_v12  ;;  %6273 = vmatprep.subr.bf16.mxu0 %v4414_v42  ;;  %v7122_v12 = vld [vmem:[%s10264_s0 + $0x174] ss:$36 sps:$4 sm:$0xff]   ;;  %v7183_v18 = vld [vmem:[%s10264_s0 + $0x3c8] ss:$36 sps:$4 sm:$0xff]  }
 0x5d1   :  { %6677 = vmatprep.subr.bf16.mxu1 %v9139_v29  ;;  %6274 = vmatpush1.bf16.msra.mxu0 %v4413_v52  ;;  %v7187_v42 = vld [vmem:[%s10264_s0 + $0x410] ss:$36 sps:$4 sm:$0xff]   ;;  %v7188_v52 = vld [vmem:[%s10264_s0 + $0x3bc] ss:$36 sps:$4 sm:$0xff]  }
 0x5d2   :  { %v4389_v0 = vpop.permute.xlu1 %4388  ;;  %5758 = vmatprep.mubr.bf16.mxu1 %v7116_v56  ;;  %6255 = vmatmul.mubr.bf16.gmra.mrb[60].mxu0 %v7127_v26  ;;  %v4393_v32 = vpop.permute.xlu0 %4392  ;;  %v7184_v56 = vld [vmem:[%s10264_s0 + $0x374] ss:$36 sps:$4 sm:$0xff]  }
 0x5d3   :  { %v4416_v39 = vsel %vm4404_vm8, %v4389_v0, %v4391_v53  ;;  %6297 = vmatprep.mubr.bf16.mxu0 %v7231_v24  ;;  %v4417_v28 = vsel %vm4404_vm8, %v4393_v32, %v4395_v44  ;;  %v7182_v53 = vld [vmem:[%s10264_s0 + $0x328] ss:$36 sps:$4 sm:$0xff]   ;;  %v7186_v26 = vld [vmem:[%s10264_s0 + $0x370] ss:$36 sps:$4 sm:$0xff]  }
 0x5d4   :  { %6693 = vmatpush1.bf16.msra.mxu1 %v9149_v59  ;;  %6275 = vmatprep.subr.bf16.mxu0 %v4416_v39  ;;  %v7192_v39 = vld [vmem:[%s10264_s0 + $0x404] ss:$36 sps:$4 sm:$0xff]  }
 0x5d5   :  { %6678 = vmatprep.subr.bf16.mxu1 %v9165_v35  ;;  %v7126_v35 = vld [vmem:[%s10264_s0 + $0x170] ss:$36 sps:$4 sm:$0xff]  }
 0x5d6   :  { %v4387_v29 = vpop.permute.xlu1 %4386 }
 0x5d7   :  { %v4415_v4 = vsel %vm4404_vm8, %v4387_v29, %v4389_v0  ;;  %5759 = vmatmul.mubr.bf16.gmra.mrb[16].mxu1 %v7120_v34  ;;  %v4403_v3 = vpop.permute.xlu0 %4402  ;;  %v7191_v0 = vld [vmem:[%s10264_s0 + $0x458] ss:$36 sps:$4 sm:$0xff]   ;;  %v7194_v34 = vld [vmem:[%s10264_s0 + $0x400] ss:$36 sps:$4 sm:$0xff]  }
 0x5d8   :  { %6694 = vmatpush1.bf16.msra.mxu1 %v9173_v5  ;;  %6276 = vmatpush1.bf16.msra.mxu0 %v4415_v4  ;;  %v7128_v5 = vld [vmem:[%s10264_s0 + $0x1bc] ss:$36 sps:$4 sm:$0xff]  }
 0x5d9   :  { %6679 = vmatprep.subr.bf16.mxu1 %v9187_v7  ;;  %5768 = vmatprep.mubr.bf16.mxu1 %v7122_v12  ;;  %v7197_v12 = vld [vmem:[%s10264_s0 + $0x448] ss:$36 sps:$4 sm:$0xff]  }
 0x5da   :  { %v4397_v23 = vpop.permute.xlu1 %4396 }
 0x5db   :  { %v4418_v59 = vsel %vm4404_vm8, %v4395_v44, %v4397_v23  ;;  %v7190_v44 = vld [vmem:[%s10264_s0 + $0x3b8] ss:$36 sps:$4 sm:$0xff]  }
 0x5dc   :  { %6695 = vmatpush1.bf16.msra.mxu1 %v9195_v51  ;;  %6277 = vmatprep.subr.bf16.mxu0 %v4418_v59 }
 0x5dd   :  { %6680 = vmatprep.subr.bf16.mxu1 %v9209_v50  ;;  %6278 = vmatpush1.bf16.msra.mxu0 %v4417_v28  ;;  %v7130_v50 = vld [vmem:[%s10264_s0 + $0x1b8] ss:$36 sps:$4 sm:$0xff]  }
 0x5de   :  { %v4401_v7 = vpop.permute.xlu1 %4400 }
 0x5df   :  { %5769 = vmatmul.mubr.bf16.gmra.mrb[20].mxu1 %v7126_v35  ;;  %v4420_v38 = vsel %vm4404_vm8, %v4401_v7, %v4403_v3 }
 0x5e0   :  { %6696 = vmatpush1.bf16.msra.mxu1 %v9220_v10  ;;  %6279 = vmatprep.subr.bf16.mxu0 %v4420_v38  ;;  %v7132_v10 = vld [vmem:[%s10264_s0 + $0x204] ss:$36 sps:$4 sm:$0xff]  }
 0x5e1   :  { %6681 = vmatprep.subr.bf16.mxu1 %v9236_v46  ;;  %5778 = vmatprep.mubr.bf16.mxu1 %v7128_v5  ;;  %v7134_v46 = vld [vmem:[%s10264_s0 + $0x200] ss:$36 sps:$4 sm:$0xff]  }
 0x5e2   :  { %v4399_v51 = vpop.permute.xlu1 %4398 }
 0x5e3   :  { %v4419_v8 = vsel %vm4404_vm8, %v4399_v51, %v4401_v7 }
 0x5e4   :  { %6697 = vmatpush1.bf16.msra.mxu1 %v9246_v57  ;;  %6280 = vmatpush1.bf16.msra.mxu0 %v4419_v8  ;;  %v7135_v57 = vld [vmem:[%s10264_s0 + $0x68] ss:$36 sps:$4 sm:$0xff]  }
 0x5e5   :  { %6682 = vmatprep.subr.bf16.mxu1 %v9262_v61  ;;  %v7136_v61 = vld [vmem:[%s10264_s0 + $0x24c] ss:$36 sps:$4 sm:$0xff]  }
 0x5e7   :  { %5779 = vmatmul.mubr.bf16.gmra.mrb[24].mxu1 %v7130_v50  ;;  %6298 = vmatmul.mubr.bf16.vlgmr.msra.gmra.mrb[0].mxu0 %v7131_v47 }
 0x5e8   :  { %6698 = vmatpush1.bf16.msra.mxu1 %v9274_v9  ;;  %5788 = vmatprep.mubr.bf16.mxu1 %v7132_v10  ;;  %v7138_v9 = vld [vmem:[%s10264_s0 + $0x248] ss:$36 sps:$4 sm:$0xff]  }
 0x5e9   :  { %6683 = vmatprep.subr.bf16.mxu1 %v9292_v19  ;;  %6307 = vmatprep.mubr.bf16.mxu0 %v7231_v24  ;;  %v7139_v19 = vld [vmem:[%s10264_s0 + $0xb0] ss:$36 sps:$4 sm:$0xff]  }
 0x5ec   :  { %6699 = vmatpush1.bf16.msra.mxu1 %v9304_v1  ;;  %v7140_v1 = vld [vmem:[%s10264_s0 + $0x294] ss:$36 sps:$4 sm:$0xff]  }
 0x5ed   :  { %6684 = vmatprep.subr.bf16.mxu1 %v9320_v63  ;;  %v7142_v63 = vld [vmem:[%s10264_s0 + $0x290] ss:$36 sps:$4 sm:$0xff]  }
 0x5ef   :  { %5789 = vmatmul.mubr.bf16.gmra.mrb[28].mxu1 %v7134_v46  ;;  %6308 = vmatmul.mubr.bf16.gmra.mrb[4].mxu0 %v7135_v57 }
 0x5f0   :  { %6700 = vmatpush1.bf16.msra.mxu1 %v9328_v58  ;;  %5798 = vmatprep.mubr.bf16.mxu1 %v7136_v61  ;;  %v7143_v58 = vld [vmem:[%s10264_s0 + $0xf8] ss:$36 sps:$4 sm:$0xff]  }
 0x5f1   :  { %6685 = vmatprep.subr.bf16.mxu1 %v9348_v13  ;;  %6317 = vmatprep.mubr.bf16.mxu0 %v7231_v24  ;;  %v7144_v13 = vld [vmem:[%s10264_s0 + $0x2dc] ss:$36 sps:$4 sm:$0xff]  }
 0x5f4   :  { %6701 = vmatpush1.bf16.msra.mxu1 %v9356_v17  ;;  %v7146_v17 = vld [vmem:[%s10264_s0 + $0x2d8] ss:$36 sps:$4 sm:$0xff]  }
 0x5f7   :  { %5799 = vmatmul.mubr.bf16.gmra.mrb[32].mxu1 %v7138_v9  ;;  %6318 = vmatmul.mubr.bf16.gmra.mrb[8].mxu0 %v7139_v19 }
 0x5f8   :  { %5808 = vmatprep.mubr.bf16.mxu1 %v7140_v1  ;;  %6327 = vmatprep.mubr.bf16.mxu0 %v7231_v24 }
 0x5ff   :  { %5809 = vmatmul.mubr.bf16.gmra.mrb[36].mxu1 %v7142_v63  ;;  %6328 = vmatmul.mubr.bf16.gmra.mrb[12].mxu0 %v7143_v58 }
 0x600   :  { %5818 = vmatprep.mubr.bf16.mxu1 %v7144_v13  ;;  %6337 = vmatprep.mubr.bf16.mxu0 %v7231_v24 }
 0x607   :  { %5819 = vmatmul.mubr.bf16.gmra.mrb[40].mxu1 %v7146_v17  ;;  %6338 = vmatmul.mubr.bf16.gmra.mrb[16].mxu0 %v7147_v6 }
 0x608   :  { %5828 = vmatprep.mubr.bf16.mxu1 %v7148_v14  ;;  %6347 = vmatprep.mubr.bf16.mxu0 %v7231_v24 }
 0x60f   :  { %5829 = vmatmul.mubr.bf16.gmra.mrb[44].mxu1 %v7150_v22  ;;  %6348 = vmatmul.mubr.bf16.gmra.mrb[20].mxu0 %v7151_v25 }
 0x610   :  { %5838 = vmatprep.mubr.bf16.mxu1 %v7152_v31  ;;  %6357 = vmatprep.mubr.bf16.mxu0 %v7231_v24 }
 0x617   :  { %5839 = vmatmul.mubr.bf16.gmra.mrb[48].mxu1 %v7154_v11  ;;  %6358 = vmatmul.mubr.bf16.gmra.mrb[24].mxu0 %v7155_v30 }
 0x618   :  { %5848 = vmatprep.mubr.bf16.mxu1 %v7156_v49  ;;  %6367 = vmatprep.mubr.bf16.mxu0 %v7231_v24 }
 0x61f   :  { %5849 = vmatmul.mubr.bf16.gmra.mrb[52].mxu1 %v7158_v41  ;;  %6368 = vmatmul.mubr.bf16.gmra.mrb[28].mxu0 %v7159_v36 }
 0x620   :  { %5858 = vmatprep.mubr.bf16.mxu1 %v7160_v33  ;;  %6377 = vmatprep.mubr.bf16.mxu0 %v7231_v24 }
 0x627   :  { %5859 = vmatmul.mubr.bf16.gmra.mrb[56].mxu1 %v7162_v54  ;;  %6378 = vmatmul.mubr.bf16.gmra.mrb[32].mxu0 %v7163_v60 }
 0x628   :  { %5868 = vmatprep.mubr.bf16.mxu1 %v7164_v20  ;;  %6387 = vmatprep.mubr.bf16.mxu0 %v7231_v24 }
 0x62f   :  { %5869 = vmatmul.mubr.bf16.gmra.mrb[60].mxu1 %v7166_v21  ;;  %6388 = vmatmul.mubr.bf16.gmra.mrb[36].mxu0 %v7167_v48 }
 0x630   :  { %5991 = vmatprep.mubr.bf16.mxu1 %v7170_v2  ;;  %6397 = vmatprep.mubr.bf16.mxu0 %v7231_v24 }
 0x637   :  { %5992 = vmatmul.mubr.bf16.vlgmr.msra.gmra.mrb[32].mxu1 %v7168_v27  ;;  %6398 = vmatmul.mubr.bf16.gmra.mrb[40].mxu0 %v7171_v15 }
 0x638   :  { %6001 = vmatprep.mubr.bf16.mxu1 %v7172_v45  ;;  %6407 = vmatprep.mubr.bf16.mxu0 %v7231_v24 }
 0x63f   :  { %6002 = vmatmul.mubr.bf16.gmra.mrb[36].mxu1 %v7174_v55  ;;  %6408 = vmatmul.mubr.bf16.gmra.mrb[44].mxu0 %v7175_v62 }
 0x640   :  { %6011 = vmatprep.mubr.bf16.mxu1 %v7176_v16  ;;  %6417 = vmatprep.mubr.bf16.mxu0 %v7231_v24 }
 0x647   :  { %6012 = vmatmul.mubr.bf16.gmra.mrb[40].mxu1 %v7178_v40  ;;  %6418 = vmatmul.mubr.bf16.gmra.mrb[48].mxu0 %v7179_v43 }
 0x648   :  { %6021 = vmatprep.mubr.bf16.mxu1 %v7180_v37  ;;  %6427 = vmatprep.mubr.bf16.mxu0 %v7231_v24 }
 0x64f   :  { %6022 = vmatmul.mubr.bf16.gmra.mrb[44].mxu1 %v7182_v53  ;;  %6428 = vmatmul.mubr.bf16.gmra.mrb[52].mxu0 %v7183_v18 }
 0x650   :  { %6031 = vmatprep.mubr.bf16.mxu1 %v7184_v56  ;;  %6437 = vmatprep.mubr.bf16.mxu0 %v7231_v24 }
 0x657   :  { %6032 = vmatmul.mubr.bf16.gmra.mrb[48].mxu1 %v7186_v26  ;;  %6438 = vmatmul.mubr.bf16.gmra.mrb[56].mxu0 %v7187_v42 }
 0x658   :  { %6041 = vmatprep.mubr.bf16.mxu1 %v7188_v52  ;;  %6447 = vmatprep.mubr.bf16.mxu0 %v7231_v24  ;;  %v7195_v24 = vld [vmem:[%s10264_s0 + $0x44c] ss:$36 sps:$4 sm:$0xff]  }
 0x65f   :  { %6042 = vmatmul.mubr.bf16.gmra.mrb[52].mxu1 %v7190_v44  ;;  %6448 = vmatmul.mubr.bf16.gmra.mrb[60].mxu0 %v7191_v0 }
 0x660   :  { %6051 = vmatprep.mubr.bf16.mxu1 %v7192_v39 }
 0x667   :  { %6052 = vmatmul.mubr.bf16.gmra.mrb[56].mxu1 %v7194_v34 }
 0x668   :  { %6061 = vmatprep.mubr.bf16.mxu1 %v7195_v24 }
 0x66f   :  { %6062 = vmatmul.mubr.bf16.gmra.mrb[60].mxu1 %v7197_v12 }
 0x68a   :  { %v5720_v29 = vpop.f32.mrb[0].mxu1 }
 0x68b   :  { %v5722_v4 = vpop.f32.mrb[1].mxu1 }
 0x68c   :  { %v5724_v32 = vpop.f32.mrb[2].mxu1 }
 0x68d   :  { %v5726_v23 = vpop.f32.mrb[3].mxu1 }
 0x692   :  { %v5730_v59 = vpop.f32.mrb[4].mxu1 }
 0x693   :  { %v5732_v35 = vpop.f32.mrb[5].mxu1 }
 0x694   :  { %v5734_v28 = vpop.f32.mrb[6].mxu1 }
 0x695   :  { %v5736_v3 = vpop.f32.mrb[7].mxu1 }
 0x69a   :  { %v5740_v5 = vpop.f32.mrb[8].mxu1 }
 0x69b   :  { %v5742_v7 = vpop.f32.mrb[9].mxu1 }
 0x69c   :  { %v5744_v38 = vpop.f32.mrb[10].mxu1 }
 0x69d   :  { %v5746_v51 = vpop.f32.mrb[11].mxu1 }
 0x6a2   :  { %v5750_v8 = vpop.f32.mrb[12].mxu1 }
 0x6a3   :  { %v5752_v50 = vpop.f32.mrb[13].mxu1 }
 0x6a4   :  { %v5754_v47 = vpop.f32.mrb[14].mxu1 }
 0x6a5   :  { %v10020_v10 = vpop.f32.mrb[15].mxu1 }
 0x6aa   :  { %v10022_v46 = vpop.f32.mrb[16].mxu1 }
 0x6ab   :  { %v10024_v57 = vpop.f32.mrb[17].mxu1 }
 0x6ac   :  { %v10026_v61 = vpop.f32.mrb[18].mxu1 }
 0x6ad   :  { %v10028_v9 = vpop.f32.mrb[19].mxu1 }
 0x6b2   :  { %v10030_v19 = vpop.f32.mrb[20].mxu1 }
 0x6b3   :  { %v10032_v1 = vpop.f32.mrb[21].mxu1 }
 0x6b4   :  { %v10034_v63 = vpop.f32.mrb[22].mxu1 }
 0x6b5   :  { %v10036_v58 = vpop.f32.mrb[23].mxu1 }
 0x6ba   :  { %v10038_v13 = vpop.f32.mrb[24].mxu1  ;;  %v6299_v17 = vpop.f32.mrb[0].mxu0 }
 0x6bb   :  { %v6702_v6 = vadd.f32 %v6299_v17, %v5720_v29  ;;  %v10040_v14 = vpop.f32.mrb[25].mxu1  ;;  %v6301_v22 = vpop.f32.mrb[1].mxu0 }
 0x6bc   :  { %v6703_v25 = vadd.f32 %v6301_v22, %v5722_v4  ;;  %v10042_v31 = vpop.f32.mrb[26].mxu1  ;;  %v6303_v11 = vpop.f32.mrb[2].mxu0 }
 0x6bd   :  { %6458 = vst [vmem:[%s10265_s2] sm:$0xff] %v6702_v6  ;;  %v6704_v30 = vadd.f32 %v6303_v11, %v5724_v32  ;;  %v10047_v49 = vpop.f32.mrb[27].mxu1  ;;  %v6305_v41 = vpop.f32.mrb[3].mxu0 }
 0x6be   :  { %6459 = vst [vmem:[%s10265_s2 + $0x8] sm:$0xff] %v6703_v25  ;;  %v6705_v36 = vadd.f32 %v6305_v41, %v5726_v23 }
 0x6bf   :  { %6460 = vst [vmem:[%s10265_s2 + $0x10] sm:$0xff] %v6704_v30 }
 0x6c0   :  { %6461 = vst [vmem:[%s10265_s2 + $0x18] sm:$0xff] %v6705_v36 }
 0x6c2   :  { %v10058_v33 = vpop.f32.mrb[28].mxu1  ;;  %v6309_v54 = vpop.f32.mrb[4].mxu0 }
 0x6c3   :  { %v6706_v60 = vadd.f32 %v6309_v54, %v5730_v59  ;;  %v10060_v20 = vpop.f32.mrb[29].mxu1  ;;  %v6311_v21 = vpop.f32.mrb[5].mxu0 }
 0x6c4   :  { %v6707_v48 = vadd.f32 %v6311_v21, %v5732_v35  ;;  %v10062_v2 = vpop.f32.mrb[30].mxu1  ;;  %v6313_v27 = vpop.f32.mrb[6].mxu0 }
 0x6c5   :  { %6462 = vst [vmem:[%s10265_s2 + $0x20] sm:$0xff] %v6706_v60  ;;  %v6708_v15 = vadd.f32 %v6313_v27, %v5734_v28  ;;  %v10067_v45 = vpop.f32.mrb[31].mxu1  ;;  %v6315_v55 = vpop.f32.mrb[7].mxu0 }
 0x6c6   :  { %6463 = vst [vmem:[%s10265_s2 + $0x28] sm:$0xff] %v6707_v48  ;;  %v6709_v62 = vadd.f32 %v6315_v55, %v5736_v3 }
 0x6c7   :  { %6464 = vst [vmem:[%s10265_s2 + $0x30] sm:$0xff] %v6708_v15 }
 0x6c8   :  { %6465 = vst [vmem:[%s10265_s2 + $0x38] sm:$0xff] %v6709_v62 }
 0x6ca   :  { %v6319_v16 = vpop.f32.mrb[8].mxu0 }
 0x6cb   :  { %v6710_v40 = vadd.f32 %v6319_v16, %v5740_v5  ;;  %v6321_v43 = vpop.f32.mrb[9].mxu0 }
 0x6cc   :  { %v6711_v37 = vadd.f32 %v6321_v43, %v5742_v7  ;;  %v6323_v53 = vpop.f32.mrb[10].mxu0 }
 0x6cd   :  { %6466 = vst [vmem:[%s10265_s2 + $0x40] sm:$0xff] %v6710_v40  ;;  %v6712_v18 = vadd.f32 %v6323_v53, %v5744_v38  ;;  %v6325_v56 = vpop.f32.mrb[11].mxu0 }
 0x6ce   :  { %6467 = vst [vmem:[%s10265_s2 + $0x48] sm:$0xff] %v6711_v37  ;;  %v6713_v26 = vadd.f32 %v6325_v56, %v5746_v51 }
 0x6cf   :  { %6468 = vst [vmem:[%s10265_s2 + $0x50] sm:$0xff] %v6712_v18 }
 0x6d0   :  { %6469 = vst [vmem:[%s10265_s2 + $0x58] sm:$0xff] %v6713_v26 }
 0x6d2   :  { %v6329_v42 = vpop.f32.mrb[12].mxu0 }
 0x6d3   :  { %v6714_v52 = vadd.f32 %v6329_v42, %v5750_v8  ;;  %v6331_v44 = vpop.f32.mrb[13].mxu0 }
 0x6d4   :  { %v6715_v0 = vadd.f32 %v6331_v44, %v5752_v50  ;;  %v6333_v39 = vpop.f32.mrb[14].mxu0 }
 0x6d5   :  { %6470 = vst [vmem:[%s10265_s2 + $0x60] sm:$0xff] %v6714_v52  ;;  %v6716_v34 = vadd.f32 %v6333_v39, %v5754_v47  ;;  %v6335_v24 = vpop.f32.mrb[15].mxu0 }
 0x6d6   :  { %6471 = vst [vmem:[%s10265_s2 + $0x68] sm:$0xff] %v6715_v0  ;;  %v6717_v12 = vadd.f32 %v6335_v24, %v10020_v10 }
 0x6d7   :  { %6472 = vst [vmem:[%s10265_s2 + $0x70] sm:$0xff] %v6716_v34 }
 0x6d8   :  { %6473 = vst [vmem:[%s10265_s2 + $0x78] sm:$0xff] %v6717_v12 }
 0x6da   :  { %v6339_v29 = vpop.f32.mrb[16].mxu0 }
 0x6db   :  { %v6718_v4 = vadd.f32 %v6339_v29, %v10022_v46  ;;  %v6341_v32 = vpop.f32.mrb[17].mxu0 }
 0x6dc   :  { %v6719_v23 = vadd.f32 %v6341_v32, %v10024_v57  ;;  %v6343_v59 = vpop.f32.mrb[18].mxu0 }
 0x6dd   :  { %6474 = vst [vmem:[%s10265_s2 + $0x80] sm:$0xff] %v6718_v4  ;;  %v6720_v35 = vadd.f32 %v6343_v59, %v10026_v61  ;;  %v6345_v28 = vpop.f32.mrb[19].mxu0 }
 0x6de   :  { %6475 = vst [vmem:[%s10265_s2 + $0x88] sm:$0xff] %v6719_v23  ;;  %v6721_v3 = vadd.f32 %v6345_v28, %v10028_v9 }
 0x6df   :  { %6476 = vst [vmem:[%s10265_s2 + $0x90] sm:$0xff] %v6720_v35 }
 0x6e0   :  { %6477 = vst [vmem:[%s10265_s2 + $0x98] sm:$0xff] %v6721_v3 }
 0x6e2   :  { %v6349_v5 = vpop.f32.mrb[20].mxu0 }
 0x6e3   :  { %v6722_v7 = vadd.f32 %v6349_v5, %v10030_v19  ;;  %v6351_v38 = vpop.f32.mrb[21].mxu0 }
 0x6e4   :  { %v6723_v51 = vadd.f32 %v6351_v38, %v10032_v1  ;;  %v6353_v8 = vpop.f32.mrb[22].mxu0 }
 0x6e5   :  { %6478 = vst [vmem:[%s10265_s2 + $0xa0] sm:$0xff] %v6722_v7  ;;  %v6724_v50 = vadd.f32 %v6353_v8, %v10034_v63  ;;  %v6355_v47 = vpop.f32.mrb[23].mxu0 }
 0x6e6   :  { %6479 = vst [vmem:[%s10265_s2 + $0xa8] sm:$0xff] %v6723_v51  ;;  %v6725_v10 = vadd.f32 %v6355_v47, %v10036_v58 }
 0x6e7   :  { %6480 = vst [vmem:[%s10265_s2 + $0xb0] sm:$0xff] %v6724_v50 }
 0x6e8   :  { %6481 = vst [vmem:[%s10265_s2 + $0xb8] sm:$0xff] %v6725_v10 }
 0x6ea   :  { %v6359_v46 = vpop.f32.mrb[24].mxu0 }
 0x6eb   :  { %v6726_v57 = vadd.f32 %v6359_v46, %v10038_v13  ;;  %v6361_v61 = vpop.f32.mrb[25].mxu0 }
 0x6ec   :  { %v6727_v9 = vadd.f32 %v6361_v61, %v10040_v14  ;;  %v6363_v19 = vpop.f32.mrb[26].mxu0 }
 0x6ed   :  { %6482 = vst [vmem:[%s10265_s2 + $0xc0] sm:$0xff] %v6726_v57  ;;  %v6728_v1 = vadd.f32 %v6363_v19, %v10042_v31  ;;  %v6365_v63 = vpop.f32.mrb[27].mxu0 }
 0x6ee   :  { %6483 = vst [vmem:[%s10265_s2 + $0xc8] sm:$0xff] %v6727_v9  ;;  %v6729_v58 = vadd.f32 %v6365_v63, %v10047_v49 }
 0x6ef   :  { %6484 = vst [vmem:[%s10265_s2 + $0xd0] sm:$0xff] %v6728_v1 }
 0x6f0   :  { %6485 = vst [vmem:[%s10265_s2 + $0xd8] sm:$0xff] %v6729_v58 }
 0x6f2   :  { %v6369_v13 = vpop.f32.mrb[28].mxu0 }
 0x6f3   :  { %v6730_v17 = vadd.f32 %v6369_v13, %v10058_v33  ;;  %v6371_v6 = vpop.f32.mrb[29].mxu0 }
 0x6f4   :  { %v6731_v14 = vadd.f32 %v6371_v6, %v10060_v20  ;;  %v6373_v22 = vpop.f32.mrb[30].mxu0 }
 0x6f5   :  { %6486 = vst [vmem:[%s10265_s2 + $0xe0] sm:$0xff] %v6730_v17  ;;  %v6732_v25 = vadd.f32 %v6373_v22, %v10062_v2  ;;  %v6375_v31 = vpop.f32.mrb[31].mxu0 }
 0x6f6   :  { %6487 = vst [vmem:[%s10265_s2 + $0xe8] sm:$0xff] %v6731_v14  ;;  %v6733_v11 = vadd.f32 %v6375_v31, %v10067_v45 }
 0x6f7   :  { %6488 = vst [vmem:[%s10265_s2 + $0xf0] sm:$0xff] %v6732_v25 }
 0x6f8   :  { %6489 = vst [vmem:[%s10265_s2 + $0xf8] sm:$0xff] %v6733_v11 }
 0x6fa   :  { %v6379_v30 = vpop.f32.mrb[32].mxu0 }
 0x6fb   :  { %v6381_v49 = vpop.f32.mrb[33].mxu0 }
 0x6fc   :  { %v6383_v41 = vpop.f32.mrb[34].mxu0 }
 0x6fd   :  { %v6385_v36 = vpop.f32.mrb[35].mxu0 }
 0x702   :  { %v6389_v33 = vpop.f32.mrb[36].mxu0 }
 0x703   :  { %v6391_v54 = vpop.f32.mrb[37].mxu0 }
 0x704   :  { %v6393_v60 = vpop.f32.mrb[38].mxu0 }
 0x705   :  { %v6395_v20 = vpop.f32.mrb[39].mxu0 }
 0x70a   :  { %v5993_v21 = vpop.f32.mrb[32].mxu1  ;;  %v6399_v48 = vpop.f32.mrb[40].mxu0 }
 0x70b   :  { %v6734_v2 = vadd.f32 %v6379_v30, %v5993_v21  ;;  %v5995_v27 = vpop.f32.mrb[33].mxu1  ;;  %v6401_v15 = vpop.f32.mrb[41].mxu0 }
 0x70c   :  { %v6735_v45 = vadd.f32 %v6381_v49, %v5995_v27  ;;  %v5997_v55 = vpop.f32.mrb[34].mxu1  ;;  %v6403_v62 = vpop.f32.mrb[42].mxu0 }
 0x70d   :  { %6490 = vst [vmem:[%s10265_s2 + $0x100] sm:$0xff] %v6734_v2  ;;  %v6736_v16 = vadd.f32 %v6383_v41, %v5997_v55  ;;  %v5999_v40 = vpop.f32.mrb[35].mxu1  ;;  %v6405_v43 = vpop.f32.mrb[43].mxu0 }
 0x70e   :  { %6491 = vst [vmem:[%s10265_s2 + $0x108] sm:$0xff] %v6735_v45  ;;  %v6737_v37 = vadd.f32 %v6385_v36, %v5999_v40 }
 0x70f   :  { %6492 = vst [vmem:[%s10265_s2 + $0x110] sm:$0xff] %v6736_v16 }
 0x710   :  { %6493 = vst [vmem:[%s10265_s2 + $0x118] sm:$0xff] %v6737_v37 }
 0x712   :  { %v6003_v53 = vpop.f32.mrb[36].mxu1  ;;  %v6409_v18 = vpop.f32.mrb[44].mxu0 }
 0x713   :  { %v6738_v56 = vadd.f32 %v6389_v33, %v6003_v53  ;;  %v6005_v26 = vpop.f32.mrb[37].mxu1  ;;  %v6411_v42 = vpop.f32.mrb[45].mxu0 }
 0x714   :  { %v6739_v52 = vadd.f32 %v6391_v54, %v6005_v26  ;;  %v6007_v44 = vpop.f32.mrb[38].mxu1  ;;  %v6413_v0 = vpop.f32.mrb[46].mxu0 }
 0x715   :  { %6494 = vst [vmem:[%s10265_s2 + $0x120] sm:$0xff] %v6738_v56  ;;  %v6740_v39 = vadd.f32 %v6393_v60, %v6007_v44  ;;  %v6009_v34 = vpop.f32.mrb[39].mxu1  ;;  %v6415_v24 = vpop.f32.mrb[47].mxu0 }
 0x716   :  { %6495 = vst [vmem:[%s10265_s2 + $0x128] sm:$0xff] %v6739_v52  ;;  %v6741_v12 = vadd.f32 %v6395_v20, %v6009_v34 }
 0x717   :  { %6496 = vst [vmem:[%s10265_s2 + $0x130] sm:$0xff] %v6740_v39 }
 0x718   :  { %6497 = vst [vmem:[%s10265_s2 + $0x138] sm:$0xff] %v6741_v12 }
 0x71a   :  { %v6013_v29 = vpop.f32.mrb[40].mxu1  ;;  %v6419_v4 = vpop.f32.mrb[48].mxu0 }
 0x71b   :  { %v6742_v32 = vadd.f32 %v6399_v48, %v6013_v29  ;;  %v6015_v23 = vpop.f32.mrb[41].mxu1  ;;  %v6421_v59 = vpop.f32.mrb[49].mxu0 }
 0x71c   :  { %v6743_v35 = vadd.f32 %v6401_v15, %v6015_v23  ;;  %v6017_v28 = vpop.f32.mrb[42].mxu1  ;;  %v6423_v3 = vpop.f32.mrb[50].mxu0 }
 0x71d   :  { %6498 = vst [vmem:[%s10265_s2 + $0x140] sm:$0xff] %v6742_v32  ;;  %v6744_v5 = vadd.f32 %v6403_v62, %v6017_v28  ;;  %v6019_v7 = vpop.f32.mrb[43].mxu1  ;;  %v6425_v38 = vpop.f32.mrb[51].mxu0 }
 0x71e   :  { %6499 = vst [vmem:[%s10265_s2 + $0x148] sm:$0xff] %v6743_v35  ;;  %v6745_v51 = vadd.f32 %v6405_v43, %v6019_v7 }
 0x71f   :  { %6500 = vst [vmem:[%s10265_s2 + $0x150] sm:$0xff] %v6744_v5 }
 0x720   :  { %6501 = vst [vmem:[%s10265_s2 + $0x158] sm:$0xff] %v6745_v51 }
 0x722   :  { %v6023_v8 = vpop.f32.mrb[44].mxu1  ;;  %v6429_v50 = vpop.f32.mrb[52].mxu0 }
 0x723   :  { %v6746_v47 = vadd.f32 %v6409_v18, %v6023_v8  ;;  %v6025_v10 = vpop.f32.mrb[45].mxu1  ;;  %v6431_v46 = vpop.f32.mrb[53].mxu0 }
 0x724   :  { %v6747_v57 = vadd.f32 %v6411_v42, %v6025_v10  ;;  %v6027_v61 = vpop.f32.mrb[46].mxu1  ;;  %v6433_v9 = vpop.f32.mrb[54].mxu0 }
 0x725   :  { %6502 = vst [vmem:[%s10265_s2 + $0x160] sm:$0xff] %v6746_v47  ;;  %v6748_v19 = vadd.f32 %v6413_v0, %v6027_v61  ;;  %v6029_v1 = vpop.f32.mrb[47].mxu1  ;;  %v6435_v63 = vpop.f32.mrb[55].mxu0 }
 0x726   :  { %6503 = vst [vmem:[%s10265_s2 + $0x168] sm:$0xff] %v6747_v57  ;;  %v6749_v58 = vadd.f32 %v6415_v24, %v6029_v1 }
 0x727   :  { %6504 = vst [vmem:[%s10265_s2 + $0x170] sm:$0xff] %v6748_v19 }
 0x728   :  { %6505 = vst [vmem:[%s10265_s2 + $0x178] sm:$0xff] %v6749_v58 }
 0x72a   :  { %v6033_v13 = vpop.f32.mrb[48].mxu1  ;;  %v6439_v17 = vpop.f32.mrb[56].mxu0 }
 0x72b   :  { %v6750_v6 = vadd.f32 %v6419_v4, %v6033_v13  ;;  %v6035_v14 = vpop.f32.mrb[49].mxu1  ;;  %v6441_v22 = vpop.f32.mrb[57].mxu0 }
 0x72c   :  { %v6751_v25 = vadd.f32 %v6421_v59, %v6035_v14  ;;  %v6037_v31 = vpop.f32.mrb[50].mxu1  ;;  %v6443_v11 = vpop.f32.mrb[58].mxu0 }
 0x72d   :  { %6506 = vst [vmem:[%s10265_s2 + $0x180] sm:$0xff] %v6750_v6  ;;  %v6752_v30 = vadd.f32 %v6423_v3, %v6037_v31  ;;  %v6039_v49 = vpop.f32.mrb[51].mxu1  ;;  %v6445_v41 = vpop.f32.mrb[59].mxu0 }
 0x72e   :  { %6507 = vst [vmem:[%s10265_s2 + $0x188] sm:$0xff] %v6751_v25  ;;  %v6753_v36 = vadd.f32 %v6425_v38, %v6039_v49 }
 0x72f   :  { %6508 = vst [vmem:[%s10265_s2 + $0x190] sm:$0xff] %v6752_v30 }
 0x730   :  { %6509 = vst [vmem:[%s10265_s2 + $0x198] sm:$0xff] %v6753_v36 }
 0x732   :  { %v6043_v33 = vpop.f32.mrb[52].mxu1  ;;  %v6449_v54 = vpop.f32.mrb[60].mxu0 }
 0x733   :  { %v6754_v60 = vadd.f32 %v6429_v50, %v6043_v33  ;;  %v6045_v20 = vpop.f32.mrb[53].mxu1  ;;  %v6451_v21 = vpop.f32.mrb[61].mxu0 }
 0x734   :  { %v6755_v48 = vadd.f32 %v6431_v46, %v6045_v20  ;;  %v6047_v2 = vpop.f32.mrb[54].mxu1  ;;  %v6453_v27 = vpop.f32.mrb[62].mxu0 }
 0x735   :  { %6510 = vst [vmem:[%s10265_s2 + $0x1a0] sm:$0xff] %v6754_v60  ;;  %v6756_v15 = vadd.f32 %v6433_v9, %v6047_v2  ;;  %v6049_v45 = vpop.f32.mrb[55].mxu1  ;;  %v6455_v55 = vpop.f32.mrb[63].mxu0 }
 0x736   :  { %6511 = vst [vmem:[%s10265_s2 + $0x1a8] sm:$0xff] %v6755_v48  ;;  %v6757_v62 = vadd.f32 %v6435_v63, %v6049_v45 }
 0x737   :  { %6512 = vst [vmem:[%s10265_s2 + $0x1b0] sm:$0xff] %v6756_v15 }
 0x738   :  { %6513 = vst [vmem:[%s10265_s2 + $0x1b8] sm:$0xff] %v6757_v62 }
 0x73a   :  { %v6053_v16 = vpop.f32.mrb[56].mxu1 }
 0x73b   :  { %v6758_v40 = vadd.f32 %v6439_v17, %v6053_v16  ;;  %v6055_v43 = vpop.f32.mrb[57].mxu1 }
 0x73c   :  { %v6759_v37 = vadd.f32 %v6441_v22, %v6055_v43  ;;  %v6057_v53 = vpop.f32.mrb[58].mxu1 }
 0x73d   :  { %6514 = vst [vmem:[%s10265_s2 + $0x1c0] sm:$0xff] %v6758_v40  ;;  %v6760_v18 = vadd.f32 %v6443_v11, %v6057_v53  ;;  %v6059_v56 = vpop.f32.mrb[59].mxu1 }
 0x73e   :  { %6515 = vst [vmem:[%s10265_s2 + $0x1c8] sm:$0xff] %v6759_v37  ;;  %v6761_v26 = vadd.f32 %v6445_v41, %v6059_v56 }
 0x73f   :  { %6516 = vst [vmem:[%s10265_s2 + $0x1d0] sm:$0xff] %v6760_v18 }
 0x740   :  { %6517 = vst [vmem:[%s10265_s2 + $0x1d8] sm:$0xff] %v6761_v26 }
 0x742   :  { %v6063_v42 = vpop.f32.mrb[60].mxu1 }
 0x743   :  { %v6762_v52 = vadd.f32 %v6449_v54, %v6063_v42  ;;  %v6065_v44 = vpop.f32.mrb[61].mxu1 }
 0x744   :  { %v6763_v0 = vadd.f32 %v6451_v21, %v6065_v44  ;;  %v6067_v39 = vpop.f32.mrb[62].mxu1 }
 0x745   :  { %6518 = vst [vmem:[%s10265_s2 + $0x1e0] sm:$0xff] %v6762_v52  ;;  %v6764_v34 = vadd.f32 %v6453_v27, %v6067_v39  ;;  %v6069_v24 = vpop.f32.mrb[63].mxu1 }
 0x746   :  { %6519 = vst [vmem:[%s10265_s2 + $0x1e8] sm:$0xff] %v6763_v0  ;;  %v6765_v12 = vadd.f32 %v6455_v55, %v6069_v24 }
 0x747   :  { %6520 = vst [vmem:[%s10265_s2 + $0x1f0] sm:$0xff] %v6764_v34 }
 0x748   :  { %6521 = vst [vmem:[%s10265_s2 + $0x1f8] sm:$0xff] %v6765_v12 }

</bundles_post_ra>
